<compile_context>
chip_gen: v7x
topology: tpu7x:2x2x1
jax: 0.10.0
libtpu: 0.0.40
codegen_flags: <defaults>
</compile_context>

<pallas_src>
import jax
import jax.numpy as jnp
from jax.experimental import pallas as pl
from jax.experimental.pallas import tpu as pltpu


# ----------------------------------------------------------------------------
# Output packing layout (single lane-dense [*, 128] slab)
# ----------------------------------------------------------------------------
N_SENT, N_RESP, N_CRISIS = 3, 2, 2
OFF_SENT = 0
OFF_RESP = OFF_SENT + N_SENT          # 3
OFF_CRISIS = OFF_RESP + N_RESP        # 5
OFF_ATTN = OFF_CRISIS + N_CRISIS      # 7
OUT_LANES = 128
HEAD_HIDDEN = 64


def _gelu(x):
    # tanh approximation (f32, EUP-friendly)
    c = 0.7978845608028654  # sqrt(2/pi)
    return 0.5 * x * (1.0 + jnp.tanh(c * (x + 0.044715 * x * x * x)))


def _layernorm(x, gamma, beta, eps=1e-5):
    # Single-pass LN: E[x] and E[x^2] computed together, var = E[x^2] - mu^2.
    mu = jnp.mean(x, axis=-1, keepdims=True)
    ex2 = jnp.mean(x * x, axis=-1, keepdims=True)
    var = ex2 - mu * mu
    return (x - mu) * jax.lax.rsqrt(var + eps) * gamma + beta


# ----------------------------------------------------------------------------
# Fused Pallas kernel: encoder layer + everything after sequence_output,
# for a block of Bt batch elements.
# ----------------------------------------------------------------------------
def fused_kernel(x_ref, kbias_ref, poolw_ref,
                 wqkv_ref, bqkv_ref, wo_ref, bo_ref, g1_ref, be1_ref,
                 wf1_ref, bf1_ref, wf2_ref, bf2_ref, g2_ref, be2_ref,
                 w1_ref, b1a_ref, w2a_ref, b2a_ref,
                 whead_ref, bhead_ref,
                 out_ref):
    f32 = jnp.float32
    bf16 = jnp.bfloat16

    x = x_ref[...]              # [Bt, S, H] f32 embeddings
    kb = kbias_ref[...]         # [Bt, 1, S] f32 additive key-mask bias (0 keep / -1e9 pad)
    poolw = poolw_ref[...]      # [Bt, 1, S] f32 reply-pooling weights (lane-dense)
    Bt, S, H = x.shape

    # Fold batch into rows so every dense matmul fills the MXU.
    xf = x.reshape(Bt * S, H)                                        # [Bt*S, H]

    # ---- fused QKV projection (Q columns pre-scaled by 1/sqrt(H)) ----------
    qkv = jnp.dot(xf.astype(bf16), wqkv_ref[...],
                  preferred_element_type=f32) + bqkv_ref[...]        # [Bt*S, 3H]
    q = qkv[:, 0:H].reshape(Bt, S, H)
    k = qkv[:, H:2 * H].reshape(Bt, S, H)
    v = qkv[:, 2 * H:3 * H].reshape(Bt, S, H)

    # ---- single-head self attention, batched over Bt (encoder stand-in) ----
    scores = jnp.einsum('bqd,bkd->bqk', q.astype(bf16), k.astype(bf16),
                        preferred_element_type=f32)                  # [Bt, S, S]
    scores = scores + kb                                             # mask padded keys (f32)
    mx = jnp.max(scores, axis=-1, keepdims=True)
    e = jnp.exp(scores - mx)
    # <s> token is always unmasked, so the denominator is never ~0.
    p = e * pl.reciprocal(jnp.sum(e, axis=-1, keepdims=True), approx=True)
    ctx = jnp.einsum('bqk,bkd->bqd', p.astype(bf16), v.astype(bf16),
                     preferred_element_type=f32)                     # [Bt, S, H]

    attn_out = jnp.dot(ctx.reshape(Bt * S, H).astype(bf16), wo_ref[...],
                       preferred_element_type=f32) + bo_ref[...]
    h = _layernorm(xf + attn_out, g1_ref[...], be1_ref[...])         # [Bt*S, H]

    # ---- FFN ----------------------------------------------------------------
    ff = _gelu(jnp.dot(h.astype(bf16), wf1_ref[...],
                       preferred_element_type=f32) + bf1_ref[...])
    ff = jnp.dot(ff.astype(bf16), wf2_ref[...],
                 preferred_element_type=f32) + bf2_ref[...]
    seqf = _layernorm(h + ff, g2_ref[...], be2_ref[...])             # sequence_output (folded)
    seq = seqf.reshape(Bt, S, H)

    # ---- multitask head -----------------------------------------------------
    history_rep = seq[:, 0, :]                                       # [Bt, H]  (<s> token)
    # Reply pooling: lane-dense [Bt,1,S] x [Bt,S,H] MXU dot (exact f32).
    reply_rep = jnp.einsum('bks,bsh->bkh', poolw, seq,
                           preferred_element_type=f32)[:, 0, :]      # [Bt, H]

    # attention_layer: Linear(2H, 64) -> Tanh -> Linear(64, 2); fused first layer,
    # 64 hidden zero-padded to 128 lanes.
    feats = jnp.concatenate([history_rep, reply_rep], axis=-1)       # [Bt, 2H]
    h1 = jnp.tanh(jnp.dot(feats.astype(bf16), w1_ref[...],
                          preferred_element_type=f32) + b1a_ref[...])    # [Bt, 128]
    sc2 = jnp.dot(h1.astype(bf16), w2a_ref[...],
                  preferred_element_type=f32) + b2a_ref[...]         # [Bt, 2]
    m2 = jnp.max(sc2, axis=-1, keepdims=True)
    e2 = jnp.exp(sc2 - m2)
    attn_w = e2 / jnp.sum(e2, axis=-1, keepdims=True)                # exact (returned to caller)

    combined = history_rep * attn_w[:, 0:1] + reply_rep * attn_w[:, 1:2]
    pooled = combined                    # dropout: eval-mode identity

    # packed task heads: whead = [W_sent | W_resp | W_crisis | zeros] -> [H, 128]
    logits = jnp.dot(pooled.astype(bf16), whead_ref[...],
                     preferred_element_type=f32) + bhead_ref[...]    # [Bt, 128]
    lane = jax.lax.broadcasted_iota(jnp.int32, (Bt, OUT_LANES), 1)
    packed = (logits
              + jnp.where(lane == OFF_ATTN, attn_w[:, 0:1], 0.0)
              + jnp.where(lane == OFF_ATTN + 1, attn_w[:, 1:2], 0.0))
    out_ref[...] = packed


# ----------------------------------------------------------------------------
# Pallas wrapper
# ----------------------------------------------------------------------------
_WEIGHT_NAMES = ('wqkv', 'bqkv', 'wo', 'bo', 'g1', 'be1',
                 'wf1', 'bf1', 'wf2', 'bf2', 'g2', 'be2',
                 'w1', 'b1a', 'w2a', 'b2a', 'whead', 'bhead')


def _pick_bt(B, S):
    # >=256 rows per step (v6e/v7x MXU depth; covers v5e's 128 too); one grid
    # step for small batches (v5e/v6e: fewer, fatter steps), and at large B this
    # yields >=2 "parallel" steps so v7x's two TensorCores both get work.
    return max(1, min(B, pl.cdiv(256, S)))


def fused_forward_call(x, kbias, poolw, params):
    B, S, H = x.shape
    bt = _pick_bt(B, S)
    nblk = pl.cdiv(B, bt)
    Bp = nblk * bt
    if Bp != B:  # pad batch to a multiple of Bt (padded rows are sliced off below)
        pad = Bp - B
        x = jnp.pad(x, ((0, pad), (0, 0), (0, 0)))
        kbias = jnp.pad(kbias, ((0, pad), (0, 0), (0, 0)))
        poolw = jnp.pad(poolw, ((0, pad), (0, 0), (0, 0)))

    weights = [params[n] for n in _WEIGHT_NAMES]

    # TODO(synk): at real RoBERTa sizes (H=768, F=3072, ~14 MiB bf16 weights) add
    #             pipeline_mode=pl.Buffered(1) to these constant-index weight specs
    #             to avoid double-buffering them against v7x's 64 MiB VMEM.
    def rep(shape):  # whole-array block, same block every grid step
        nd = len(shape)
        return pl.BlockSpec(shape, lambda b, _nd=nd: (0,) * _nd)

    in_specs = [
        pl.BlockSpec((bt, S, H), lambda b: (b, 0, 0)),   # embeddings
        pl.BlockSpec((bt, 1, S), lambda b: (b, 0, 0)),   # key-mask bias (lane-dense)
        pl.BlockSpec((bt, 1, S), lambda b: (b, 0, 0)),   # reply-pool weights (lane-dense)
    ] + [rep(w.shape) for w in weights]

    packed = pl.pallas_call(
        fused_kernel,
        out_shape=jax.ShapeDtypeStruct((nblk, bt, OUT_LANES), jnp.float32),
        grid=(nblk,),
        in_specs=in_specs,
        out_specs=pl.BlockSpec((None, bt, OUT_LANES), lambda b: (b, 0, 0)),
        compiler_params=pltpu.CompilerParams(
            dimension_semantics=("parallel",),
            vmem_limit_bytes=32 * 1024 * 1024),
    )(x, kbias, poolw, *weights)

    return packed.reshape(Bp, OUT_LANES)[:B]


@jax.jit
def multitask_forward(input_ids, attention_mask, current_token_id, params):
    B, S = input_ids.shape

    # ---- XLA glue: embedding lookup (stand-in for roberta embeddings) -------
    x = params['tok_emb'][input_ids] + params['pos_emb'][None, :S, :]   # [B,S,H] f32

    # ---- additive key mask for encoder attention -----------------------------
    kbias = ((attention_mask.astype(jnp.float32) - 1.0) * 1e9).reshape(B, 1, S)

    # ---- reply-pooling weights (data-dependent integer logic, cheap in XLA) --
    # Matches torch reference: mean of tokens strictly after [CURRENT] if present
    # (padding included, as in the reference), else mean of tokens after <s>;
    # last-token fallback when [CURRENT] is the final token.  Lane-dense [B,1,S].
    pos = jax.lax.broadcasted_iota(jnp.int32, (B, S), 1)
    is_cur = input_ids == current_token_id
    has_cur = jnp.any(is_cur, axis=1, keepdims=True)
    first_pos = jnp.min(jnp.where(is_cur, pos, S), axis=1, keepdims=True)
    mask_after = jnp.where(has_cur, pos > first_pos, pos >= 1).astype(jnp.float32)
    cnt = jnp.sum(mask_after, axis=1, keepdims=True)
    last_tok = (pos == S - 1).astype(jnp.float32)
    pool_w = jnp.where(cnt > 0.0, mask_after / jnp.maximum(cnt, 1.0), last_tok)
    pool_w = pool_w.reshape(B, 1, S)

    # ---- fused Pallas hot path ------------------------------------------------
    packed = fused_forward_call(x, kbias, pool_w, params)               # [B, 128]
    sentiment_logits = packed[:, OFF_SENT:OFF_SENT + N_SENT]
    response_logits = packed[:, OFF_RESP:OFF_RESP + N_RESP]
    crisis_logits = packed[:, OFF_CRISIS:OFF_CRISIS + N_CRISIS]
    attn_weights = packed[:, OFF_ATTN:OFF_ATTN + 2]
    return sentiment_logits, response_logits, crisis_logits, attn_weights


# ----------------------------------------------------------------------------
# Deterministic parameter construction (lane-dense / packed / bf16 MXU weights)
# ----------------------------------------------------------------------------
def make_params(key, vocab, S, H, F):
    ks = jax.random.split(key, 12)
    std = 0.02
    bf16 = jnp.bfloat16

    def w(k, shape):
        return jax.random.normal(k, shape, jnp.float32) * std

    # fused QKV; pre-scale the Q columns (and Q bias) by 1/sqrt(H) so the kernel
    # needs no per-step `scores * scale` multiply.
    wqkv = w(ks[2], (H, 3 * H))
    qk_scale = 1.0 / (float(H) ** 0.5)
    wqkv = wqkv.at[:, 0:H].multiply(qk_scale)
    bqkv = jnp.zeros((1, 3 * H), jnp.float32)   # zero; Q part would also be pre-scaled if nonzero

    # attention_layer Linear(2H,64)->Tanh->Linear(64,2), first layer fused & padded to 128 lanes
    w1h = w(ks[6], (H, HEAD_HIDDEN))
    w1r = w(ks[7], (H, HEAD_HIDDEN))
    w1 = jnp.concatenate([w1h, w1r], axis=0)                 # [2H, 64]
    w2 = w(ks[8], (HEAD_HIDDEN, 2))

    # three task heads packed into one lane-dense [H, 128] matrix (zero-padded)
    ws = w(ks[9], (H, N_SENT))
    wr = w(ks[10], (H, N_RESP))
    wc = w(ks[11], (H, N_CRISIS))
    whead = jnp.concatenate([ws, wr, wc], axis=1)            # [H, 7]

    return {
        # embedding glue (stays in XLA wrapper)
        'tok_emb': w(ks[0], (vocab, H)),
        'pos_emb': w(ks[1], (S, H)),
        # encoder layer (single-head stand-in); MXU weights stored bf16, fused QKV
        'wqkv': wqkv.astype(bf16),
        'bqkv': bqkv,
        'wo': w(ks[3], (H, H)).astype(bf16),
        'bo': jnp.zeros((1, H), jnp.float32),
        'g1': jnp.ones((1, H), jnp.float32), 'be1': jnp.zeros((1, H), jnp.float32),
        'wf1': w(ks[4], (H, F)).astype(bf16), 'bf1': jnp.zeros((1, F), jnp.float32),
        'wf2': w(ks[5], (F, H)).astype(bf16), 'bf2': jnp.zeros((1, H), jnp.float32),
        'g2': jnp.ones((1, H), jnp.float32), 'be2': jnp.zeros((1, H), jnp.float32),
        # multitask head
        'w1': jnp.pad(w1, ((0, 0), (0, OUT_LANES - HEAD_HIDDEN))).astype(bf16),
        'b1a': jnp.zeros((1, OUT_LANES), jnp.float32),
        'w2a': jnp.pad(w2, ((0, OUT_LANES - HEAD_HIDDEN), (0, 0))).astype(bf16),
        'b2a': jnp.zeros((1, 2), jnp.float32),
        'whead': jnp.pad(whead, ((0, 0), (0, OUT_LANES - whead.shape[1]))).astype(bf16),
        'bhead': jnp.zeros((1, OUT_LANES), jnp.float32),
    }


# ----------------------------------------------------------------------------
# Main
# ----------------------------------------------------------------------------
if __name__ == "__main__":
    B, S, H, F = 8, 8, 128, 512          # H/F lane-dense; Bt*S = 64 rows per grid step
    VOCAB = 64
    CURRENT_TOKEN_ID = 5

    key = jax.random.PRNGKey(0)
    k_param, k_ids = jax.random.split(key)
    params = make_params(k_param, VOCAB, S, H, F)

    # batch 0 has [CURRENT] mid-sequence, batch 2 has [CURRENT] as last token
    # (last-token fallback path), batch 1 has trailing padding, others neither.
    input_ids = jax.random.randint(k_ids, (B, S), 6, VOCAB, dtype=jnp.int32)
    input_ids = input_ids.at[0, 3].set(CURRENT_TOKEN_ID)
    input_ids = input_ids.at[2, S - 1].set(CURRENT_TOKEN_ID)
    attention_mask = jnp.ones((B, S), jnp.int32)
    attention_mask = attention_mask.at[1, S - 2:].set(0)

    outs = multitask_forward(input_ids, attention_mask,
                             jnp.int32(CURRENT_TOKEN_ID), params)
    sentiment_logits, response_logits, crisis_logits, attn_weights = outs
    jax.block_until_ready(outs)

    assert sentiment_logits.shape == (B, N_SENT)
    assert response_logits.shape == (B, N_RESP)
    assert crisis_logits.shape == (B, N_CRISIS)
    assert attn_weights.shape == (B, 2)
    all_out = jnp.concatenate(
        [sentiment_logits, response_logits, crisis_logits, attn_weights], axis=1)
    assert bool(jnp.all(jnp.isfinite(all_out)))
    # head softmax is exact now -> weights sum to 1
    assert bool(jnp.allclose(jnp.sum(attn_weights, axis=1), 1.0, atol=1e-5))
    print("KERNEL_OK")
</pallas_src>

<mosaic_0001>
module attributes {stable_mosaic.version = 11 : i64} {
  func.func @fused_kernel(%arg0: i32, %arg1: memref<8x8x128xf32, #tpu.memory_space<vmem>>, %arg2: memref<8x1x8xf32, #tpu.memory_space<vmem>>, %arg3: memref<8x1x8xf32, #tpu.memory_space<vmem>>, %arg4: memref<128x384xbf16, #tpu.memory_space<vmem>>, %arg5: memref<1x384xf32, #tpu.memory_space<vmem>>, %arg6: memref<128x128xbf16, #tpu.memory_space<vmem>>, %arg7: memref<1x128xf32, #tpu.memory_space<vmem>>, %arg8: memref<1x128xf32, #tpu.memory_space<vmem>>, %arg9: memref<1x128xf32, #tpu.memory_space<vmem>>, %arg10: memref<128x512xbf16, #tpu.memory_space<vmem>>, %arg11: memref<1x512xf32, #tpu.memory_space<vmem>>, %arg12: memref<512x128xbf16, #tpu.memory_space<vmem>>, %arg13: memref<1x128xf32, #tpu.memory_space<vmem>>, %arg14: memref<1x128xf32, #tpu.memory_space<vmem>>, %arg15: memref<1x128xf32, #tpu.memory_space<vmem>>, %arg16: memref<256x128xbf16, #tpu.memory_space<vmem>>, %arg17: memref<1x128xf32, #tpu.memory_space<vmem>>, %arg18: memref<128x2xbf16, #tpu.memory_space<vmem>>, %arg19: memref<1x2xf32, #tpu.memory_space<vmem>>, %arg20: memref<128x128xbf16, #tpu.memory_space<vmem>>, %arg21: memref<1x128xf32, #tpu.memory_space<vmem>>, %arg22: memref<1x8x128xf32, #tpu.memory_space<vmem>>) attributes {dimension_semantics = [#tpu.dimension_semantics<parallel>], iteration_bounds = array<i64: 1>, scalar_prefetch = 0 : i64, scratch_operands = 0 : i64, tpu.core_type = #tpu.core_type<tc>, window_params = [{transform_indices = @transform_0, window_bounds = array<i64: 8, 8, 128>}, {transform_indices = @transform_1, window_bounds = array<i64: 8, 1, 8>}, {transform_indices = @transform_2, window_bounds = array<i64: 8, 1, 8>}, {pipeline_mode = #tpu.pipeline_mode<synchronous>, transform_indices = @transform_3, window_bounds = array<i64: 128, 384>}, {pipeline_mode = #tpu.pipeline_mode<synchronous>, transform_indices = @transform_4, window_bounds = array<i64: 1, 384>}, {pipeline_mode = #tpu.pipeline_mode<synchronous>, transform_indices = @transform_5, window_bounds = array<i64: 128, 128>}, {pipeline_mode = #tpu.pipeline_mode<synchronous>, transform_indices = @transform_6, window_bounds = array<i64: 1, 128>}, {pipeline_mode = #tpu.pipeline_mode<synchronous>, transform_indices = @transform_7, window_bounds = array<i64: 1, 128>}, {pipeline_mode = #tpu.pipeline_mode<synchronous>, transform_indices = @transform_8, window_bounds = array<i64: 1, 128>}, {pipeline_mode = #tpu.pipeline_mode<synchronous>, transform_indices = @transform_9, window_bounds = array<i64: 128, 512>}, {pipeline_mode = #tpu.pipeline_mode<synchronous>, transform_indices = @transform_10, window_bounds = array<i64: 1, 512>}, {pipeline_mode = #tpu.pipeline_mode<synchronous>, transform_indices = @transform_11, window_bounds = array<i64: 512, 128>}, {pipeline_mode = #tpu.pipeline_mode<synchronous>, transform_indices = @transform_12, window_bounds = array<i64: 1, 128>}, {pipeline_mode = #tpu.pipeline_mode<synchronous>, transform_indices = @transform_13, window_bounds = array<i64: 1, 128>}, {pipeline_mode = #tpu.pipeline_mode<synchronous>, transform_indices = @transform_14, window_bounds = array<i64: 1, 128>}, {pipeline_mode = #tpu.pipeline_mode<synchronous>, transform_indices = @transform_15, window_bounds = array<i64: 256, 128>}, {pipeline_mode = #tpu.pipeline_mode<synchronous>, transform_indices = @transform_16, window_bounds = array<i64: 1, 128>}, {pipeline_mode = #tpu.pipeline_mode<synchronous>, transform_indices = @transform_17, window_bounds = array<i64: 128, 2>}, {pipeline_mode = #tpu.pipeline_mode<synchronous>, transform_indices = @transform_18, window_bounds = array<i64: 1, 2>}, {pipeline_mode = #tpu.pipeline_mode<synchronous>, transform_indices = @transform_19, window_bounds = array<i64: 128, 128>}, {pipeline_mode = #tpu.pipeline_mode<synchronous>, transform_indices = @transform_20, window_bounds = array<i64: 1, 128>}, {transform_indices = @transform_21, window_bounds = array<i64: 1, 8, 128>}]} {
    %c0 = arith.constant 0 : index
    %c0_0 = arith.constant 0 : index
    %c0_1 = arith.constant 0 : index
    %0 = vector.load %arg1[%c0, %c0_0, %c0_1] : memref<8x8x128xf32, #tpu.memory_space<vmem>>, vector<8x8x128xf32>
    %c0_2 = arith.constant 0 : index
    %c0_3 = arith.constant 0 : index
    %c0_4 = arith.constant 0 : index
    %1 = vector.load %arg2[%c0_2, %c0_3, %c0_4] : memref<8x1x8xf32, #tpu.memory_space<vmem>>, vector<8x1x8xf32>
    %c0_5 = arith.constant 0 : index
    %c0_6 = arith.constant 0 : index
    %c0_7 = arith.constant 0 : index
    %2 = vector.load %arg3[%c0_5, %c0_6, %c0_7] : memref<8x1x8xf32, #tpu.memory_space<vmem>>, vector<8x1x8xf32>
    %3 = vector.shape_cast %0 : vector<8x8x128xf32> to vector<64x128xf32>
    %4 = arith.truncf %3 : vector<64x128xf32> to vector<64x128xbf16>
    %c0_8 = arith.constant 0 : index
    %c0_9 = arith.constant 0 : index
    %5 = vector.load %arg4[%c0_8, %c0_9] : memref<128x384xbf16, #tpu.memory_space<vmem>>, vector<128x384xbf16>
    %cst = arith.constant dense<0.000000e+00> : vector<64x384xf32>
    %6 = tpu.matmul %4, %5, %cst {dimension_numbers = #tpu.dot_dimension_numbers<[1], [0], [0], [1], [0, 0, 1, 1], [], []>} : vector<64x128xbf16>, vector<128x384xbf16>, vector<64x384xf32> -> vector<64x384xf32>
    %c0_10 = arith.constant 0 : index
    %c0_11 = arith.constant 0 : index
    %7 = vector.load %arg5[%c0_10, %c0_11] : memref<1x384xf32, #tpu.memory_space<vmem>>, vector<1x384xf32>
    %8 = vector.broadcast %7 : vector<1x384xf32> to vector<64x384xf32>
    %9 = arith.addf %6, %8 : vector<64x384xf32>
    %10 = vector.extract_strided_slice %9 {offsets = [0, 0], sizes = [64, 128], strides = [1, 1]} : vector<64x384xf32> to vector<64x128xf32>
    %11 = vector.shape_cast %10 : vector<64x128xf32> to vector<8x8x128xf32>
    %12 = vector.extract_strided_slice %9 {offsets = [0, 128], sizes = [64, 128], strides = [1, 1]} : vector<64x384xf32> to vector<64x128xf32>
    %13 = vector.shape_cast %12 : vector<64x128xf32> to vector<8x8x128xf32>
    %14 = vector.extract_strided_slice %9 {offsets = [0, 256], sizes = [64, 128], strides = [1, 1]} : vector<64x384xf32> to vector<64x128xf32>
    %15 = vector.shape_cast %14 : vector<64x128xf32> to vector<8x8x128xf32>
    %16 = arith.truncf %11 : vector<8x8x128xf32> to vector<8x8x128xbf16>
    %17 = arith.truncf %13 : vector<8x8x128xf32> to vector<8x8x128xbf16>
    "tpu.trace_start"() <{level = 10 : i32, message = "bqd,bkd->bqk"}> : () -> ()
    %cst_12 = arith.constant dense<0.000000e+00> : vector<8x8x8xf32>
    %18 = tpu.matmul %16, %17, %cst_12 {dimension_numbers = #tpu.dot_dimension_numbers<[2], [2], [1], [1], [0, 0, 0, 1, 1, 1], [0], [0]>} : vector<8x8x128xbf16>, vector<8x8x128xbf16>, vector<8x8x8xf32> -> vector<8x8x8xf32>
    "tpu.trace_stop"() : () -> ()
    %19 = vector.broadcast %1 : vector<8x1x8xf32> to vector<8x8x8xf32>
    %20 = arith.addf %18, %19 : vector<8x8x8xf32>
    %cst_13 = arith.constant dense<0xFF800000> : vector<8x8xf32>
    %21 = vector.multi_reduction <maximumf>, %20, %cst_13 [2] : vector<8x8x8xf32> to vector<8x8xf32>
    %22 = vector.shape_cast %21 : vector<8x8xf32> to vector<8x8x1xf32>
    %23 = vector.broadcast %22 : vector<8x8x1xf32> to vector<8x8x8xf32>
    %24 = arith.subf %20, %23 : vector<8x8x8xf32>
    %25 = math.exp %24 : vector<8x8x8xf32>
    %cst_14 = arith.constant dense<0.000000e+00> : vector<8x8xf32>
    %26 = vector.multi_reduction <add>, %25, %cst_14 [2] : vector<8x8x8xf32> to vector<8x8xf32>
    %27 = vector.shape_cast %26 : vector<8x8xf32> to vector<8x8x1xf32>
    %28 = tpu.reciprocal %27 {approx = true} : vector<8x8x1xf32> -> vector<8x8x1xf32>
    %29 = vector.broadcast %28 : vector<8x8x1xf32> to vector<8x8x8xf32>
    %30 = arith.mulf %25, %29 : vector<8x8x8xf32>
    %31 = arith.truncf %30 : vector<8x8x8xf32> to vector<8x8x8xbf16>
    %32 = arith.truncf %15 : vector<8x8x128xf32> to vector<8x8x128xbf16>
    "tpu.trace_start"() <{level = 10 : i32, message = "bqk,bkd->bqd"}> : () -> ()
    %cst_15 = arith.constant dense<0.000000e+00> : vector<8x8x128xf32>
    %33 = tpu.matmul %31, %32, %cst_15 {dimension_numbers = #tpu.dot_dimension_numbers<[2], [1], [1], [2], [0, 0, 0, 1, 1, 2], [0], [0]>} : vector<8x8x8xbf16>, vector<8x8x128xbf16>, vector<8x8x128xf32> -> vector<8x8x128xf32>
    "tpu.trace_stop"() : () -> ()
    %34 = vector.shape_cast %33 : vector<8x8x128xf32> to vector<64x128xf32>
    %35 = arith.truncf %34 : vector<64x128xf32> to vector<64x128xbf16>
    %c0_16 = arith.constant 0 : index
    %c0_17 = arith.constant 0 : index
    %36 = vector.load %arg6[%c0_16, %c0_17] : memref<128x128xbf16, #tpu.memory_space<vmem>>, vector<128x128xbf16>
    %cst_18 = arith.constant dense<0.000000e+00> : vector<64x128xf32>
    %37 = tpu.matmul %35, %36, %cst_18 {dimension_numbers = #tpu.dot_dimension_numbers<[1], [0], [0], [1], [0, 0, 1, 1], [], []>} : vector<64x128xbf16>, vector<128x128xbf16>, vector<64x128xf32> -> vector<64x128xf32>
    %c0_19 = arith.constant 0 : index
    %c0_20 = arith.constant 0 : index
    %38 = vector.load %arg7[%c0_19, %c0_20] : memref<1x128xf32, #tpu.memory_space<vmem>>, vector<1x128xf32>
    %39 = vector.broadcast %38 : vector<1x128xf32> to vector<64x128xf32>
    %40 = arith.addf %37, %39 : vector<64x128xf32>
    %41 = arith.addf %3, %40 : vector<64x128xf32>
    %c0_21 = arith.constant 0 : index
    %c0_22 = arith.constant 0 : index
    %42 = vector.load %arg8[%c0_21, %c0_22] : memref<1x128xf32, #tpu.memory_space<vmem>>, vector<1x128xf32>
    %c0_23 = arith.constant 0 : index
    %c0_24 = arith.constant 0 : index
    %43 = vector.load %arg9[%c0_23, %c0_24] : memref<1x128xf32, #tpu.memory_space<vmem>>, vector<1x128xf32>
    %cst_25 = arith.constant dense<0.000000e+00> : vector<64xf32>
    %44 = vector.multi_reduction <add>, %41, %cst_25 [1] : vector<64x128xf32> to vector<64xf32>
    %45 = vector.shape_cast %44 : vector<64xf32> to vector<64x1xf32>
    %cst_26 = arith.constant 1.280000e+02 : f32
    %46 = vector.broadcast %cst_26 : f32 to vector<64x1xf32>
    %47 = arith.divf %45, %46 : vector<64x1xf32>
    %48 = arith.mulf %41, %41 : vector<64x128xf32>
    %cst_27 = arith.constant dense<0.000000e+00> : vector<64xf32>
    %49 = vector.multi_reduction <add>, %48, %cst_27 [1] : vector<64x128xf32> to vector<64xf32>
    %50 = vector.shape_cast %49 : vector<64xf32> to vector<64x1xf32>
    %cst_28 = arith.constant 1.280000e+02 : f32
    %51 = vector.broadcast %cst_28 : f32 to vector<64x1xf32>
    %52 = arith.divf %50, %51 : vector<64x1xf32>
    %53 = arith.mulf %47, %47 : vector<64x1xf32>
    %54 = arith.subf %52, %53 : vector<64x1xf32>
    %55 = vector.broadcast %47 : vector<64x1xf32> to vector<64x128xf32>
    %56 = arith.subf %41, %55 : vector<64x128xf32>
    %cst_29 = arith.constant 9.99999974E-6 : f32
    %57 = vector.broadcast %cst_29 : f32 to vector<64x1xf32>
    %58 = arith.addf %54, %57 : vector<64x1xf32>
    %59 = math.rsqrt %58 : vector<64x1xf32>
    %60 = vector.broadcast %59 : vector<64x1xf32> to vector<64x128xf32>
    %61 = arith.mulf %56, %60 : vector<64x128xf32>
    %62 = vector.broadcast %42 : vector<1x128xf32> to vector<64x128xf32>
    %63 = arith.mulf %61, %62 : vector<64x128xf32>
    %64 = vector.broadcast %43 : vector<1x128xf32> to vector<64x128xf32>
    %65 = arith.addf %63, %64 : vector<64x128xf32>
    %66 = arith.truncf %65 : vector<64x128xf32> to vector<64x128xbf16>
    %c0_30 = arith.constant 0 : index
    %c0_31 = arith.constant 0 : index
    %67 = vector.load %arg10[%c0_30, %c0_31] : memref<128x512xbf16, #tpu.memory_space<vmem>>, vector<128x512xbf16>
    %cst_32 = arith.constant dense<0.000000e+00> : vector<64x512xf32>
    %68 = tpu.matmul %66, %67, %cst_32 {dimension_numbers = #tpu.dot_dimension_numbers<[1], [0], [0], [1], [0, 0, 1, 1], [], []>} : vector<64x128xbf16>, vector<128x512xbf16>, vector<64x512xf32> -> vector<64x512xf32>
    %c0_33 = arith.constant 0 : index
    %c0_34 = arith.constant 0 : index
    %69 = vector.load %arg11[%c0_33, %c0_34] : memref<1x512xf32, #tpu.memory_space<vmem>>, vector<1x512xf32>
    %70 = vector.broadcast %69 : vector<1x512xf32> to vector<64x512xf32>
    %71 = arith.addf %68, %70 : vector<64x512xf32>
    %cst_35 = arith.constant 5.000000e-01 : f32
    %72 = vector.broadcast %cst_35 : f32 to vector<64x512xf32>
    %73 = arith.mulf %72, %71 : vector<64x512xf32>
    %cst_36 = arith.constant 4.471500e-02 : f32
    %74 = vector.broadcast %cst_36 : f32 to vector<64x512xf32>
    %75 = arith.mulf %74, %71 : vector<64x512xf32>
    %76 = arith.mulf %75, %71 : vector<64x512xf32>
    %77 = arith.mulf %76, %71 : vector<64x512xf32>
    %78 = arith.addf %71, %77 : vector<64x512xf32>
    %cst_37 = arith.constant 0.797884583 : f32
    %79 = vector.broadcast %cst_37 : f32 to vector<64x512xf32>
    %80 = arith.mulf %79, %78 : vector<64x512xf32>
    %81 = math.tanh %80 : vector<64x512xf32>
    %cst_38 = arith.constant 1.000000e+00 : f32
    %82 = vector.broadcast %cst_38 : f32 to vector<64x512xf32>
    %83 = arith.addf %82, %81 : vector<64x512xf32>
    %84 = arith.mulf %73, %83 : vector<64x512xf32>
    %85 = arith.truncf %84 : vector<64x512xf32> to vector<64x512xbf16>
    %c0_39 = arith.constant 0 : index
    %c0_40 = arith.constant 0 : index
    %86 = vector.load %arg12[%c0_39, %c0_40] : memref<512x128xbf16, #tpu.memory_space<vmem>>, vector<512x128xbf16>
    %cst_41 = arith.constant dense<0.000000e+00> : vector<64x128xf32>
    %87 = tpu.matmul %85, %86, %cst_41 {dimension_numbers = #tpu.dot_dimension_numbers<[1], [0], [0], [1], [0, 0, 1, 1], [], []>} : vector<64x512xbf16>, vector<512x128xbf16>, vector<64x128xf32> -> vector<64x128xf32>
    %c0_42 = arith.constant 0 : index
    %c0_43 = arith.constant 0 : index
    %88 = vector.load %arg13[%c0_42, %c0_43] : memref<1x128xf32, #tpu.memory_space<vmem>>, vector<1x128xf32>
    %89 = vector.broadcast %88 : vector<1x128xf32> to vector<64x128xf32>
    %90 = arith.addf %87, %89 : vector<64x128xf32>
    %91 = arith.addf %65, %90 : vector<64x128xf32>
    %c0_44 = arith.constant 0 : index
    %c0_45 = arith.constant 0 : index
    %92 = vector.load %arg14[%c0_44, %c0_45] : memref<1x128xf32, #tpu.memory_space<vmem>>, vector<1x128xf32>
    %c0_46 = arith.constant 0 : index
    %c0_47 = arith.constant 0 : index
    %93 = vector.load %arg15[%c0_46, %c0_47] : memref<1x128xf32, #tpu.memory_space<vmem>>, vector<1x128xf32>
    %cst_48 = arith.constant dense<0.000000e+00> : vector<64xf32>
    %94 = vector.multi_reduction <add>, %91, %cst_48 [1] : vector<64x128xf32> to vector<64xf32>
    %95 = vector.shape_cast %94 : vector<64xf32> to vector<64x1xf32>
    %cst_49 = arith.constant 1.280000e+02 : f32
    %96 = vector.broadcast %cst_49 : f32 to vector<64x1xf32>
    %97 = arith.divf %95, %96 : vector<64x1xf32>
    %98 = arith.mulf %91, %91 : vector<64x128xf32>
    %cst_50 = arith.constant dense<0.000000e+00> : vector<64xf32>
    %99 = vector.multi_reduction <add>, %98, %cst_50 [1] : vector<64x128xf32> to vector<64xf32>
    %100 = vector.shape_cast %99 : vector<64xf32> to vector<64x1xf32>
    %cst_51 = arith.constant 1.280000e+02 : f32
    %101 = vector.broadcast %cst_51 : f32 to vector<64x1xf32>
    %102 = arith.divf %100, %101 : vector<64x1xf32>
    %103 = arith.mulf %97, %97 : vector<64x1xf32>
    %104 = arith.subf %102, %103 : vector<64x1xf32>
    %105 = vector.broadcast %97 : vector<64x1xf32> to vector<64x128xf32>
    %106 = arith.subf %91, %105 : vector<64x128xf32>
    %cst_52 = arith.constant 9.99999974E-6 : f32
    %107 = vector.broadcast %cst_52 : f32 to vector<64x1xf32>
    %108 = arith.addf %104, %107 : vector<64x1xf32>
    %109 = math.rsqrt %108 : vector<64x1xf32>
    %110 = vector.broadcast %109 : vector<64x1xf32> to vector<64x128xf32>
    %111 = arith.mulf %106, %110 : vector<64x128xf32>
    %112 = vector.broadcast %92 : vector<1x128xf32> to vector<64x128xf32>
    %113 = arith.mulf %111, %112 : vector<64x128xf32>
    %114 = vector.broadcast %93 : vector<1x128xf32> to vector<64x128xf32>
    %115 = arith.addf %113, %114 : vector<64x128xf32>
    %116 = vector.shape_cast %115 : vector<64x128xf32> to vector<8x8x128xf32>
    %117 = vector.extract_strided_slice %116 {offsets = [0, 0, 0], sizes = [8, 1, 128], strides = [1, 1, 1]} : vector<8x8x128xf32> to vector<8x1x128xf32>
    %118 = vector.shape_cast %117 : vector<8x1x128xf32> to vector<8x128xf32>
    "tpu.trace_start"() <{level = 10 : i32, message = "bks,bsh->bkh"}> : () -> ()
    %cst_53 = arith.constant dense<0.000000e+00> : vector<8x1x128xf32>
    %119 = tpu.matmul %2, %116, %cst_53 {dimension_numbers = #tpu.dot_dimension_numbers<[2], [1], [1], [2], [0, 0, 0, 1, 1, 2], [0], [0]>} : vector<8x1x8xf32>, vector<8x8x128xf32>, vector<8x1x128xf32> -> vector<8x1x128xf32>
    "tpu.trace_stop"() : () -> ()
    %120 = vector.shape_cast %119 : vector<8x1x128xf32> to vector<8x128xf32>
    %121 = tpu.concatenate %118, %120 in 1 : vector<8x128xf32>, vector<8x128xf32> -> vector<8x256xf32>
    %122 = arith.truncf %121 : vector<8x256xf32> to vector<8x256xbf16>
    %c0_54 = arith.constant 0 : index
    %c0_55 = arith.constant 0 : index
    %123 = vector.load %arg16[%c0_54, %c0_55] : memref<256x128xbf16, #tpu.memory_space<vmem>>, vector<256x128xbf16>
    %cst_56 = arith.constant dense<0.000000e+00> : vector<8x128xf32>
    %124 = tpu.matmul %122, %123, %cst_56 {dimension_numbers = #tpu.dot_dimension_numbers<[1], [0], [0], [1], [0, 0, 1, 1], [], []>} : vector<8x256xbf16>, vector<256x128xbf16>, vector<8x128xf32> -> vector<8x128xf32>
    %c0_57 = arith.constant 0 : index
    %c0_58 = arith.constant 0 : index
    %125 = vector.load %arg17[%c0_57, %c0_58] : memref<1x128xf32, #tpu.memory_space<vmem>>, vector<1x128xf32>
    %126 = vector.broadcast %125 : vector<1x128xf32> to vector<8x128xf32>
    %127 = arith.addf %124, %126 : vector<8x128xf32>
    %128 = math.tanh %127 : vector<8x128xf32>
    %129 = arith.truncf %128 : vector<8x128xf32> to vector<8x128xbf16>
    %c0_59 = arith.constant 0 : index
    %c0_60 = arith.constant 0 : index
    %130 = vector.load %arg18[%c0_59, %c0_60] : memref<128x2xbf16, #tpu.memory_space<vmem>>, vector<128x2xbf16>
    %cst_61 = arith.constant dense<0.000000e+00> : vector<8x2xf32>
    %131 = tpu.matmul %129, %130, %cst_61 {dimension_numbers = #tpu.dot_dimension_numbers<[1], [0], [0], [1], [0, 0, 1, 1], [], []>} : vector<8x128xbf16>, vector<128x2xbf16>, vector<8x2xf32> -> vector<8x2xf32>
    %c0_62 = arith.constant 0 : index
    %c0_63 = arith.constant 0 : index
    %132 = vector.load %arg19[%c0_62, %c0_63] : memref<1x2xf32, #tpu.memory_space<vmem>>, vector<1x2xf32>
    %133 = vector.broadcast %132 : vector<1x2xf32> to vector<8x2xf32>
    %134 = arith.addf %131, %133 : vector<8x2xf32>
    %cst_64 = arith.constant dense<0xFF800000> : vector<8xf32>
    %135 = vector.multi_reduction <maximumf>, %134, %cst_64 [1] : vector<8x2xf32> to vector<8xf32>
    %136 = vector.shape_cast %135 : vector<8xf32> to vector<8x1xf32>
    %137 = vector.broadcast %136 : vector<8x1xf32> to vector<8x2xf32>
    %138 = arith.subf %134, %137 : vector<8x2xf32>
    %139 = math.exp %138 : vector<8x2xf32>
    %cst_65 = arith.constant dense<0.000000e+00> : vector<8xf32>
    %140 = vector.multi_reduction <add>, %139, %cst_65 [1] : vector<8x2xf32> to vector<8xf32>
    %141 = vector.shape_cast %140 : vector<8xf32> to vector<8x1xf32>
    %142 = vector.broadcast %141 : vector<8x1xf32> to vector<8x2xf32>
    %143 = arith.divf %139, %142 : vector<8x2xf32>
    %144 = vector.extract_strided_slice %143 {offsets = [0, 0], sizes = [8, 1], strides = [1, 1]} : vector<8x2xf32> to vector<8x1xf32>
    %145 = vector.broadcast %144 : vector<8x1xf32> to vector<8x128xf32>
    %146 = arith.mulf %118, %145 : vector<8x128xf32>
    %147 = vector.extract_strided_slice %143 {offsets = [0, 1], sizes = [8, 1], strides = [1, 1]} : vector<8x2xf32> to vector<8x1xf32>
    %148 = vector.broadcast %147 : vector<8x1xf32> to vector<8x128xf32>
    %149 = arith.mulf %120, %148 : vector<8x128xf32>
    %150 = arith.addf %146, %149 : vector<8x128xf32>
    %151 = arith.truncf %150 : vector<8x128xf32> to vector<8x128xbf16>
    %c0_66 = arith.constant 0 : index
    %c0_67 = arith.constant 0 : index
    %152 = vector.load %arg20[%c0_66, %c0_67] : memref<128x128xbf16, #tpu.memory_space<vmem>>, vector<128x128xbf16>
    %cst_68 = arith.constant dense<0.000000e+00> : vector<8x128xf32>
    %153 = tpu.matmul %151, %152, %cst_68 {dimension_numbers = #tpu.dot_dimension_numbers<[1], [0], [0], [1], [0, 0, 1, 1], [], []>} : vector<8x128xbf16>, vector<128x128xbf16>, vector<8x128xf32> -> vector<8x128xf32>
    %c0_69 = arith.constant 0 : index
    %c0_70 = arith.constant 0 : index
    %154 = vector.load %arg21[%c0_69, %c0_70] : memref<1x128xf32, #tpu.memory_space<vmem>>, vector<1x128xf32>
    %155 = vector.broadcast %154 : vector<1x128xf32> to vector<8x128xf32>
    %156 = arith.addf %153, %155 : vector<8x128xf32>
    %157 = tpu.iota {dimensions = array<i32: 1>} : vector<8x128xi32>
    %c7_i32 = arith.constant 7 : i32
    %158 = vector.broadcast %c7_i32 : i32 to vector<8x128xi32>
    %159 = arith.cmpi eq, %157, %158 : vector<8x128xi32>
    %160 = vector.extract_strided_slice %143 {offsets = [0, 0], sizes = [8, 1], strides = [1, 1]} : vector<8x2xf32> to vector<8x1xf32>
    %cst_71 = arith.constant 0.000000e+00 : f32
    %161 = vector.shape_cast %160 : vector<8x1xf32> to vector<8x1xf32>
    %162 = vector.broadcast %161 : vector<8x1xf32> to vector<8x128xf32>
    %163 = vector.broadcast %cst_71 : f32 to vector<8x128xf32>
    %164 = arith.select %159, %162, %163 : vector<8x128xi1>, vector<8x128xf32>
    %165 = arith.addf %156, %164 : vector<8x128xf32>
    %c8_i32 = arith.constant 8 : i32
    %166 = vector.broadcast %c8_i32 : i32 to vector<8x128xi32>
    %167 = arith.cmpi eq, %157, %166 : vector<8x128xi32>
    %168 = vector.extract_strided_slice %143 {offsets = [0, 1], sizes = [8, 1], strides = [1, 1]} : vector<8x2xf32> to vector<8x1xf32>
    %cst_72 = arith.constant 0.000000e+00 : f32
    %169 = vector.shape_cast %168 : vector<8x1xf32> to vector<8x1xf32>
    %170 = vector.broadcast %169 : vector<8x1xf32> to vector<8x128xf32>
    %171 = vector.broadcast %cst_72 : f32 to vector<8x128xf32>
    %172 = arith.select %167, %170, %171 : vector<8x128xi1>, vector<8x128xf32>
    %173 = arith.addf %165, %172 : vector<8x128xf32>
    %c0_73 = arith.constant 0 : index
    %c0_74 = arith.constant 0 : index
    %c0_75 = arith.constant 0 : index
    %174 = vector.load %arg22[%c0_73, %c0_74, %c0_75] : memref<1x8x128xf32, #tpu.memory_space<vmem>>, vector<1x8x128xf32>
    %175 = vector.shape_cast %174 : vector<1x8x128xf32> to vector<8x128xf32>
    %176 = vector.shape_cast %173 : vector<8x128xf32> to vector<1x8x128xf32>
    tpu.vector_store %arg22[%c0_73, %c0_74, %c0_75], %176 {strides = array<i32>} : memref<1x8x128xf32, #tpu.memory_space<vmem>>, vector<1x8x128xf32>,
    return
  }
  func.func @transform_0(%arg0: i32) -> (i32, i32, i32) {
    %c0_i32 = arith.constant 0 : i32
    %c0_i32_0 = arith.constant 0 : i32
    %c0_i32_1 = arith.constant 0 : i32
    return %arg0, %c0_i32, %c0_i32_0 : i32, i32, i32
  }
  func.func @transform_1(%arg0: i32) -> (i32, i32, i32) {
    %c0_i32 = arith.constant 0 : i32
    %c0_i32_0 = arith.constant 0 : i32
    %c0_i32_1 = arith.constant 0 : i32
    return %arg0, %c0_i32, %c0_i32_0 : i32, i32, i32
  }
  func.func @transform_2(%arg0: i32) -> (i32, i32, i32) {
    %c0_i32 = arith.constant 0 : i32
    %c0_i32_0 = arith.constant 0 : i32
    %c0_i32_1 = arith.constant 0 : i32
    return %arg0, %c0_i32, %c0_i32_0 : i32, i32, i32
  }
  func.func @transform_3(%arg0: i32) -> (i32, i32) {
    %c0_i32 = arith.constant 0 : i32
    %c0_i32_0 = arith.constant 0 : i32
    %c0_i32_1 = arith.constant 0 : i32
    return %c0_i32, %c0_i32_0 : i32, i32
  }
  func.func @transform_4(%arg0: i32) -> (i32, i32) {
    %c0_i32 = arith.constant 0 : i32
    %c0_i32_0 = arith.constant 0 : i32
    %c0_i32_1 = arith.constant 0 : i32
    return %c0_i32, %c0_i32_0 : i32, i32
  }
  func.func @transform_5(%arg0: i32) -> (i32, i32) {
    %c0_i32 = arith.constant 0 : i32
    %c0_i32_0 = arith.constant 0 : i32
    %c0_i32_1 = arith.constant 0 : i32
    return %c0_i32, %c0_i32_0 : i32, i32
  }
  func.func @transform_6(%arg0: i32) -> (i32, i32) {
    %c0_i32 = arith.constant 0 : i32
    %c0_i32_0 = arith.constant 0 : i32
    %c0_i32_1 = arith.constant 0 : i32
    return %c0_i32, %c0_i32_0 : i32, i32
  }
  func.func @transform_7(%arg0: i32) -> (i32, i32) {
    %c0_i32 = arith.constant 0 : i32
    %c0_i32_0 = arith.constant 0 : i32
    %c0_i32_1 = arith.constant 0 : i32
    return %c0_i32, %c0_i32_0 : i32, i32
  }
  func.func @transform_8(%arg0: i32) -> (i32, i32) {
    %c0_i32 = arith.constant 0 : i32
    %c0_i32_0 = arith.constant 0 : i32
    %c0_i32_1 = arith.constant 0 : i32
    return %c0_i32, %c0_i32_0 : i32, i32
  }
  func.func @transform_9(%arg0: i32) -> (i32, i32) {
    %c0_i32 = arith.constant 0 : i32
    %c0_i32_0 = arith.constant 0 : i32
    %c0_i32_1 = arith.constant 0 : i32
    return %c0_i32, %c0_i32_0 : i32, i32
  }
  func.func @transform_10(%arg0: i32) -> (i32, i32) {
    %c0_i32 = arith.constant 0 : i32
    %c0_i32_0 = arith.constant 0 : i32
    %c0_i32_1 = arith.constant 0 : i32
    return %c0_i32, %c0_i32_0 : i32, i32
  }
  func.func @transform_11(%arg0: i32) -> (i32, i32) {
    %c0_i32 = arith.constant 0 : i32
    %c0_i32_0 = arith.constant 0 : i32
    %c0_i32_1 = arith.constant 0 : i32
    return %c0_i32, %c0_i32_0 : i32, i32
  }
  func.func @transform_12(%arg0: i32) -> (i32, i32) {
    %c0_i32 = arith.constant 0 : i32
    %c0_i32_0 = arith.constant 0 : i32
    %c0_i32_1 = arith.constant 0 : i32
    return %c0_i32, %c0_i32_0 : i32, i32
  }
  func.func @transform_13(%arg0: i32) -> (i32, i32) {
    %c0_i32 = arith.constant 0 : i32
    %c0_i32_0 = arith.constant 0 : i32
    %c0_i32_1 = arith.constant 0 : i32
    return %c0_i32, %c0_i32_0 : i32, i32
  }
  func.func @transform_14(%arg0: i32) -> (i32, i32) {
    %c0_i32 = arith.constant 0 : i32
    %c0_i32_0 = arith.constant 0 : i32
    %c0_i32_1 = arith.constant 0 : i32
    return %c0_i32, %c0_i32_0 : i32, i32
  }
  func.func @transform_15(%arg0: i32) -> (i32, i32) {
    %c0_i32 = arith.constant 0 : i32
    %c0_i32_0 = arith.constant 0 : i32
    %c0_i32_1 = arith.constant 0 : i32
    return %c0_i32, %c0_i32_0 : i32, i32
  }
  func.func @transform_16(%arg0: i32) -> (i32, i32) {
    %c0_i32 = arith.constant 0 : i32
    %c0_i32_0 = arith.constant 0 : i32
    %c0_i32_1 = arith.constant 0 : i32
    return %c0_i32, %c0_i32_0 : i32, i32
  }
  func.func @transform_17(%arg0: i32) -> (i32, i32) {
    %c0_i32 = arith.constant 0 : i32
    %c0_i32_0 = arith.constant 0 : i32
    %c0_i32_1 = arith.constant 0 : i32
    return %c0_i32, %c0_i32_0 : i32, i32
  }
  func.func @transform_18(%arg0: i32) -> (i32, i32) {
    %c0_i32 = arith.constant 0 : i32
    %c0_i32_0 = arith.constant 0 : i32
    %c0_i32_1 = arith.constant 0 : i32
    return %c0_i32, %c0_i32_0 : i32, i32
  }
  func.func @transform_19(%arg0: i32) -> (i32, i32) {
    %c0_i32 = arith.constant 0 : i32
    %c0_i32_0 = arith.constant 0 : i32
    %c0_i32_1 = arith.constant 0 : i32
    return %c0_i32, %c0_i32_0 : i32, i32
  }
  func.func @transform_20(%arg0: i32) -> (i32, i32) {
    %c0_i32 = arith.constant 0 : i32
    %c0_i32_0 = arith.constant 0 : i32
    %c0_i32_1 = arith.constant 0 : i32
    return %c0_i32, %c0_i32_0 : i32, i32
  }
  func.func @transform_21(%arg0: i32) -> (i32, i32, i32) {
    %c0_i32 = arith.constant 0 : i32
    %c0_i32_0 = arith.constant 0 : i32
    %c0_i32_1 = arith.constant 0 : i32
    return %arg0, %c0_i32, %c0_i32_0 : i32, i32, i32
  }
}

</mosaic_0001>

<bundles_post_ra>
// kernel: multitask_forward.1
= control target key start
LH: loop header
LB: loop body
LE: loop exit
PB: predicated region body
PF: predicated region fallthrough
CT: control target
= control target key end

     0   :  { %s6779_s0 = inlined_call_operand.vmem [shape: f32[8,8,128], index: 0, kind: input, shape index: {}]   ;;  %s6780_s1 = inlined_call_operand.vmem [shape: f32[8,1,8], index: 1, kind: input, shape index: {}]   ;;  %s6781_s2 = inlined_call_operand.vmem [shape: f32[8,1,8], index: 2, kind: input, shape index: {}]   ;;  %s6782_s3 = inlined_call_operand.vmem [shape: bf16[128,384], index: 3, kind: input, shape index: {}]   ;;  %s6783_s4 = inlined_call_operand.hbm [shape: f32[1,384], index: 4, kind: input, shape index: {}]   ;;  %s6784_s5 = inlined_call_operand.vmem [shape: bf16[128,128], index: 5, kind: input, shape index: {}]   ;;  %s6785_s6 = inlined_call_operand.vmem [shape: f32[1,128], index: 6, kind: input, shape index: {}]   ;;  %s6786_s7 = inlined_call_operand.hbm [shape: f32[1,128], index: 7, kind: input, shape index: {}]   ;;  %s6787_s8 = inlined_call_operand.hbm [shape: f32[1,128], index: 8, kind: input, shape index: {}]   ;;  %s6788_s9 = inlined_call_operand.vmem [shape: bf16[128,512], index: 9, kind: input, shape index: {}]   ;;  %s6789_s10 = inlined_call_operand.hbm [shape: f32[1,512], index: 10, kind: input, shape index: {}]   ;;  %s6790_s11 = inlined_call_operand.vmem [shape: bf16[512,128], index: 11, kind: input, shape index: {}]   ;;  %s6791_s12 = inlined_call_operand.hbm [shape: f32[1,128], index: 12, kind: input, shape index: {}]   ;;  %s6792_s13 = inlined_call_operand.hbm [shape: f32[1,128], index: 13, kind: input, shape index: {}]   ;;  %s6793_s14 = inlined_call_operand.hbm [shape: f32[1,128], index: 14, kind: input, shape index: {}]   ;;  %s6794_s15 = inlined_call_operand.vmem [shape: bf16[256,128], index: 15, kind: input, shape index: {}]   ;;  %s6795_s16 = inlined_call_operand.hbm [shape: f32[1,128], index: 16, kind: input, shape index: {}]   ;;  %s6796_s17 = inlined_call_operand.vmem [shape: bf16[128,2], index: 17, kind: input, shape index: {}]   ;;  %s6797_s18 = inlined_call_operand.hbm [shape: f32[1,2], index: 18, kind: input, shape index: {}]   ;;  %s6798_s19 = inlined_call_operand.vmem [shape: bf16[128,128], index: 19, kind: input, shape index: {}]   ;;  %s6799_s20 = inlined_call_operand.hbm [shape: f32[1,128], index: 20, kind: input, shape index: {}]   ;;  %s6800_s21 = inlined_call_operand.vmem [shape: f32[1,8,128], index: 21, kind: output, shape index: {}]  }
   0x1   :  { %6826 = sst [smem:[#allocation41_spill]] %s6779_s0 }
   0x2   :  { %6827 = sst [smem:[#allocation42_spill]] %s6780_s1 }
   0x3   :  { %6828 = sst [smem:[#allocation43_spill]] %s6781_s2 }
   0x4   :  { %6829 = sst [smem:[#allocation44_spill]] %s6782_s3 }
   0x5   :  { %6830 = sst [smem:[#allocation45_spill]] %s6783_s4 }
   0x6   :  { %6831 = sst [smem:[#allocation46_spill]] %s6784_s5 }
   0x7   :  { %26 = vsyncpa [#allocation3], 0 }
   0x8   :  { %27 = vsyncpa [#allocation5], 0 }
   0x9   :  { %28 = vsyncpa [#allocation8], 0 }
   0xa   :  { %29 = vsyncpa [#allocation11], 0 }
   0xb   :  { %30 = vsyncpa [#allocation14], 0 }
   0xc   :  { %31 = vsyncpa [#allocation17], 0  ;;  %s5162_s2 = smov [#allocation4]   ;;  %s5163_s26 = smov [#allocation7]  }
   0xd   :  { %s60_s25 = sshll.u32 %s5162_s2, 4  ;;  %s82_s27 = sshll.u32 %s5163_s26, 4  ;;  %s61_s25 = int_to_ptr.vmem [resolvable:$true] %s60_s25  ;;  %s83_s27 = int_to_ptr.vmem [resolvable:$true] %s82_s27 }
   0xe   :  { %s4930_s29 = scalar_lea.hbm %s6786_s7, 16 }
   0xf   :  { %p4931_p0 = scmp.ne.s32.totalorder %s6786_s7, %s4930_s29  ;;  %p4934_p1 = scmp.lt.u32.totalorder %s4930_s29, %s6786_s7 }
  0x11   :  { %p4936_p2 = pnand %p4934_p1, %p4931_p0 }
  0x13   :  { %4939 = shalt.err (!%p4936_p2)
}
  0x14   :  { %s4940_s22 = scalar_lea.vmem %s61_s25, 16  ;;  %s4944_s23 = scalar_lea.vmem %s61_s25, 32 }
  0x15   :  { %p4941_p3 = scmp.ne.s32.totalorder %s61_s25, %s4940_s22  ;;  %p4945_p4 = scmp.lt.s32.totalorder %s61_s25, %s61_s25 }
  0x16   :  { %p4946_p5 = scmp.lt.s32.totalorder %s4944_s23, %s4940_s22 }
  0x18   :  { %p4947_p6 = por %p4946_p5, %p4945_p4 }
  0x1a   :  { %p4948_p7 = pnand %p4947_p6, %p4941_p3 }
  0x1c   :  { %4951 = shalt.err (!%p4948_p7)
}
  0x1d   :  { %63 = dma.hbm_to_vmem [thread:$0]  %s6786_s7, 16, %s61_s25, [#allocation5]  }
  0x1e   :  { %s4952_s3 = scalar_lea.hbm %s6789_s10, 64 }
  0x1f   :  { %p4953_p8 = scmp.ne.s32.totalorder %s6789_s10, %s4952_s3  ;;  %p4956_p9 = scmp.lt.u32.totalorder %s4952_s3, %s6789_s10 }
  0x21   :  { %p4958_p10 = pnand %p4956_p9, %p4953_p8 }
  0x23   :  { %4961 = shalt.err (!%p4958_p10)
}
  0x24   :  { %s4962_s30 = scalar_lea.vmem %s83_s27, 64  ;;  %p4967_p12 = scmp.lt.s32.totalorder %s83_s27, %s83_s27 }
  0x25   :  { %p4963_p11 = scmp.ne.s32.totalorder %s83_s27, %s4962_s30  ;;  %p4968_p13 = scmp.lt.s32.totalorder %s4962_s30, %s4962_s30 }
  0x27   :  { %p4969_p0 = por %p4968_p13, %p4967_p12 }
  0x29   :  { %p4970_p1 = pnand %p4969_p0, %p4963_p11 }
  0x2b   :  { %4973 = shalt.err (!%p4970_p1)
}
  0x2c   :  { %85 = dma.hbm_to_vmem [thread:$0]  %s6789_s10, 64, %s83_s27, [#allocation8]  }
  0x2d   :  { %s5164_s5 = smov [#allocation10]   ;;  %s5165_s23 = smov [#allocation13]  }
  0x2e   :  { %s104_s22 = sshll.u32 %s5164_s5, 4  ;;  %s126_s1 = sshll.u32 %s5165_s23, 4  ;;  %s105_s22 = int_to_ptr.vmem [resolvable:$true] %s104_s22  ;;  %s127_s1 = int_to_ptr.vmem [resolvable:$true] %s126_s1 }
  0x2f   :  { %s4974_s26 = scalar_lea.hbm %s6792_s13, 16 }
  0x30   :  { %p4975_p2 = scmp.ne.s32.totalorder %s6792_s13, %s4974_s26  ;;  %p4978_p3 = scmp.lt.u32.totalorder %s4974_s26, %s6792_s13 }
  0x32   :  { %p4980_p4 = pnand %p4978_p3, %p4975_p2 }
  0x34   :  { %4983 = shalt.err (!%p4980_p4)
}
  0x35   :  { %s4984_s10 = scalar_lea.vmem %s105_s22, 16  ;;  %s4988_s27 = scalar_lea.vmem %s105_s22, 32 }
  0x36   :  { %p4985_p5 = scmp.ne.s32.totalorder %s105_s22, %s4984_s10  ;;  %p4989_p6 = scmp.lt.s32.totalorder %s105_s22, %s105_s22 }
  0x37   :  { %p4990_p7 = scmp.lt.s32.totalorder %s4988_s27, %s4984_s10 }
  0x39   :  { %p4991_p8 = por %p4990_p7, %p4989_p6 }
  0x3b   :  { %p4992_p9 = pnand %p4991_p8, %p4985_p5 }
  0x3d   :  { %4995 = shalt.err (!%p4992_p9)
}
  0x3e   :  { %107 = dma.hbm_to_vmem [thread:$0]  %s6792_s13, 16, %s105_s22, [#allocation11]  }
  0x3f   :  { %s4996_s5 = scalar_lea.hbm %s6795_s16, 16 }
  0x40   :  { %p4997_p10 = scmp.ne.s32.totalorder %s6795_s16, %s4996_s5  ;;  %p5000_p11 = scmp.lt.u32.totalorder %s4996_s5, %s6795_s16 }
  0x42   :  { %p5002_p12 = pnand %p5000_p11, %p4997_p10 }
  0x44   :  { %5005 = shalt.err (!%p5002_p12)
}
  0x45   :  { %s5006_s3 = scalar_lea.vmem %s127_s1, 16  ;;  %s5010_s28 = scalar_lea.vmem %s127_s1, 32 }
  0x46   :  { %p5007_p13 = scmp.ne.s32.totalorder %s127_s1, %s5006_s3  ;;  %p5011_p0 = scmp.lt.s32.totalorder %s127_s1, %s127_s1 }
  0x47   :  { %p5012_p1 = scmp.lt.s32.totalorder %s5010_s28, %s5006_s3 }
  0x49   :  { %p5013_p2 = por %p5012_p1, %p5011_p0 }
  0x4b   :  { %p5014_p3 = pnand %p5013_p2, %p5007_p13 }
  0x4d   :  { %5017 = shalt.err (!%p5014_p3)
}
  0x4e   :  { %129 = dma.hbm_to_vmem [thread:$0]  %s6795_s16, 16, %s127_s1, [#allocation14]  }
  0x4f   :  { %s5166_s29 = smov [#allocation2]   ;;  %s5167_s10 = smov [#allocation6]  }
  0x50   :  { %s46_s0 = sshll.u32 %s5166_s29, 4  ;;  %s70_s27 = sshll.u32 %s5167_s10, 4  ;;  %s47_s0 = int_to_ptr.vmem [resolvable:$true] %s46_s0  ;;  %s71_s27 = int_to_ptr.vmem [resolvable:$true] %s70_s27 }
  0x51   :  { %s6832_s7 = sld [smem:[#allocation45_spill]] }
  0x57   :  { %s5018_s25 = scalar_lea.hbm %s6832_s7, 48 }
  0x58   :  { %p5019_p4 = scmp.ne.s32.totalorder %s6832_s7, %s5018_s25  ;;  %p5022_p5 = scmp.lt.u32.totalorder %s5018_s25, %s6832_s7 }
  0x5a   :  { %p5024_p6 = pnand %p5022_p5, %p5019_p4 }
  0x5c   :  { %5027 = shalt.err (!%p5024_p6)
}
  0x5d   :  { %s5028_s16 = scalar_lea.vmem %s47_s0, 48  ;;  %s5032_s1 = scalar_lea.vmem %s47_s0, 64 }
  0x5e   :  { %p5029_p7 = scmp.ne.s32.totalorder %s47_s0, %s5028_s16  ;;  %p5033_p8 = scmp.lt.s32.totalorder %s47_s0, %s47_s0 }
  0x5f   :  { %p5034_p9 = scmp.lt.s32.totalorder %s5032_s1, %s5028_s16 }
  0x61   :  { %p5035_p10 = por %p5034_p9, %p5033_p8 }
  0x63   :  { %p5036_p11 = pnand %p5035_p10, %p5029_p7 }
  0x65   :  { %5039 = shalt.err (!%p5036_p11)
}
  0x66   :  { %49 = dma.hbm_to_vmem [thread:$0]  %s6832_s7, 48, %s47_s0, [#allocation3]  }
  0x67   :  { %s5040_s22 = scalar_lea.hbm %s6787_s8, 16 }
  0x68   :  { %p5041_p12 = scmp.ne.s32.totalorder %s6787_s8, %s5040_s22  ;;  %p5044_p13 = scmp.lt.u32.totalorder %s5040_s22, %s6787_s8 }
  0x6a   :  { %p5046_p0 = pnand %p5044_p13, %p5041_p12 }
  0x6c   :  { %5049 = shalt.err (!%p5046_p0)
}
  0x6d   :  { %s5050_s25 = scalar_lea.vmem %s71_s27, 16  ;;  %s5054_s5 = scalar_lea.vmem %s71_s27, 32 }
  0x6e   :  { %p5051_p1 = scmp.ne.s32.totalorder %s71_s27, %s5050_s25  ;;  %p5055_p2 = scmp.lt.s32.totalorder %s71_s27, %s71_s27 }
  0x6f   :  { %p5056_p3 = scmp.lt.s32.totalorder %s5054_s5, %s5050_s25 }
  0x71   :  { %p5057_p4 = por %p5056_p3, %p5055_p2 }
  0x73   :  { %p5058_p5 = pnand %p5057_p4, %p5051_p1 }
  0x75   :  { %5061 = shalt.err (!%p5058_p5)
}
  0x76   :  { %73 = dma.hbm_to_vmem [thread:$0]  %s6787_s8, 16, %s71_s27, [#allocation5]  }
  0x77   :  { %s5168_s23 = smov [#allocation9]   ;;  %s5169_s2 = smov [#allocation12]  }
  0x78   :  { %s94_s24 = sshll.u32 %s5168_s23, 4  ;;  %s114_s16 = sshll.u32 %s5169_s2, 4  ;;  %s95_s24 = int_to_ptr.vmem [resolvable:$true] %s94_s24  ;;  %s115_s16 = int_to_ptr.vmem [resolvable:$true] %s114_s16 }
  0x79   :  { %s5062_s3 = scalar_lea.hbm %s6791_s12, 16 }
  0x7a   :  { %p5063_p6 = scmp.ne.s32.totalorder %s6791_s12, %s5062_s3  ;;  %p5066_p7 = scmp.lt.u32.totalorder %s5062_s3, %s6791_s12 }
  0x7c   :  { %p5068_p8 = pnand %p5066_p7, %p5063_p6 }
  0x7e   :  { %5071 = shalt.err (!%p5068_p8)
}
  0x7f   :  { %s5072_s8 = scalar_lea.vmem %s95_s24, 16  ;;  %s5076_s27 = scalar_lea.vmem %s95_s24, 32 }
  0x80   :  { %p5073_p9 = scmp.ne.s32.totalorder %s95_s24, %s5072_s8  ;;  %p5077_p10 = scmp.lt.s32.totalorder %s95_s24, %s95_s24 }
  0x81   :  { %p5078_p11 = scmp.lt.s32.totalorder %s5076_s27, %s5072_s8 }
  0x83   :  { %p5079_p12 = por %p5078_p11, %p5077_p10 }
  0x85   :  { %p5080_p13 = pnand %p5079_p12, %p5073_p9 }
  0x87   :  { %5083 = shalt.err (!%p5080_p13)
}
  0x88   :  { %97 = dma.hbm_to_vmem [thread:$0]  %s6791_s12, 16, %s95_s24, [#allocation8]  }
  0x89   :  { %s5084_s5 = scalar_lea.hbm %s6793_s14, 16 }
  0x8a   :  { %p5085_p0 = scmp.ne.s32.totalorder %s6793_s14, %s5084_s5  ;;  %p5088_p1 = scmp.lt.u32.totalorder %s5084_s5, %s6793_s14 }
  0x8c   :  { %p5090_p2 = pnand %p5088_p1, %p5085_p0 }
  0x8e   :  { %5093 = shalt.err (!%p5090_p2)
}
  0x8f   :  { %s5094_s1 = scalar_lea.vmem %s115_s16, 16  ;;  %s5098_s26 = scalar_lea.vmem %s115_s16, 32 }
  0x90   :  { %p5095_p3 = scmp.ne.s32.totalorder %s115_s16, %s5094_s1  ;;  %p5099_p4 = scmp.lt.s32.totalorder %s115_s16, %s115_s16 }
  0x91   :  { %p5100_p5 = scmp.lt.s32.totalorder %s5098_s26, %s5094_s1 }
  0x93   :  { %p5101_p6 = por %p5100_p5, %p5099_p4 }
  0x95   :  { %p5102_p7 = pnand %p5101_p6, %p5095_p3 }
  0x97   :  { %5105 = shalt.err (!%p5102_p7)
}
  0x98   :  { %117 = dma.hbm_to_vmem [thread:$0]  %s6793_s14, 16, %s115_s16, [#allocation11]  }
  0x99   :  { %s5170_s3 = smov [#allocation15]   ;;  %s5171_s13 = smov [#allocation16]  }
  0x9a   :  { %s138_s28 = sshll.u32 %s5170_s3, 4  ;;  %s150_s22 = sshll.u32 %s5171_s13, 4  ;;  %s139_s28 = int_to_ptr.vmem [resolvable:$true] %s138_s28  ;;  %s151_s22 = int_to_ptr.vmem [resolvable:$true] %s150_s22 }
  0x9b   :  { %s5106_s27 = scalar_lea.hbm %s6797_s18, 16 }
  0x9c   :  { %p5107_p8 = scmp.ne.s32.totalorder %s6797_s18, %s5106_s27  ;;  %p5110_p9 = scmp.lt.u32.totalorder %s5106_s27, %s6797_s18 }
  0x9e   :  { %p5112_p10 = pnand %p5110_p9, %p5107_p8 }
  0xa0   :  { %5115 = shalt.err (!%p5112_p10)
}
  0xa1   :  { %s5116_s14 = scalar_lea.vmem %s139_s28, 16  ;;  %s5120_s16 = scalar_lea.vmem %s139_s28, 32 }
  0xa2   :  { %p5117_p11 = scmp.ne.s32.totalorder %s139_s28, %s5116_s14  ;;  %p5121_p12 = scmp.lt.s32.totalorder %s139_s28, %s139_s28 }
  0xa3   :  { %p5122_p13 = scmp.lt.s32.totalorder %s5120_s16, %s5116_s14 }
  0xa5   :  { %p5123_p0 = por %p5122_p13, %p5121_p12 }
  0xa7   :  { %p5124_p1 = pnand %p5123_p0, %p5117_p11 }
  0xa9   :  { %5127 = shalt.err (!%p5124_p1)
}
  0xaa   :  { %141 = dma.hbm_to_vmem [thread:$0]  %s6797_s18, 16, %s139_s28, [#allocation14]  }
  0xab   :  { %s5128_s2 = scalar_lea.hbm %s6799_s20, 16 }
  0xac   :  { %p5129_p2 = scmp.ne.s32.totalorder %s6799_s20, %s5128_s2  ;;  %p5132_p3 = scmp.lt.u32.totalorder %s5128_s2, %s6799_s20 }
  0xae   :  { %p5134_p4 = pnand %p5132_p3, %p5129_p2 }
  0xb0   :  { %5137 = shalt.err (!%p5134_p4)
}
  0xb1   :  { %s5138_s3 = scalar_lea.vmem %s151_s22, 16  ;;  %s5142_s13 = scalar_lea.vmem %s151_s22, 32 }
  0xb2   :  { %p5139_p5 = scmp.ne.s32.totalorder %s151_s22, %s5138_s3  ;;  %p5143_p6 = scmp.lt.s32.totalorder %s151_s22, %s151_s22 }
  0xb3   :  { %p5144_p7 = scmp.lt.s32.totalorder %s5142_s13, %s5138_s3 }
  0xb5   :  { %p5145_p8 = por %p5144_p7, %p5143_p6 }
  0xb7   :  { %p5146_p9 = pnand %p5145_p8, %p5139_p5 }
  0xb9   :  { %5149 = shalt.err (!%p5146_p9)
}
  0xba   :  { %153 = dma.hbm_to_vmem [thread:$0]  %s6799_s20, 16, %s151_s22, [#allocation17]  }
  0xbb   :  { %5150 = dma.done.wait [#allocation3], 48  }
  0xbc   :  { %5151 = vsyncadd [#allocation3], 4294967248 }
  0xbd   :  { %5152 = dma.done.wait [#allocation5], 32  }
  0xbe   :  { %5153 = vsyncadd [#allocation5], 4294967264 }
  0xbf   :  { %5154 = dma.done.wait [#allocation8], 80  }
  0xc0   :  { %5155 = vsyncadd [#allocation8], 4294967216 }
  0xc1   :  { %5156 = dma.done.wait [#allocation11], 32  }
  0xc2   :  { %5157 = vsyncadd [#allocation11], 4294967264 }
  0xc3   :  { %5158 = dma.done.wait [#allocation14], 32  }
  0xc4   :  { %5159 = vsyncadd [#allocation14], 4294967264 }
  0xc5   :  { %5160 = dma.done.wait [#allocation17], 16  }
  0xc6   :  { %5161 = vsyncadd [#allocation17], 4294967280  ;;  %v5172_v0 = vmov 0   ;;  %s6833_s20 = sld [smem:[#allocation44_spill]]  ;;  %s6834_s26 = sld [smem:[#allocation41_spill]]  ;;  %v6808_v37 = vmov 0.0   ;;  %v6807_v38 = vlaneseq }
  0xc7   :  { %422 = vmatprep.mubr.bf16.mxu0 %v5172_v0  ;;  %4633 = vset.pattern.permute.xlu0 %v5172_v0  ;;  %vm5174_vm0 = vmmov 0   ;;  %v245_v41 = vld [vmem:[#allocation2] sm:$0x7]  ;;  %vm1020_vm1 = vcmask 1043456   ;;  %s6835_s28 = sld [smem:[#allocation42_spill]]  ;;  %vm912_vm2 = vcmask 64512  }
  0xc8   :  { %v5514_v39 = vshrl.u32 %v6807_v38, 7  ;;  %s6872_s1 = sld [smem:[#allocation43_spill]]  ;;  %vm3465_vm3 = vcmask 1041409   ;;  %vm3468_vm4 = vcmask 1042434   ;;  %vm3471_vm5 = vcmask 1043459  }
  0xc9   :  { %vm3474_vm6 = vcmask 1044484   ;;  %vm3477_vm7 = vcmask 1045509   ;;  %vm3480_vm8 = vcmask 1046534   ;;  %vm3483_vm9 = vcmask 1047559  }
  0xca   :  { %v253_v40 = vsub.s32 1, %v5514_v39  ;;  %v249_v43 = vsub.s32 0, %v5514_v39  ;;  %v257_v52 = vsub.s32 2, %v5514_v39  ;;  %vm3799_vm10 = vcmask 15360  }
  0xcc   :  { %v4636_v1 = vld [vmem:[%s6833_s20 + $0x4] ss:$12 sps:$4 sm:$0xff]   ;;  %v4638_v2 = vld [vmem:[%s6833_s20] ss:$12 sps:$4 sm:$0xff]   ;;  %v4639_v3 = vld [vmem:[%s6833_s20 + $0x1c] ss:$12 sps:$4 sm:$0xff]   ;;  %v5519_v42 = vrot.slane %v245_v41, %v253_v40  ;;  %v5525_v48 = vrot.slane %v245_v41, %v249_v43  ;;  %v5534_v60 = vrot.slane %v245_v41, %v257_v52 }
  0xcd   :  { %390 = vmatprep.subr.bf16.mxu0 %v4636_v1  ;;  %v4641_v4 = vld [vmem:[%s6833_s20 + $0x18] ss:$12 sps:$4 sm:$0xff]   ;;  %v4642_v5 = vld [vmem:[%s6833_s20 + $0x34] ss:$12 sps:$4 sm:$0xff]   ;;  %v4644_v6 = vld [vmem:[%s6833_s20 + $0x30] ss:$12 sps:$4 sm:$0xff]  }
  0xce   :  { %391 = vmatpush1.bf16.msra.mxu0 %v4638_v2  ;;  %v4645_v7 = vld [vmem:[%s6833_s20 + $0x4c] ss:$12 sps:$4 sm:$0xff]   ;;  %v185_v8 = vld [vmem:[%s6834_s26] sm:$0xff]  ;;  %v4647_v9 = vld [vmem:[%s6833_s20 + $0x48] ss:$12 sps:$4 sm:$0xff]  }
  0xcf   :  { %392 = vmatprep.subr.bf16.mxu0 %v4639_v3  ;;  %v186_v10 = vld [vmem:[%s6834_s26 + $0x8] sm:$0xff]  ;;  %v4648_v11 = vld [vmem:[%s6833_s20 + $0x64] ss:$12 sps:$4 sm:$0xff]   ;;  %v4654_v19 = vld [vmem:[%s6833_s20 + $0x94] ss:$12 sps:$4 sm:$0xff]  }
  0xd0   :  { %v209_v12 = vpack.c.bf16 %v186_v10, %v185_v8  ;;  %v4650_v13 = vld [vmem:[%s6833_s20 + $0x60] ss:$12 sps:$4 sm:$0xff]   ;;  %v4660_v14 = vld [vmem:[%s6833_s20 + $0x8] ss:$12 sps:$4 sm:$0xff]   ;;  %v4662_v17 = vld [vmem:[%s6833_s20 + $0x38] ss:$12 sps:$4 sm:$0xff]  }
  0xd1   :  { %v4661_v15 = vld [vmem:[%s6833_s20 + $0x20] ss:$12 sps:$4 sm:$0xff]   ;;  %v4651_v16 = vld [vmem:[%s6833_s20 + $0x7c] ss:$12 sps:$4 sm:$0xff]   ;;  %4395 = vmatprep.subr.bf16.mxu1 %v4660_v14  ;;  %v4653_v18 = vld [vmem:[%s6833_s20 + $0x78] ss:$12 sps:$4 sm:$0xff]  }
  0xd2   :  { %393 = vmatpush1.bf16.msra.mxu0 %v4641_v4  ;;  %4411 = vmatprep.mubr.bf16.mxu1 %v209_v12  ;;  %v4656_v20 = vld [vmem:[%s6833_s20 + $0x90] ss:$12 sps:$4 sm:$0xff]   ;;  %v4657_v22 = vld [vmem:[%s6833_s20 + $0xac] ss:$12 sps:$4 sm:$0xff]   ;;  %v4664_v23 = vld [vmem:[%s6833_s20 + $0x68] ss:$12 sps:$4 sm:$0xff]  }
  0xd3   :  { %394 = vmatprep.subr.bf16.mxu0 %v4642_v5  ;;  %4396 = vmatpush3.bf16.msra.mxu1 %v4660_v14  ;;  %v4663_v21 = vld [vmem:[%s6833_s20 + $0x50] ss:$12 sps:$4 sm:$0xff]   ;;  %v4659_v24 = vld [vmem:[%s6833_s20 + $0xa8] ss:$12 sps:$4 sm:$0xff]   ;;  %v4665_v25 = vld [vmem:[%s6833_s20 + $0x80] ss:$12 sps:$4 sm:$0xff]  }
  0xd4   :  { %4397 = vmatprep.subr.bf16.mxu1 %v4661_v15  ;;  %v4666_v26 = vld [vmem:[%s6833_s20 + $0x98] ss:$12 sps:$4 sm:$0xff]   ;;  %v187_v27 = vld [vmem:[%s6834_s26 + $0x10] sm:$0xff]  ;;  %v190_v32 = vld [vmem:[%s6834_s26 + $0x28] sm:$0xff] }
  0xd5   :  { %v188_v28 = vld [vmem:[%s6834_s26 + $0x18] sm:$0xff]  ;;  %v189_v31 = vld [vmem:[%s6834_s26 + $0x20] sm:$0xff]  ;;  %v191_v34 = vld [vmem:[%s6834_s26 + $0x30] sm:$0xff] }
  0xd6   :  { %395 = vmatpush1.bf16.msra.mxu0 %v4644_v6  ;;  %v4667_v29 = vld [vmem:[%s6833_s20 + $0xb0] ss:$12 sps:$4 sm:$0xff]   ;;  %v210_v30 = vpack.c.bf16 %v188_v28, %v187_v27  ;;  %v211_v33 = vpack.c.bf16 %v190_v32, %v189_v31  ;;  %s6836_s20 = sld [smem:[#allocation46_spill]] }
  0xd7   :  { %396 = vmatprep.subr.bf16.mxu0 %v4645_v7  ;;  %4398 = vmatpush3.bf16.msra.mxu1 %v4661_v15  ;;  %v192_v35 = vld [vmem:[%s6834_s26 + $0x38] sm:$0xff] }
  0xd8   :  { %4399 = vmatprep.subr.bf16.mxu1 %v4662_v17  ;;  %v212_v36 = vpack.c.bf16 %v192_v35, %v191_v34 }
  0xda   :  { %397 = vmatpush1.bf16.msra.mxu0 %v4647_v9 }
  0xdb   :  { %398 = vmatprep.subr.bf16.mxu0 %v4648_v11  ;;  %4400 = vmatpush3.bf16.msra.mxu1 %v4662_v17 }
  0xdc   :  { %4401 = vmatprep.subr.bf16.mxu1 %v4663_v21 }
  0xde   :  { %399 = vmatpush1.bf16.msra.mxu0 %v4650_v13 }
  0xdf   :  { %400 = vmatprep.subr.bf16.mxu0 %v4651_v16  ;;  %4402 = vmatpush3.bf16.msra.mxu1 %v4663_v21 }
  0xe0   :  { %4403 = vmatprep.subr.bf16.mxu1 %v4664_v23 }
  0xe2   :  { %401 = vmatpush1.bf16.msra.mxu0 %v4653_v18 }
  0xe3   :  { %402 = vmatprep.subr.bf16.mxu0 %v4654_v19  ;;  %4404 = vmatpush3.bf16.msra.mxu1 %v4664_v23 }
  0xe4   :  { %4405 = vmatprep.subr.bf16.mxu1 %v4665_v25 }
  0xe6   :  { %403 = vmatpush1.bf16.msra.mxu0 %v4656_v20 }
  0xe7   :  { %404 = vmatprep.subr.bf16.mxu0 %v4657_v22  ;;  %4406 = vmatpush3.bf16.msra.mxu1 %v4665_v25 }
  0xe8   :  { %4407 = vmatprep.subr.bf16.mxu1 %v4666_v26 }
  0xea   :  { %405 = vmatpush1.bf16.msra.mxu0 %v4659_v24 }
  0xeb   :  { %4408 = vmatpush3.bf16.msra.mxu1 %v4666_v26  ;;  %4431 = vmatprep.subr.bf16.mxu0 %v6808_v37 }
  0xec   :  { %4409 = vmatprep.subr.bf16.mxu1 %v4667_v29 }
  0xed   :  { %423 = vmatmul.mubr.bf16.vlgmr.msra.gmra.mrb[0].mxu0 %v209_v12 }
  0xee   :  { %432 = vmatprep.mubr.bf16.mxu0 %v5172_v0 }
  0xef   :  { %4410 = vmatpush3.bf16.msra.mxu1 %v4667_v29 }
  0xf0   :  { %4419 = vmatprep.subr.bf16.mxu1 %v6808_v37 }
  0xf2   :  { %4412 = vmatmul.mubr.bf16.vlgmr.msra.gmra.mrb[0].mxu1 %v210_v30 }
  0xf3   :  { %4415 = vmatprep.mubr.bf16.mxu1 %v211_v33 }
  0xf5   :  { %433 = vmatmul.mubr.bf16.gmra.mrb[4].mxu0 %v210_v30 }
  0xf6   :  { %442 = vmatprep.mubr.bf16.mxu0 %v5172_v0 }
  0xfa   :  { %4416 = vmatmul.mubr.bf16.gmra.mrb[4].mxu1 %v212_v36 }
  0xfb   :  { %4421 = vmatprep.mubr.msk.bf16.mxu1 %vm5174_vm0, %v6808_v37 }
  0xfd   :  { %443 = vmatmul.mubr.bf16.gmra.mrb[8].mxu0 %v211_v33 }
  0xfe   :  { %452 = vmatprep.mubr.bf16.mxu0 %v5172_v0 }
 0x105   :  { %453 = vmatmul.mubr.bf16.gmra.mrb[12].mxu0 %v212_v36 }
 0x106   :  { %4433 = vmatprep.mubr.msk.bf16.mxu0 %vm5174_vm0, %v6808_v37 }
 0x1c0   :  { %v424_v44 = vpop.f32.mrb[0].mxu0 }
 0x1c1   :  { %v426_v45 = vpop.f32.mrb[1].mxu0  ;;  %v425_v51 = vadd.f32 %v424_v44, %v5525_v48 }
 0x1c2   :  { %v427_v46 = vadd.f32 %v426_v45, %v5519_v42  ;;  %v428_v47 = vpop.f32.mrb[2].mxu0 }
 0x1c3   :  { %v430_v49 = vpop.f32.mrb[3].mxu0  ;;  %v528_v58 = vpack.c.bf16 %v425_v51, %v425_v51  ;;  %v429_v1 = vadd.f32 %v428_v47, %v5525_v48 }
 0x1c4   :  { %v536_v50 = vpack.c.bf16 %v427_v46, %v427_v46  ;;  %v431_v53 = vadd.f32 %v430_v49, %v5519_v42 }
 0x1c5   :  { %v4413_v63 = vpop.f32.mrb[0].mxu1  ;;  %v529_v14 = vpack.c.bf16 %v429_v1, %v429_v1 }
 0x1c6   :  { %4420 = vmatpush3.bf16.xpose.msra.mxu1 %v536_v50  ;;  %v537_v61 = vpack.c.bf16 %v431_v53, %v431_v53  ;;  %v506_v3 = vadd.f32 %v4413_v63, %v5534_v60  ;;  %v497_v4 = vpop.f32.mrb[1].mxu1 }
 0x1c7   :  { %4425 = vmatprep.subr.bf16.mxu1 %v6808_v37  ;;  %v4414_v7 = vpop.f32.mrb[2].mxu1  ;;  %v498_v49 = vadd.f32 %v497_v4, %v5534_v60 }
 0x1c8   :  { %v434_v54 = vpop.f32.mrb[4].mxu0  ;;  %v1011_v9 = vpack.c.bf16 %v506_v3, %v506_v3  ;;  %v509_v10 = vadd.f32 %v4414_v7, %v5534_v60  ;;  %v500_v11 = vpop.f32.mrb[3].mxu1 }
 0x1c9   :  { %v436_v55 = vpop.f32.mrb[5].mxu0  ;;  %v435_v2 = vadd.f32 %v434_v54, %v5525_v48  ;;  %v1009_v63 = vpack.c.bf16 %v498_v49, %v498_v49  ;;  %v501_v3 = vadd.f32 %v500_v11, %v5534_v60 }
 0x1ca   :  { %v437_v56 = vadd.f32 %v436_v55, %v5519_v42  ;;  %v438_v57 = vpop.f32.mrb[6].mxu0  ;;  %v5547_v17 = vsel %vm1020_vm1, %v1011_v9, 0  ;;  %v1012_v18 = vpack.c.bf16 %v509_v10, %v509_v10 }
 0x1cb   :  { %v440_v59 = vpop.f32.mrb[7].mxu0  ;;  %v530_v15 = vpack.c.bf16 %v435_v2, %v435_v2  ;;  %v439_v22 = vadd.f32 %v438_v57, %v5525_v48 }
 0x1cc   :  { %v538_v62 = vpack.c.bf16 %v437_v56, %v437_v56  ;;  %v441_v5 = vadd.f32 %v440_v59, %v5519_v42  ;;  %v5550_v21 = vsel %vm1020_vm1, %v1012_v18, 0 }
 0x1cd   :  { %4422 = vmatmul.mubr.bf16.vlgmr.msra.gmra.mrb[8].mxu1 %v528_v58  ;;  %v4417_v23 = vpop.f32.mrb[4].mxu1  ;;  %v531_v35 = vpack.c.bf16 %v439_v22, %v439_v22 }
 0x1ce   :  { %4426 = vmatpush3.bf16.xpose.msra.mxu1 %v537_v61  ;;  %4432 = vmatpush3.bf16.xpose.msra.mxu0 %v538_v62  ;;  %v539_v19 = vpack.c.bf16 %v441_v5, %v441_v5  ;;  %v522_v25 = vadd.f32 %v4417_v23, %v5534_v60  ;;  %v513_v26 = vpop.f32.mrb[5].mxu1  ;;  %v1022_v5 = vsel %vm1020_vm1, %v1009_v63, 0 }
 0x1cf   :  { %4427 = vmatprep.mubr.msk.bf16.mxu1 %vm5174_vm0, %v6808_v37  ;;  %4437 = vmatprep.subr.bf16.mxu1 %v6808_v37  ;;  %v514_v29 = vadd.f32 %v513_v26, %v5534_v60  ;;  %v4418_v30 = vpop.f32.mrb[6].mxu1 }
 0x1d0   :  { %v444_v6 = vpop.f32.mrb[8].mxu0  ;;  %4443 = vmatprep.subr.bf16.mxu0 %v6808_v37  ;;  %v1015_v32 = vpack.c.bf16 %v522_v25, %v522_v25  ;;  %v525_v33 = vadd.f32 %v4418_v30, %v5534_v60  ;;  %v516_v34 = vpop.f32.mrb[7].mxu1  ;;  %v4069_v30 = vld [vmem:[%s6835_s28 + $0x3] ss:$0 sm:$0xff] }
 0x1d1   :  { %v446_v8 = vpop.f32.mrb[9].mxu0  ;;  %v445_v24 = vadd.f32 %v444_v6, %v5525_v48  ;;  %v1013_v44 = vpack.c.bf16 %v514_v29, %v514_v29  ;;  %v517_v45 = vadd.f32 %v516_v34, %v5534_v60  ;;  %v1010_v6 = vpack.c.bf16 %v501_v3, %v501_v3 }
 0x1d2   :  { %v447_v12 = vadd.f32 %v446_v8, %v5519_v42  ;;  %v448_v13 = vpop.f32.mrb[10].mxu0  ;;  %v5568_v50 = vsel %vm1020_vm1, %v1015_v32, 0  ;;  %v1016_v51 = vpack.c.bf16 %v525_v33, %v525_v33 }
 0x1d3   :  { %v450_v16 = vpop.f32.mrb[11].mxu0  ;;  %v532_v46 = vpack.c.bf16 %v445_v24, %v445_v24  ;;  %v5571_v55 = vsel %vm1020_vm1, %v1013_v44, 0  ;;  %v1014_v56 = vpack.c.bf16 %v517_v45, %v517_v45  ;;  %v449_v59 = vadd.f32 %v448_v13, %v5525_v48 }
 0x1d4   :  { %v540_v20 = vpack.c.bf16 %v447_v12, %v447_v12  ;;  %v451_v27 = vadd.f32 %v450_v16, %v5519_v42  ;;  %v5574_v57 = vsel %vm1020_vm1, %v1016_v51, 0  ;;  %v1068_v7 = vsel %vm1020_vm1, %v1010_v6, 0 }
 0x1d5   :  { %4428 = vmatmul.mubr.bf16.vlgmr.msra.gmra.mrb[12].mxu1 %v529_v14  ;;  %4434 = vmatmul.mubr.bf16.vlgmr.msra.gmra.mrb[16].mxu0 %v530_v15  ;;  %v5577_v58 = vsel %vm1020_vm1, %v1014_v56, 0  ;;  %v533_v1 = vpack.c.bf16 %v449_v59, %v449_v59  ;;  %v4067_v14 = vld [vmem:[%s6835_s28 + $0x1] ss:$0 sm:$0xff]  ;;  %v4068_v15 = vld [vmem:[%s6835_s28 + $0x2] ss:$0 sm:$0xff] }
 0x1d6   :  { %4438 = vmatpush3.bf16.xpose.msra.mxu1 %v539_v19  ;;  %4444 = vmatpush3.bf16.xpose.msra.mxu0 %v540_v20  ;;  %v541_v53 = vpack.c.bf16 %v451_v27, %v451_v27 }
 0x1d7   :  { %4439 = vmatprep.mubr.msk.bf16.mxu1 %vm5174_vm0, %v6808_v37  ;;  %4445 = vmatprep.mubr.msk.bf16.mxu0 %vm5174_vm0, %v6808_v37 }
 0x1d8   :  { %v454_v28 = vpop.f32.mrb[12].mxu0  ;;  %4449 = vmatprep.subr.bf16.mxu1 %v6808_v37  ;;  %4455 = vmatprep.subr.bf16.mxu0 %v6808_v37 }
 0x1d9   :  { %v456_v31 = vpop.f32.mrb[13].mxu0  ;;  %v455_v61 = vadd.f32 %v454_v28, %v5525_v48 }
 0x1da   :  { %v457_v36 = vadd.f32 %v456_v31, %v5519_v42  ;;  %v458_v41 = vpop.f32.mrb[14].mxu0  ;;  %v4070_v31 = vld [vmem:[%s6835_s28 + $0x4] ss:$0 sm:$0xff] }
 0x1db   :  { %v460_v47 = vpop.f32.mrb[15].mxu0  ;;  %v534_v2 = vpack.c.bf16 %v455_v61, %v455_v61 }
 0x1dc   :  { %v542_v54 = vpack.c.bf16 %v457_v36, %v457_v36  ;;  %v461_v62 = vadd.f32 %v460_v47, %v5519_v42  ;;  %v459_v42 = vadd.f32 %v458_v41, %v5525_v48  ;;  %v4066_v48 = vld [vmem:[%s6835_s28] ss:$0 sm:$0xff] }
 0x1dd   :  { %4440 = vmatmul.mubr.bf16.vlgmr.msra.gmra.mrb[16].mxu1 %v531_v35  ;;  %4446 = vmatmul.mubr.bf16.vlgmr.msra.gmra.mrb[20].mxu0 %v532_v46 }
 0x1de   :  { %4450 = vmatpush3.bf16.xpose.msra.mxu1 %v541_v53  ;;  %4456 = vmatpush3.bf16.xpose.msra.mxu0 %v542_v54  ;;  %v543_v4 = vpack.c.bf16 %v461_v62, %v461_v62  ;;  %v535_v60 = vpack.c.bf16 %v459_v42, %v459_v42  ;;  %v4071_v53 = vld [vmem:[%s6835_s28 + $0x5] ss:$0 sm:$0xff]  ;;  %v4072_v54 = vld [vmem:[%s6835_s28 + $0x6] ss:$0 sm:$0xff] }
 0x1df   :  { %4451 = vmatprep.mubr.msk.bf16.mxu1 %vm5174_vm0, %v6808_v37  ;;  %4457 = vmatprep.mubr.msk.bf16.mxu0 %vm5174_vm0, %v6808_v37 }
 0x1e0   :  { %4461 = vmatprep.subr.bf16.mxu1 %v6808_v37  ;;  %4467 = vmatprep.subr.bf16.mxu0 %v6808_v37 }
 0x1e5   :  { %4452 = vmatmul.mubr.bf16.vlgmr.msra.gmra.mrb[20].mxu1 %v533_v1  ;;  %4458 = vmatmul.mubr.bf16.vlgmr.msra.gmra.mrb[24].mxu0 %v534_v2 }
 0x1e6   :  { %4462 = vmatpush3.bf16.xpose.msra.mxu1 %v543_v4  ;;  %4463 = vmatprep.mubr.msk.bf16.mxu1 %vm5174_vm0, %v6808_v37 }
 0x1e7   :  { %4473 = vmatprep.subr.bf16.mxu1 %v6808_v37  ;;  %4468 = vmatpush3.bf16.msra.mxu0 %v1022_v5 }
 0x1e8   :  { %4469 = vmatprep.mubr.msk.bf16.mxu0 %vm5174_vm0, %v6808_v37  ;;  %4479 = vmatprep.subr.bf16.mxu0 %v6808_v37 }
 0x1ed   :  { %4464 = vmatmul.mubr.bf16.vlgmr.msra.gmra.mrb[24].mxu1 %v535_v60  ;;  %v4073_v60 = vld [vmem:[%s6835_s28 + $0x7] ss:$0 sm:$0xff] }
 0x1ee   :  { %4474 = vmatpush3.bf16.msra.mxu1 %v1068_v7  ;;  %4475 = vmatprep.mubr.msk.bf16.mxu1 %vm5174_vm0, %v6808_v37 }
 0x1ef   :  { %4485 = vmatprep.subr.bf16.mxu1 %v6808_v37 }
 0x2a0   :  { %v626_v8 = vpop.f32.mrb[8].mxu1 }
 0x2a1   :  { %v5604_v9 = vadd.f32 %v4066_v48, %v626_v8  ;;  %v4423_v10 = vpop.f32.mrb[9].mxu1 }
 0x2a2   :  { %v629_v11 = vpop.f32.mrb[10].mxu1 }
 0x2a3   :  { %v4424_v12 = vpop.f32.mrb[11].mxu1  ;;  %v913_v13 = vsel %vm912_vm2, %v5604_v9, -inf }
 0x2a4   :  { %914 = vmax.xlane.f32.xlu0 %v913_v13 }
 0x2a8   :  { %v666_v16 = vpop.f32.mrb[12].mxu1  ;;  %v706_v18 = vpop.f32.mrb[16].mxu0 }
 0x2a9   :  { %v667_v19 = vadd.f32 %v4067_v14, %v666_v16  ;;  %v707_v20 = vadd.f32 %v4068_v15, %v706_v18  ;;  %v4429_v22 = vpop.f32.mrb[13].mxu1  ;;  %v4435_v23 = vpop.f32.mrb[17].mxu0 }
 0x2aa   :  { %v669_v24 = vpop.f32.mrb[14].mxu1  ;;  %v709_v25 = vpop.f32.mrb[18].mxu0 }
 0x2ab   :  { %v4430_v26 = vpop.f32.mrb[15].mxu1  ;;  %v4436_v27 = vpop.f32.mrb[19].mxu0  ;;  %v919_v28 = vsel %vm912_vm2, %v707_v20, -inf  ;;  %v916_v29 = vsel %vm912_vm2, %v667_v19, -inf }
 0x2ac   :  { %920 = vmax.xlane.f32.xlu1 %v919_v28  ;;  %917 = vmax.xlane.f32.xlu0 %v916_v29 }
 0x2b0   :  { %v746_v32 = vpop.f32.mrb[16].mxu1  ;;  %v786_v33 = vpop.f32.mrb[20].mxu0 }
 0x2b1   :  { %v747_v34 = vadd.f32 %v4069_v30, %v746_v32  ;;  %v787_v35 = vadd.f32 %v4070_v31, %v786_v33  ;;  %v4441_v36 = vpop.f32.mrb[17].mxu1  ;;  %v4447_v41 = vpop.f32.mrb[21].mxu0 }
 0x2b2   :  { %v749_v44 = vpop.f32.mrb[18].mxu1  ;;  %v789_v45 = vpop.f32.mrb[22].mxu0 }
 0x2b3   :  { %v4442_v46 = vpop.f32.mrb[19].mxu1  ;;  %v925_v47 = vsel %vm912_vm2, %v787_v35, -inf  ;;  %v922_v49 = vsel %vm912_vm2, %v747_v34, -inf  ;;  %v4448_v51 = vpop.f32.mrb[23].mxu0 }
 0x2b4   :  { %926 = vmax.xlane.f32.xlu0 %v925_v47  ;;  %923 = vmax.xlane.f32.xlu1 %v922_v49 }
 0x2b8   :  { %v826_v56 = vpop.f32.mrb[20].mxu1  ;;  %v866_v59 = vpop.f32.mrb[24].mxu0 }
 0x2b9   :  { %v827_v61 = vadd.f32 %v4071_v53, %v826_v56  ;;  %v867_v62 = vadd.f32 %v4072_v54, %v866_v59  ;;  %v4453_v63 = vpop.f32.mrb[21].mxu1  ;;  %v4459_v1 = vpop.f32.mrb[25].mxu0 }
 0x2ba   :  { %v829_v2 = vpop.f32.mrb[22].mxu1  ;;  %v869_v3 = vpop.f32.mrb[26].mxu0 }
 0x2bb   :  { %v931_v4 = vsel %vm912_vm2, %v867_v62, -inf  ;;  %v928_v5 = vsel %vm912_vm2, %v827_v61, -inf  ;;  %v4454_v42 = vpop.f32.mrb[23].mxu1  ;;  %v4460_v6 = vpop.f32.mrb[27].mxu0 }
 0x2bc   :  { %932 = vmax.xlane.f32.xlu0 %v931_v4  ;;  %929 = vmax.xlane.f32.xlu1 %v928_v5 }
 0x2c0   :  { %v906_v7 = vpop.f32.mrb[24].mxu1 }
 0x2c1   :  { %v907_v48 = vadd.f32 %v4073_v60, %v906_v7  ;;  %v4465_v8 = vpop.f32.mrb[25].mxu1 }
 0x2c2   :  { %v909_v10 = vpop.f32.mrb[26].mxu1 }
 0x2c3   :  { %v934_v11 = vsel %vm912_vm2, %v907_v48, -inf  ;;  %v4466_v12 = vpop.f32.mrb[27].mxu1 }
 0x2c4   :  { %935 = vmax.xlane.f32.xlu1 %v934_v11 }
 0x331   :  { %v915_v13 = vpop.xlane.xlu0 %914 }
 0x332   :  { %v937_v14 = vsub.f32 %v5604_v9, %v915_v13 }
 0x334   :  { %v945_v15 = vmul.f32 1.442695, %v937_v14 }
 0x336   :  { %4788 = vpow2.f32 %v945_v15 }
 0x339   :  { %v921_v16 = vpop.xlane.xlu1 %920  ;;  %v918_v18 = vpop.xlane.xlu0 %917 }
 0x33a   :  { %v939_v22 = vsub.f32 %v707_v20, %v921_v16  ;;  %v938_v23 = vsub.f32 %v667_v19, %v918_v18 }
 0x33c   :  { %v949_v24 = vmul.f32 1.442695, %v939_v22  ;;  %v947_v25 = vmul.f32 1.442695, %v938_v23 }
 0x33e   :  { %4790 = vpow2.f32 %v949_v24 }
 0x33f   :  { %4792 = vpow2.f32 %v947_v25 }
 0x340   :  { %v4789_v26 = vpop.eup %4788 }
 0x341   :  { %v927_v27 = vpop.xlane.xlu0 %926  ;;  %v924_v28 = vpop.xlane.xlu1 %923  ;;  %v961_v29 = vsel %vm912_vm2, %v4789_v26, 0.0 }
 0x342   :  { %v941_v30 = vsub.f32 %v787_v35, %v927_v27  ;;  %v940_v31 = vsub.f32 %v747_v34, %v924_v28  ;;  %962 = vadd.xlane.f32.xlu0 %v961_v29 }
 0x344   :  { %v953_v32 = vmul.f32 1.442695, %v941_v30  ;;  %v951_v9 = vmul.f32 1.442695, %v940_v31 }
 0x346   :  { %4794 = vpow2.f32 %v953_v32 }
 0x347   :  { %4796 = vpow2.f32 %v951_v9 }
 0x348   :  { %v4791_v33 = vpop.eup %4790 }
 0x349   :  { %v4793_v36 = vpop.eup %4792  ;;  %v933_v20 = vpop.xlane.xlu0 %932  ;;  %v967_v41 = vsel %vm912_vm2, %v4791_v33, 0.0 }
 0x34a   :  { %v930_v19 = vpop.xlane.xlu1 %929  ;;  %v943_v44 = vsub.f32 %v867_v62, %v933_v20  ;;  %968 = vadd.xlane.f32.xlu0 %v967_v41  ;;  %v964_v46 = vsel %vm912_vm2, %v4793_v36, 0.0  ;;  %v4671_v20 = vld [vmem:[%s6836_s20 + $0x18] sm:$0xff]   ;;  %v4674_v41 = vld [vmem:[%s6836_s20 + $0x30] sm:$0xff]  }
 0x34b   :  { %v942_v45 = vsub.f32 %v827_v61, %v930_v19  ;;  %965 = vadd.xlane.f32.xlu1 %v964_v46  ;;  %v4673_v19 = vld [vmem:[%s6836_s20 + $0x28] sm:$0xff]  }
 0x34c   :  { %v957_v47 = vmul.f32 1.442695, %v943_v44  ;;  %v4675_v44 = vld [vmem:[%s6836_s20 + $0x38] sm:$0xff]  }
 0x34d   :  { %v955_v35 = vmul.f32 1.442695, %v942_v45 }
 0x34e   :  { %4798 = vpow2.f32 %v957_v47 }
 0x34f   :  { %4800 = vpow2.f32 %v955_v35 }
 0x350   :  { %v4795_v34 = vpop.eup %4794 }
 0x351   :  { %v4797_v49 = vpop.eup %4796  ;;  %v936_v51 = vpop.xlane.xlu1 %935  ;;  %v973_v53 = vsel %vm912_vm2, %v4795_v34, 0.0 }
 0x352   :  { %v944_v54 = vsub.f32 %v907_v48, %v936_v51  ;;  %974 = vadd.xlane.f32.xlu0 %v973_v53  ;;  %v970_v56 = vsel %vm912_vm2, %v4797_v49, 0.0 }
 0x353   :  { %971 = vadd.xlane.f32.xlu1 %v970_v56 }
 0x354   :  { %v959_v59 = vmul.f32 1.442695, %v944_v54 }
 0x356   :  { %4802 = vpow2.f32 %v959_v59 }
 0x358   :  { %v4799_v61 = vpop.eup %4798 }
 0x359   :  { %v5642_v62 = vpop.eup %4800  ;;  %v979_v63 = vsel %vm912_vm2, %v4799_v61, 0.0 }
 0x35a   :  { %980 = vadd.xlane.f32.xlu0 %v979_v63  ;;  %v976_v1 = vsel %vm912_vm2, %v5642_v62, 0.0 }
 0x35b   :  { %977 = vadd.xlane.f32.xlu1 %v976_v1 }
 0x360   :  { %v5647_v2 = vpop.eup %4802 }
 0x361   :  { %v982_v3 = vsel %vm912_vm2, %v5647_v2, 0.0 }
 0x362   :  { %983 = vadd.xlane.f32.xlu1 %v982_v3 }
 0x3cf   :  { %v963_v4 = vpop.xlane.xlu0 %962 }
 0x3d0   :  { %4804 = vrcp.f32 %v963_v4 }
 0x3d7   :  { %v969_v5 = vpop.xlane.xlu0 %968 }
 0x3d8   :  { %4806 = vrcp.f32 %v969_v5  ;;  %v966_v42 = vpop.xlane.xlu1 %965 }
 0x3d9   :  { %4808 = vrcp.f32 %v966_v42 }
 0x3da   :  { %v4805_v6 = vpop.eup %4804 }
 0x3db   :  { %v993_v60 = vmul.f32 %v4805_v6, %v4789_v26  ;;  %v4668_v26 = vld [vmem:[%s6836_s20] sm:$0xff]  }
 0x3dd   :  { %v1001_v7 = vpack.c.bf16 %v993_v60, %v993_v60 }
 0x3df   :  { %4470 = vmatmul.mubr.msk.bf16.vlgmr.msra.gmra.mrb[28].mxu0 %vm912_vm2, %v1001_v7  ;;  %v975_v48 = vpop.xlane.xlu0 %974 }
 0x3e0   :  { %4480 = vmatpush3.bf16.msra.mxu0 %v5547_v17  ;;  %4810 = vrcp.f32 %v975_v48  ;;  %v972_v8 = vpop.xlane.xlu1 %971  ;;  %4481 = vmatprep.mubr.msk.bf16.mxu0 %vm5174_vm0, %v6808_v37 }
 0x3e1   :  { %4812 = vrcp.f32 %v972_v8  ;;  %4491 = vmatprep.subr.bf16.mxu0 %v6808_v37 }
 0x3e2   :  { %v4807_v10 = vpop.eup %4806 }
 0x3e3   :  { %v4809_v11 = vpop.eup %4808  ;;  %v995_v12 = vmul.f32 %v4807_v10, %v4791_v33 }
 0x3e4   :  { %v994_v13 = vmul.f32 %v4809_v11, %v4793_v36 }
 0x3e5   :  { %v1003_v14 = vpack.c.bf16 %v995_v12, %v995_v12 }
 0x3e6   :  { %v1002_v15 = vpack.c.bf16 %v994_v13, %v994_v13 }
 0x3e7   :  { %4482 = vmatmul.mubr.msk.bf16.vlgmr.msra.gmra.mrb[32].mxu0 %vm912_vm2, %v1003_v14  ;;  %v981_v16 = vpop.xlane.xlu0 %980 }
 0x3e8   :  { %4492 = vmatpush3.bf16.msra.mxu0 %v5571_v55  ;;  %4814 = vrcp.f32 %v981_v16  ;;  %4476 = vmatmul.mubr.msk.bf16.vlgmr.msra.gmra.mrb[28].mxu1 %vm912_vm2, %v1002_v15  ;;  %v978_v17 = vpop.xlane.xlu1 %977 }
 0x3e9   :  { %4486 = vmatpush3.bf16.msra.mxu1 %v5550_v21  ;;  %4816 = vrcp.f32 %v978_v17  ;;  %4487 = vmatprep.mubr.msk.bf16.mxu1 %vm5174_vm0, %v6808_v37 }
 0x3ea   :  { %v4811_v18 = vpop.eup %4810  ;;  %4493 = vmatprep.mubr.msk.bf16.mxu0 %vm5174_vm0, %v6808_v37  ;;  %4497 = vmatprep.subr.bf16.mxu1 %v6808_v37 }
 0x3eb   :  { %v4813_v22 = vpop.eup %4812  ;;  %v997_v23 = vmul.f32 %v4811_v18, %v4795_v34  ;;  %4503 = vmatprep.subr.bf16.mxu0 %v6808_v37 }
 0x3ec   :  { %v996_v55 = vmul.f32 %v4813_v22, %v4797_v49 }
 0x3ed   :  { %v1005_v24 = vpack.c.bf16 %v997_v23, %v997_v23 }
 0x3ee   :  { %v1004_v25 = vpack.c.bf16 %v996_v55, %v996_v55  ;;  %v4676_v55 = vld [vmem:[%s6788_s9] ss:$16 sps:$4 sm:$0xff]  }
 0x3ef   :  { %4494 = vmatmul.mubr.msk.bf16.vlgmr.msra.gmra.mrb[36].mxu0 %vm912_vm2, %v1005_v24  ;;  %v984_v21 = vpop.xlane.xlu1 %983  ;;  %v4678_v24 = vld [vmem:[%s6788_s9 + $0x4] ss:$16 sps:$4 sm:$0xff]  }
 0x3f0   :  { %4488 = vmatmul.mubr.msk.bf16.vlgmr.msra.gmra.mrb[32].mxu1 %vm912_vm2, %v1004_v25  ;;  %4504 = vmatpush3.bf16.msra.mxu0 %v5568_v50  ;;  %4818 = vrcp.f32 %v984_v21  ;;  %v4669_v50 = vld [vmem:[%s6836_s20 + $0x8] sm:$0xff]  }
 0x3f1   :  { %4498 = vmatpush3.bf16.msra.mxu1 %v5577_v58  ;;  %4499 = vmatprep.mubr.msk.bf16.mxu1 %vm5174_vm0, %v6808_v37  ;;  %v4670_v58 = vld [vmem:[%s6836_s20 + $0x10] sm:$0xff]   ;;  %v4679_v25 = vld [vmem:[%s6788_s9 + $0x8] ss:$16 sps:$4 sm:$0xff]   ;;  %v4681_v21 = vld [vmem:[%s6788_s9 + $0xc] ss:$16 sps:$4 sm:$0xff]  }
 0x3f2   :  { %v4815_v27 = vpop.eup %4814  ;;  %4505 = vmatprep.mubr.msk.bf16.mxu0 %vm5174_vm0, %v6808_v37  ;;  %4509 = vmatprep.subr.bf16.mxu1 %v6808_v37 }
 0x3f3   :  { %v4817_v28 = vpop.eup %4816  ;;  %v999_v29 = vmul.f32 %v4815_v27, %v4799_v61  ;;  %4515 = vmatprep.subr.bf16.mxu0 %v4668_v26 }
 0x3f4   :  { %v998_v30 = vmul.f32 %v4817_v28, %v5642_v62 }
 0x3f5   :  { %v1007_v31 = vpack.c.bf16 %v999_v29, %v999_v29 }
 0x3f6   :  { %v1006_v32 = vpack.c.bf16 %v998_v30, %v998_v30 }
 0x3f7   :  { %4506 = vmatmul.mubr.msk.bf16.vlgmr.msra.gmra.mrb[40].mxu0 %vm912_vm2, %v1007_v31 }
 0x3f8   :  { %4500 = vmatmul.mubr.msk.bf16.vlgmr.msra.gmra.mrb[36].mxu1 %vm912_vm2, %v1006_v32  ;;  %4516 = vmatpush3.bf16.msra.mxu0 %v4668_v26  ;;  %v4082_v26 = vld [vmem:[%s6785_s6] ss:$0 sm:$0xff] }
 0x3f9   :  { %4510 = vmatpush3.bf16.msra.mxu1 %v5574_v57  ;;  %4511 = vmatprep.mubr.msk.bf16.mxu1 %vm5174_vm0, %v6808_v37  ;;  %v4672_v57 = vld [vmem:[%s6836_s20 + $0x20] sm:$0xff]  }
 0x3fa   :  { %v4819_v9 = vpop.eup %4818  ;;  %4517 = vmatprep.subr.bf16.mxu0 %v4669_v50  ;;  %1887 = vmatprep.subr.bf16.mxu1 %v4678_v24  ;;  %v4922_v32 = vld [vmem:[%s6834_s26] sm:$0xff]  ;;  %v4705_v24 = vld [vmem:[%s6788_s9 + $0x8c] ss:$16 sps:$4 sm:$0xff]  }
 0x3fb   :  { %v1000_v33 = vmul.f32 %v4819_v9, %v5647_v2  ;;  %v4923_v9 = vld [vmem:[%s6834_s26 + $0x8] sm:$0xff] }
 0x3fc   :  { %4518 = vmatpush3.bf16.msra.mxu0 %v4669_v50 }
 0x3fd   :  { %v1008_v36 = vpack.c.bf16 %v1000_v33, %v1000_v33  ;;  %4519 = vmatprep.subr.bf16.mxu0 %v4670_v58 }
 0x400   :  { %4512 = vmatmul.mubr.msk.bf16.vlgmr.msra.gmra.mrb[40].mxu1 %vm912_vm2, %v1008_v36  ;;  %4520 = vmatpush3.bf16.msra.mxu0 %v4670_v58 }
 0x401   :  { %4521 = vmatprep.subr.bf16.mxu0 %v4671_v20  ;;  %1919 = vmatprep.mubr.bf16.mxu1 %v5172_v0 }
 0x402   :  { %1888 = vmatpush1.bf16.msra.mxu1 %v4676_v55  ;;  %v4702_v55 = vld [vmem:[%s6788_s9 + $0x84] ss:$16 sps:$4 sm:$0xff]  }
 0x404   :  { %4522 = vmatpush3.bf16.msra.mxu0 %v4671_v20 }
 0x405   :  { %4523 = vmatprep.subr.bf16.mxu0 %v4672_v57 }
 0x408   :  { %4524 = vmatpush3.bf16.msra.mxu0 %v4672_v57 }
 0x409   :  { %4525 = vmatprep.subr.bf16.mxu0 %v4673_v19 }
 0x40c   :  { %4526 = vmatpush3.bf16.msra.mxu0 %v4673_v19 }
 0x40d   :  { %4527 = vmatprep.subr.bf16.mxu0 %v4674_v41 }
 0x410   :  { %4528 = vmatpush3.bf16.msra.mxu0 %v4674_v41  ;;  %v4924_v41 = vld [vmem:[%s6834_s26 + $0x10] sm:$0xff] }
 0x411   :  { %4529 = vmatprep.subr.bf16.mxu0 %v4675_v44 }
 0x414   :  { %4530 = vmatpush3.bf16.msra.mxu0 %v4675_v44 }
 0x415   :  { %1960 = vmatprep.subr.bf16.mxu0 %v4681_v21  ;;  %v4703_v21 = vld [vmem:[%s6788_s9 + $0x88] ss:$16 sps:$4 sm:$0xff]  }
 0x4b2   :  { %v1058_v45 = vpop.f32.mrb[28].mxu0 }
 0x4b3   :  { %v4471_v46 = vpop.f32.mrb[29].mxu0 }
 0x4b4   :  { %v1061_v47 = vpop.f32.mrb[30].mxu0 }
 0x4b5   :  { %v4472_v35 = vpop.f32.mrb[31].mxu0 }
 0x4ba   :  { %v1150_v34 = vpop.f32.mrb[32].mxu0 }
 0x4bb   :  { %v1104_v49 = vpop.f32.mrb[28].mxu1  ;;  %v4483_v51 = vpop.f32.mrb[33].mxu0 }
 0x4bc   :  { %v1386_v53 = vpack.c.bf16 %v1104_v49, %v1058_v45  ;;  %v4477_v54 = vpop.f32.mrb[29].mxu1  ;;  %v1153_v56 = vpop.f32.mrb[34].mxu0  ;;  %v4925_v45 = vld [vmem:[%s6834_s26 + $0x18] sm:$0xff] }
 0x4bd   :  { %v1107_v59 = vpop.f32.mrb[30].mxu1  ;;  %v4484_v61 = vpop.f32.mrb[35].mxu0  ;;  %v4926_v56 = vld [vmem:[%s6834_s26 + $0x20] sm:$0xff] }
 0x4be   :  { %v4478_v62 = vpop.f32.mrb[31].mxu1  ;;  %4531 = vmatprep.mubr.bf16.mxu0 %v1386_v53 }
 0x4bf   :  { %v4927_v62 = vld [vmem:[%s6834_s26 + $0x28] sm:$0xff] }
 0x4c2   :  { %v1242_v63 = vpop.f32.mrb[36].mxu0 }
 0x4c3   :  { %v1196_v1 = vpop.f32.mrb[32].mxu1  ;;  %v4495_v2 = vpop.f32.mrb[37].mxu0 }
 0x4c4   :  { %v1387_v3 = vpack.c.bf16 %v1196_v1, %v1150_v34  ;;  %v4489_v4 = vpop.f32.mrb[33].mxu1  ;;  %v1245_v5 = vpop.f32.mrb[38].mxu0  ;;  %v4684_v1 = vld [vmem:[%s6788_s9 + $0x24] ss:$16 sps:$4 sm:$0xff]   ;;  %v4687_v2 = vld [vmem:[%s6788_s9 + $0x2c] ss:$16 sps:$4 sm:$0xff]  }
 0x4c5   :  { %v1199_v42 = vpop.f32.mrb[34].mxu1  ;;  %v4496_v6 = vpop.f32.mrb[39].mxu0  ;;  %v4685_v4 = vld [vmem:[%s6788_s9 + $0x28] ss:$16 sps:$4 sm:$0xff]   ;;  %1889 = vmatprep.subr.bf16.mxu1 %v4684_v1 }
 0x4c6   :  { %v4490_v60 = vpop.f32.mrb[35].mxu1  ;;  %4532 = vmatmul.mubr.bf16.vlgmr.msra.gmra.mrb[44].mxu0 %v1387_v3  ;;  %v4682_v3 = vld [vmem:[%s6788_s9 + $0x20] ss:$16 sps:$4 sm:$0xff]  }
 0x4c7   :  { %1961 = vmatpush1.bf16.msra.mxu0 %v4679_v25  ;;  %1890 = vmatpush1.bf16.msra.mxu1 %v4682_v3  ;;  %v4700_v25 = vld [vmem:[%s6788_s9 + $0x80] ss:$16 sps:$4 sm:$0xff]  }
 0x4c8   :  { %1962 = vmatprep.subr.bf16.mxu0 %v4687_v2 }
 0x4ca   :  { %v1334_v7 = vpop.f32.mrb[40].mxu0 }
 0x4cb   :  { %v1288_v48 = vpop.f32.mrb[36].mxu1  ;;  %v4507_v8 = vpop.f32.mrb[41].mxu0  ;;  %1963 = vmatpush1.bf16.msra.mxu0 %v4685_v4 }
 0x4cc   :  { %v1388_v10 = vpack.c.bf16 %v1288_v48, %v1242_v63  ;;  %v4501_v11 = vpop.f32.mrb[37].mxu1  ;;  %v1337_v12 = vpop.f32.mrb[42].mxu0  ;;  %v4693_v48 = vld [vmem:[%s6788_s9 + $0x4c] ss:$16 sps:$4 sm:$0xff]   ;;  %v4688_v8 = vld [vmem:[%s6788_s9 + $0x40] ss:$16 sps:$4 sm:$0xff]  }
 0x4cd   :  { %v1291_v13 = vpop.f32.mrb[38].mxu1  ;;  %v4508_v14 = vpop.f32.mrb[43].mxu0  ;;  %v4928_v11 = vld [vmem:[%s6834_s26 + $0x30] sm:$0xff]  ;;  %1964 = vmatprep.subr.bf16.mxu0 %v4693_v48 }
 0x4ce   :  { %v4502_v15 = vpop.f32.mrb[39].mxu1  ;;  %4535 = vmatprep.mubr.bf16.mxu0 %v1388_v10  ;;  %v4691_v10 = vld [vmem:[%s6788_s9 + $0x48] ss:$16 sps:$4 sm:$0xff]  }
 0x4cf   :  { %v4929_v13 = vld [vmem:[%s6834_s26 + $0x38] sm:$0xff]  ;;  %1965 = vmatpush1.bf16.msra.mxu0 %v4691_v10  ;;  %v4696_v15 = vld [vmem:[%s6788_s9 + $0x64] ss:$16 sps:$4 sm:$0xff]  }
 0x4d3   :  { %v1380_v16 = vpop.f32.mrb[40].mxu1 }
 0x4d4   :  { %v1389_v17 = vpack.c.bf16 %v1380_v16, %v1334_v7  ;;  %v4513_v18 = vpop.f32.mrb[41].mxu1  ;;  %v4690_v7 = vld [vmem:[%s6788_s9 + $0x44] ss:$16 sps:$4 sm:$0xff]   ;;  %v4699_v16 = vld [vmem:[%s6788_s9 + $0x6c] ss:$16 sps:$4 sm:$0xff]  }
 0x4d5   :  { %v1383_v22 = vpop.f32.mrb[42].mxu1  ;;  %1891 = vmatprep.subr.bf16.mxu1 %v4690_v7  ;;  %v4697_v18 = vld [vmem:[%s6788_s9 + $0x68] ss:$16 sps:$4 sm:$0xff]   ;;  %1966 = vmatprep.subr.bf16.mxu0 %v4699_v16 }
 0x4d6   :  { %v4514_v23 = vpop.f32.mrb[43].mxu1  ;;  %4536 = vmatmul.mubr.bf16.gmra.mrb[48].mxu0 %v1389_v17  ;;  %1892 = vmatpush1.bf16.msra.mxu1 %v4688_v8  ;;  %v4694_v17 = vld [vmem:[%s6788_s9 + $0x60] ss:$16 sps:$4 sm:$0xff]  }
 0x4d7   :  { %1992 = vmatprep.mubr.bf16.mxu0 %v5172_v0  ;;  %1893 = vmatprep.subr.bf16.mxu1 %v4696_v15 }
 0x4d8   :  { %1967 = vmatpush1.bf16.msra.mxu0 %v4697_v18 }
 0x4d9   :  { %1968 = vmatprep.subr.bf16.mxu0 %v4705_v24 }
 0x4da   :  { %1894 = vmatpush1.bf16.msra.mxu1 %v4694_v17 }
 0x4db   :  { %1895 = vmatprep.subr.bf16.mxu1 %v4702_v55 }
 0x4dc   :  { %1969 = vmatpush1.bf16.msra.mxu0 %v4703_v21 }
 0x4de   :  { %1896 = vmatpush1.bf16.msra.mxu1 %v4700_v25 }
 0x599   :  { %v4533_v27 = vpop.f32.mrb[44].mxu0 }
 0x59a   :  { %v1495_v28 = vpop.f32.mrb[45].mxu0  ;;  %v1504_v36 = vadd.f32 %v4533_v27, %v4082_v26  ;;  %v4711_v27 = vld [vmem:[%s6788_s9 + $0xac] ss:$16 sps:$4 sm:$0xff]  }
 0x59b   :  { %v1496_v29 = vadd.f32 %v4082_v26, %v1495_v28  ;;  %v4534_v30 = vpop.f32.mrb[46].mxu0  ;;  %v4706_v28 = vld [vmem:[%s6788_s9 + $0xa0] ss:$16 sps:$4 sm:$0xff]   ;;  %1970 = vmatprep.subr.bf16.mxu0 %v4711_v27 }
 0x59c   :  { %v1498_v31 = vpop.f32.mrb[47].mxu0  ;;  %v1507_v57 = vadd.f32 %v4534_v30, %v4082_v26  ;;  %v5743_v44 = vadd.f32 %v4924_v41, %v1504_v36  ;;  %v4714_v30 = vld [vmem:[%s6788_s9 + $0xc4] ss:$16 sps:$4 sm:$0xff]   ;;  %v4723_v36 = vld [vmem:[%s6788_s9 + $0xec] ss:$16 sps:$4 sm:$0xff]  }
 0x59d   :  { %v5727_v50 = vadd.f32 %v4922_v32, %v1496_v29  ;;  %v1499_v58 = vadd.f32 %v4082_v26, %v1498_v31  ;;  %v4709_v29 = vld [vmem:[%s6788_s9 + $0xa8] ss:$16 sps:$4 sm:$0xff]   ;;  %v4717_v31 = vld [vmem:[%s6788_s9 + $0xcc] ss:$16 sps:$4 sm:$0xff]   ;;  %v4712_v32 = vld [vmem:[%s6788_s9 + $0xc0] ss:$16 sps:$4 sm:$0xff]  }
 0x59e   :  { %v5748_v46 = vadd.f32 %v4925_v45, %v1507_v57  ;;  %v1563_v35 = vmul.f32 %v5743_v44, %v5743_v44  ;;  %1971 = vmatpush1.bf16.msra.mxu0 %v4709_v29  ;;  %v4721_v57 = vld [vmem:[%s6788_s9 + $0xe8] ss:$16 sps:$4 sm:$0xff]  }
 0x59f   :  { %v5732_v33 = vadd.f32 %v4923_v9, %v1499_v58  ;;  %1536 = vadd.xlane.f32.xlu0 %v5727_v50  ;;  %v1561_v20 = vmul.f32 %v5727_v50, %v5727_v50  ;;  %v4715_v58 = vld [vmem:[%s6788_s9 + $0xc8] ss:$16 sps:$4 sm:$0xff]   ;;  %1972 = vmatprep.subr.bf16.mxu0 %v4717_v31  ;;  %v4720_v9 = vld [vmem:[%s6788_s9 + $0xe4] ss:$16 sps:$4 sm:$0xff]  }
 0x5a0   :  { %v1564_v53 = vmul.f32 %v5748_v46, %v5748_v46 }
 0x5a1   :  { %1538 = vadd.xlane.f32.xlu1 %v5732_v33  ;;  %v1562_v19 = vmul.f32 %v5732_v33, %v5732_v33 }
 0x5a2   :  { %1973 = vmatpush1.bf16.msra.mxu0 %v4715_v58 }
 0x5a3   :  { %1569 = vadd.xlane.f32.xlu0 %v1561_v20  ;;  %v4718_v20 = vld [vmem:[%s6788_s9 + $0xe0] ss:$16 sps:$4 sm:$0xff]   ;;  %1974 = vmatprep.subr.bf16.mxu0 %v4723_v36 }
 0x5a5   :  { %1571 = vadd.xlane.f32.xlu1 %v1562_v19 }
 0x5a6   :  { %1975 = vmatpush1.bf16.msra.mxu0 %v4721_v57 }
 0x5a7   :  { %1540 = vadd.xlane.f32.xlu0 %v5743_v44 }
 0x5a9   :  { %1542 = vadd.xlane.f32.xlu1 %v5748_v46  ;;  %v4537_v47 = vpop.f32.mrb[48].mxu0 }
 0x5aa   :  { %v1511_v34 = vpop.f32.mrb[49].mxu0  ;;  %v1520_v5 = vadd.f32 %v4537_v47, %v4082_v26 }
 0x5ab   :  { %v1512_v49 = vadd.f32 %v4082_v26, %v1511_v34  ;;  %1573 = vadd.xlane.f32.xlu0 %v1563_v35  ;;  %v4538_v51 = vpop.f32.mrb[50].mxu0 }
 0x5ac   :  { %v1514_v54 = vpop.f32.mrb[51].mxu0  ;;  %v1523_v6 = vadd.f32 %v4538_v51, %v4082_v26  ;;  %v5799_v12 = vadd.f32 %v4928_v11, %v1520_v5 }
 0x5ad   :  { %v5759_v59 = vadd.f32 %v4926_v56, %v1512_v49  ;;  %v1515_v61 = vadd.f32 %v4082_v26, %v1514_v54  ;;  %1575 = vadd.xlane.f32.xlu1 %v1564_v53  ;;  %v4708_v26 = vld [vmem:[%s6788_s9 + $0xa4] ss:$16 sps:$4 sm:$0xff]  }
 0x5ae   :  { %v5804_v14 = vadd.f32 %v4929_v13, %v1523_v6  ;;  %v1567_v22 = vmul.f32 %v5799_v12, %v5799_v12  ;;  %1897 = vmatprep.subr.bf16.mxu1 %v4708_v26  ;;  %v5879_v26 = vld [vmem:[#allocation4] ss:$0 sm:$0xff] }
 0x5af   :  { %v5764_v63 = vadd.f32 %v4927_v62, %v1515_v61  ;;  %1544 = vadd.xlane.f32.xlu0 %v5759_v59  ;;  %v1565_v42 = vmul.f32 %v5759_v59, %v5759_v59  ;;  %1898 = vmatpush1.bf16.msra.mxu1 %v4706_v28 }
 0x5b0   :  { %v1568_v23 = vmul.f32 %v5804_v14, %v5804_v14  ;;  %1899 = vmatprep.subr.bf16.mxu1 %v4714_v30 }
 0x5b1   :  { %1546 = vadd.xlane.f32.xlu1 %v5764_v63  ;;  %v1566_v60 = vmul.f32 %v5764_v63, %v5764_v63 }
 0x5b3   :  { %1577 = vadd.xlane.f32.xlu0 %v1565_v42  ;;  %1900 = vmatpush1.bf16.msra.mxu1 %v4712_v32 }
 0x5b4   :  { %1901 = vmatprep.subr.bf16.mxu1 %v4720_v9 }
 0x5b5   :  { %1579 = vadd.xlane.f32.xlu1 %v1566_v60 }
 0x5b7   :  { %1548 = vadd.xlane.f32.xlu0 %v5799_v12  ;;  %1902 = vmatpush1.bf16.msra.mxu1 %v4718_v20 }
 0x5b9   :  { %1550 = vadd.xlane.f32.xlu1 %v5804_v14 }
 0x5bb   :  { %1581 = vadd.xlane.f32.xlu0 %v1567_v22 }
 0x5bd   :  { %1583 = vadd.xlane.f32.xlu1 %v1568_v23 }
 0x62c   :  { %v1537_v19 = vpop.xlane.xlu0 %1536 }
 0x62d   :  { %v1553_v41 = vmul.f32 0.0078125, %v1537_v19 }
 0x62e   :  { %v1539_v45 = vpop.xlane.xlu1 %1538 }
 0x62f   :  { %v1554_v47 = vmul.f32 0.0078125, %v1539_v45  ;;  %v1593_v34 = vmul.f32 %v1553_v41, %v1553_v41  ;;  %v1609_v22 = vsub.f32 %v5727_v50, %v1553_v41  ;;  %v5885_v41 = vld [vmem:[#allocation6] ss:$0 sm:$0xff] }
 0x630   :  { %v1570_v35 = vpop.xlane.xlu0 %1569 }
 0x631   :  { %v1585_v49 = vmul.f32 0.0078125, %v1570_v35  ;;  %v1594_v53 = vmul.f32 %v1554_v47, %v1554_v47  ;;  %v1610_v27 = vsub.f32 %v5732_v33, %v1554_v47 }
 0x632   :  { %v1572_v51 = vpop.xlane.xlu1 %1571 }
 0x633   :  { %v1601_v54 = vsub.f32 %v1585_v49, %v1593_v34  ;;  %v1586_v56 = vmul.f32 0.0078125, %v1572_v51 }
 0x634   :  { %v1541_v61 = vpop.xlane.xlu0 %1540 }
 0x635   :  { %v1617_v62 = vadd.f32 1e-05, %v1601_v54  ;;  %v1602_v1 = vsub.f32 %v1586_v56, %v1594_v53  ;;  %v1555_v2 = vmul.f32 0.0078125, %v1541_v61 }
 0x636   :  { %v1543_v3 = vpop.xlane.xlu1 %1542 }
 0x637   :  { %4820 = vrsqrt.f32 %v1617_v62  ;;  %v1618_v4 = vadd.f32 1e-05, %v1602_v1  ;;  %v1556_v5 = vmul.f32 0.0078125, %v1543_v3  ;;  %v1595_v6 = vmul.f32 %v1555_v2, %v1555_v2 }
 0x638   :  { %v1574_v42 = vpop.xlane.xlu0 %1573  ;;  %v1611_v35 = vsub.f32 %v5743_v44, %v1555_v2 }
 0x639   :  { %4822 = vrsqrt.f32 %v1618_v4  ;;  %v1587_v60 = vmul.f32 0.0078125, %v1574_v42  ;;  %v1596_v48 = vmul.f32 %v1556_v5, %v1556_v5  ;;  %v1612_v62 = vsub.f32 %v5748_v46, %v1556_v5 }
 0x63a   :  { %v1576_v7 = vpop.xlane.xlu1 %1575 }
 0x63b   :  { %v1603_v8 = vsub.f32 %v1587_v60, %v1595_v6  ;;  %v1588_v10 = vmul.f32 0.0078125, %v1576_v7 }
 0x63c   :  { %v1545_v11 = vpop.xlane.xlu0 %1544 }
 0x63d   :  { %v1619_v13 = vadd.f32 1e-05, %v1603_v8  ;;  %v1604_v15 = vsub.f32 %v1588_v10, %v1596_v48  ;;  %v5872_v16 = vmul.f32 0.0078125, %v1545_v11 }
 0x63e   :  { %v1547_v17 = vpop.xlane.xlu1 %1546 }
 0x63f   :  { %4824 = vrsqrt.f32 %v1619_v13  ;;  %v1620_v18 = vadd.f32 1e-05, %v1604_v15  ;;  %v5875_v23 = vmul.f32 0.0078125, %v1547_v17  ;;  %v1597_v25 = vmul.f32 %v5872_v16, %v5872_v16 }
 0x640   :  { %v1578_v55 = vpop.xlane.xlu0 %1577  ;;  %v1613_v10 = vsub.f32 %v5759_v59, %v5872_v16 }
 0x641   :  { %v4821_v24 = vpop.eup %4820  ;;  %4826 = vrsqrt.f32 %v1620_v18  ;;  %v1589_v21 = vmul.f32 0.0078125, %v1578_v55  ;;  %v1598_v31 = vmul.f32 %v5875_v23, %v5875_v23  ;;  %v1614_v17 = vsub.f32 %v5764_v63, %v5875_v23 }
 0x642   :  { %v1580_v28 = vpop.xlane.xlu1 %1579  ;;  %v1633_v29 = vmul.f32 %v4821_v24, %v1609_v22 }
 0x643   :  { %v4823_v30 = vpop.eup %4822  ;;  %v1605_v50 = vsub.f32 %v1589_v21, %v1597_v25  ;;  %v1590_v32 = vmul.f32 0.0078125, %v1580_v28 }
 0x644   :  { %v1549_v58 = vpop.xlane.xlu0 %1548  ;;  %v1634_v9 = vmul.f32 %v4823_v30, %v1610_v27  ;;  %v1647_v36 = vmul.f32 %v5879_v26, %v1633_v29 }
 0x645   :  { %v1621_v20 = vadd.f32 1e-05, %v1605_v50  ;;  %v1606_v57 = vsub.f32 %v1590_v32, %v1598_v31  ;;  %v1559_v19 = vmul.f32 0.0078125, %v1549_v58 }
 0x646   :  { %v1551_v45 = vpop.xlane.xlu1 %1550  ;;  %v1648_v33 = vmul.f32 %v5879_v26, %v1634_v9  ;;  %v5890_v51 = vadd.f32 %v5885_v41, %v1647_v36  ;;  %v4724_v9 = vld [vmem:[%s6790_s11 + $0x40] sm:$0xff]  }
 0x647   :  { %4828 = vrsqrt.f32 %v1621_v20  ;;  %v1622_v47 = vadd.f32 1e-05, %v1606_v57  ;;  %v1560_v34 = vmul.f32 0.0078125, %v1551_v45  ;;  %v1599_v56 = vmul.f32 %v1559_v19, %v1559_v19  ;;  %4259 = vmatprep.subr.bf16.mxu1 %v4724_v9  ;;  %v4727_v36 = vld [vmem:[%s6790_s11 + $0x80] sm:$0xff]   ;;  %v4728_v20 = vld [vmem:[%s6790_s11 + $0x48] sm:$0xff]   ;;  %v4732_v45 = vld [vmem:[%s6790_s11 + $0x50] sm:$0xff]  }
 0x648   :  { %v1582_v49 = vpop.xlane.xlu0 %1581  ;;  %6837 = vst [vmem:[#allocation24_spill] sm:$0xff] %v5890_v51  ;;  %v5893_v53 = vadd.f32 %v5885_v41, %v1648_v33  ;;  %v1615_v25 = vsub.f32 %v5799_v12, %v1559_v19  ;;  %v4729_v57 = vld [vmem:[%s6790_s11 + $0xc8] sm:$0xff]   ;;  %v4733_v33 = vld [vmem:[%s6790_s11 + $0xd0] sm:$0xff]  }
 0x649   :  { %v4825_v54 = vpop.eup %4824  ;;  %4830 = vrsqrt.f32 %v1622_v47  ;;  %v1591_v61 = vmul.f32 0.0078125, %v1582_v49  ;;  %v1600_v2 = vmul.f32 %v1560_v34, %v1560_v34  ;;  %v1616_v27 = vsub.f32 %v5804_v14, %v1560_v34  ;;  %v4730_v19 = vld [vmem:[%s6790_s11 + $0x8] sm:$0xff]   ;;  %v4734_v47 = vld [vmem:[%s6790_s11 + $0x10] sm:$0xff]   ;;  %v4736_v34 = vld [vmem:[%s6790_s11 + $0x58] sm:$0xff]  }
 0x64a   :  { %6838 = vst [vmem:[#allocation25_spill] sm:$0xff] %v5893_v53  ;;  %v1584_v1 = vpop.xlane.xlu1 %1583  ;;  %v1669_v3 = vpack.c.bf16 %v5893_v53, %v5890_v51  ;;  %v1635_v4 = vmul.f32 %v4825_v54, %v1611_v35  ;;  %v4735_v35 = vld [vmem:[%s6790_s11 + $0x90] sm:$0xff]   ;;  %v4737_v49 = vld [vmem:[%s6790_s11 + $0xd8] sm:$0xff]  }
 0x64b   :  { %v4827_v44 = vpop.eup %4826  ;;  %v1607_v42 = vsub.f32 %v1591_v61, %v1599_v56  ;;  %v1592_v6 = vmul.f32 0.0078125, %v1584_v1  ;;  %v4738_v54 = vld [vmem:[%s6790_s11 + $0x18] sm:$0xff]   ;;  %v4740_v61 = vld [vmem:[%s6790_s11 + $0x60] sm:$0xff]  }
 0x64c   :  { %1920 = vmatmul.mubr.bf16.vlgmr.msra.gmra.mrb[44].mxu1 %v1669_v3  ;;  %1993 = vmatmul.mubr.bf16.vlgmr.msra.gmra.mrb[52].mxu0 %v1669_v3  ;;  %v1636_v60 = vmul.f32 %v4827_v44, %v1612_v62  ;;  %v1649_v7 = vmul.f32 %v5879_v26, %v1635_v4  ;;  %v4739_v56 = vld [vmem:[%s6790_s11 + $0x98] sm:$0xff]   ;;  %v4741_v62 = vld [vmem:[%s6790_s11 + $0xe0] sm:$0xff]   ;;  %v4744_v4 = vld [vmem:[%s6790_s11 + $0x68] sm:$0xff]  }
 0x64d   :  { %v1623_v48 = vadd.f32 1e-05, %v1607_v42  ;;  %v1608_v8 = vsub.f32 %v1592_v6, %v1600_v2  ;;  %1929 = vmatprep.mubr.bf16.mxu1 %v5172_v0  ;;  %2002 = vmatprep.mubr.bf16.mxu0 %v5172_v0  ;;  %v4742_v1 = vld [vmem:[%s6790_s11 + $0x20] sm:$0xff]   ;;  %v4745_v44 = vld [vmem:[%s6790_s11 + $0xe8] sm:$0xff]   ;;  %v4748_v6 = vld [vmem:[%s6790_s11 + $0x70] sm:$0xff]  }
 0x64e   :  { %v1650_v46 = vmul.f32 %v5879_v26, %v1636_v60  ;;  %v5905_v11 = vadd.f32 %v5885_v41, %v1649_v7  ;;  %v4743_v3 = vld [vmem:[%s6790_s11 + $0xa0] sm:$0xff]   ;;  %v4746_v2 = vld [vmem:[%s6790_s11 + $0x28] sm:$0xff]   ;;  %v4749_v60 = vld [vmem:[%s6790_s11 + $0xf0] sm:$0xff]  }
 0x64f   :  { %4832 = vrsqrt.f32 %v1623_v48  ;;  %v1624_v5 = vadd.f32 1e-05, %v1608_v8  ;;  %v4747_v42 = vld [vmem:[%s6790_s11 + $0xa8] sm:$0xff]   ;;  %v4750_v7 = vld [vmem:[%s6790_s11 + $0x30] sm:$0xff]   ;;  %v4752_v8 = vld [vmem:[%s6790_s11 + $0x78] sm:$0xff]  }
 0x650   :  { %6839 = vst [vmem:[#allocation26_spill] sm:$0xff] %v5905_v11  ;;  %v5908_v13 = vadd.f32 %v5885_v41, %v1650_v46  ;;  %v4751_v48 = vld [vmem:[%s6790_s11 + $0xb0] sm:$0xff]   ;;  %v4753_v46 = vld [vmem:[%s6790_s11 + $0xf8] sm:$0xff]  }
 0x651   :  { %v4829_v15 = vpop.eup %4828  ;;  %4834 = vrsqrt.f32 %v1624_v5  ;;  %v4754_v5 = vld [vmem:[%s6790_s11 + $0x38] sm:$0xff]  }
 0x652   :  { %6840 = vst [vmem:[#allocation27_spill] sm:$0xff] %v5908_v13  ;;  %v1670_v18 = vpack.c.bf16 %v5908_v13, %v5905_v11  ;;  %v1637_v22 = vmul.f32 %v4829_v15, %v1613_v10  ;;  %v4755_v10 = vld [vmem:[%s6790_s11 + $0xb8] sm:$0xff]   ;;  %v1705_v15 = vld [vmem:[#allocation7] sm:$0xf] }
 0x653   :  { %v4831_v55 = vpop.eup %4830 }
 0x654   :  { %1930 = vmatmul.mubr.bf16.gmra.mrb[48].mxu1 %v1670_v18  ;;  %2003 = vmatmul.mubr.bf16.gmra.mrb[56].mxu0 %v1670_v18  ;;  %v1638_v24 = vmul.f32 %v4831_v55, %v1614_v17  ;;  %v1651_v59 = vmul.f32 %v5879_v26, %v1637_v22  ;;  %v1721_v17 = vsub.s32 3, %v5514_v39  ;;  %v6040_v18 = vrot.slane %v1705_v15, %v249_v43 }
 0x655   :  { %1939 = vmatprep.mubr.bf16.mxu1 %v5172_v0  ;;  %2012 = vmatprep.mubr.bf16.mxu0 %v5172_v0  ;;  %v6044_v22 = vrot.slane %v1705_v15, %v257_v52  ;;  %v6048_v55 = vrot.slane %v1705_v15, %v253_v40 }
 0x656   :  { %v1652_v16 = vmul.f32 %v5879_v26, %v1638_v24  ;;  %v5920_v63 = vadd.f32 %v5885_v41, %v1651_v59  ;;  %v6050_v24 = vrot.slane %v1705_v15, %v1721_v17 }
 0x658   :  { %6841 = vst [vmem:[#allocation28_spill] sm:$0xff] %v5920_v63  ;;  %v5923_v23 = vadd.f32 %v5885_v41, %v1652_v16 }
 0x659   :  { %v4833_v21 = vpop.eup %4832 }
 0x65a   :  { %6842 = vst [vmem:[#allocation29_spill] sm:$0xff] %v5923_v23  ;;  %v1671_v28 = vpack.c.bf16 %v5923_v23, %v5920_v63  ;;  %v1639_v29 = vmul.f32 %v4833_v21, %v1615_v25 }
 0x65b   :  { %v4835_v30 = vpop.eup %4834 }
 0x65c   :  { %1940 = vmatmul.mubr.bf16.gmra.mrb[52].mxu1 %v1671_v28  ;;  %2013 = vmatmul.mubr.bf16.gmra.mrb[60].mxu0 %v1671_v28  ;;  %v1640_v31 = vmul.f32 %v4835_v30, %v1616_v27  ;;  %v1653_v50 = vmul.f32 %v5879_v26, %v1639_v29 }
 0x65d   :  { %1949 = vmatprep.mubr.bf16.mxu1 %v5172_v0  ;;  %2022 = vmatprep.mubr.bf16.mxu0 %v5172_v0  ;;  %v4725_v0 = vld [vmem:[%s6790_s11 + $0xc0] sm:$0xff]  }
 0x65e   :  { %v1654_v12 = vmul.f32 %v5879_v26, %v1640_v31  ;;  %v5933_v32 = vadd.f32 %v5885_v41, %v1653_v50  ;;  %4299 = vmatprep.subr.bf16.mxu0 %v4725_v0  ;;  %v4726_v26 = vld [vmem:[%s6790_s11] sm:$0xff]  }
 0x65f   :  { %4260 = vmatpush3.bf16.msra.mxu1 %v4726_v26  ;;  %4300 = vmatpush3.bf16.msra.mxu0 %v4727_v36 }
 0x660   :  { %6843 = vst [vmem:[#allocation30_spill] sm:$0xff] %v5933_v32  ;;  %v5936_v14 = vadd.f32 %v5885_v41, %v1654_v12  ;;  %v4731_v41 = vld [vmem:[%s6790_s11 + $0x88] sm:$0xff]   ;;  %4261 = vmatprep.subr.bf16.mxu1 %v4728_v20  ;;  %4301 = vmatprep.subr.bf16.mxu0 %v4729_v57 }
 0x662   :  { %6844 = vst [vmem:[#allocation31_spill] sm:$0xff] %v5936_v14  ;;  %v1672_v58 = vpack.c.bf16 %v5936_v14, %v5933_v32 }
 0x663   :  { %4262 = vmatpush3.bf16.msra.mxu1 %v4730_v19  ;;  %4302 = vmatpush3.bf16.msra.mxu0 %v4731_v41 }
 0x664   :  { %1950 = vmatmul.mubr.bf16.gmra.mrb[56].mxu1 %v1672_v58  ;;  %2023 = vmatmul.mubr.bf16.gmra.mrb[64].mxu0 %v1672_v58 }
 0x665   :  { %4263 = vmatprep.subr.bf16.mxu1 %v4732_v45  ;;  %4303 = vmatprep.subr.bf16.mxu0 %v4733_v33 }
 0x667   :  { %4264 = vmatpush3.bf16.msra.mxu1 %v4734_v47  ;;  %4304 = vmatpush3.bf16.msra.mxu0 %v4735_v35 }
 0x668   :  { %4265 = vmatprep.subr.bf16.mxu1 %v4736_v34  ;;  %4305 = vmatprep.subr.bf16.mxu0 %v4737_v49 }
 0x66b   :  { %4266 = vmatpush3.bf16.msra.mxu1 %v4738_v54  ;;  %4306 = vmatpush3.bf16.msra.mxu0 %v4739_v56 }
 0x66c   :  { %4267 = vmatprep.subr.bf16.mxu1 %v4740_v61  ;;  %4307 = vmatprep.subr.bf16.mxu0 %v4741_v62 }
 0x66f   :  { %4268 = vmatpush3.bf16.msra.mxu1 %v4742_v1  ;;  %4308 = vmatpush3.bf16.msra.mxu0 %v4743_v3 }
 0x670   :  { %4269 = vmatprep.subr.bf16.mxu1 %v4744_v4  ;;  %4309 = vmatprep.subr.bf16.mxu0 %v4745_v44 }
 0x673   :  { %4270 = vmatpush3.bf16.msra.mxu1 %v4746_v2  ;;  %4310 = vmatpush3.bf16.msra.mxu0 %v4747_v42 }
 0x674   :  { %4271 = vmatprep.subr.bf16.mxu1 %v4748_v6  ;;  %4311 = vmatprep.subr.bf16.mxu0 %v4749_v60 }
 0x677   :  { %4272 = vmatpush3.bf16.msra.mxu1 %v4750_v7  ;;  %4312 = vmatpush3.bf16.msra.mxu0 %v4751_v48 }
 0x678   :  { %4273 = vmatprep.subr.bf16.mxu1 %v4752_v8  ;;  %4313 = vmatprep.subr.bf16.mxu0 %v4753_v46 }
 0x67b   :  { %4274 = vmatpush3.bf16.msra.mxu1 %v4754_v5  ;;  %4314 = vmatpush3.bf16.msra.mxu0 %v4755_v10 }
 0x67c   :  { %4539 = vmatprep.subr.mxu1 %v6808_v37 }
 0x71f   :  { %v1921_v59 = vpop.f32.mrb[44].mxu1  ;;  %v1994_v16 = vpop.f32.mrb[52].mxu0 }
 0x720   :  { %v1922_v25 = vadd.f32 %v1921_v59, %v6040_v18  ;;  %v1995_v21 = vadd.f32 %v1994_v16, %v6044_v22  ;;  %v1923_v27 = vpop.f32.mrb[45].mxu1  ;;  %v1996_v28 = vpop.f32.mrb[53].mxu0 }
 0x721   :  { %v6055_v43 = vadd.f32 %v1923_v27, %v6048_v55  ;;  %v6058_v52 = vadd.f32 %v1996_v28, %v6050_v24  ;;  %v1925_v29 = vpop.f32.mrb[46].mxu1  ;;  %v1998_v39 = vpop.f32.mrb[54].mxu0 }
 0x722   :  { %v2065_v40 = vmul.f32 0.044715, %v1922_v25  ;;  %v2067_v30 = vmul.f32 0.044715, %v1995_v21  ;;  %v1926_v50 = vadd.f32 %v1925_v29, %v6040_v18  ;;  %v1999_v12 = vadd.f32 %v1998_v39, %v6044_v22  ;;  %v1927_v58 = vpop.f32.mrb[47].mxu1  ;;  %v2000_v9 = vpop.f32.mrb[55].mxu0 }
 0x723   :  { %v2066_v31 = vmul.f32 0.044715, %v6055_v43  ;;  %v2068_v36 = vmul.f32 0.044715, %v6058_v52  ;;  %v6065_v20 = vadd.f32 %v1927_v58, %v6048_v55  ;;  %v6068_v33 = vadd.f32 %v2000_v9, %v6050_v24 }
 0x724   :  { %v2097_v0 = vmul.f32 %v2065_v40, %v1922_v25  ;;  %v2099_v26 = vmul.f32 %v2067_v30, %v1995_v21  ;;  %v2069_v57 = vmul.f32 0.044715, %v1926_v50  ;;  %v2071_v45 = vmul.f32 0.044715, %v1999_v12 }
 0x725   :  { %v2098_v47 = vmul.f32 %v2066_v31, %v6055_v43  ;;  %v2100_v56 = vmul.f32 %v2068_v36, %v6058_v52  ;;  %v2070_v62 = vmul.f32 0.044715, %v6065_v20  ;;  %v6079_v7 = vmul.f32 0.5, %v1922_v25 }
 0x726   :  { %v2129_v19 = vmul.f32 %v2097_v0, %v1922_v25  ;;  %v2131_v41 = vmul.f32 %v2099_v26, %v1995_v21  ;;  %v2101_v35 = vmul.f32 %v2069_v57, %v1926_v50  ;;  %v2103_v61 = vmul.f32 %v2071_v45, %v1999_v12 }
 0x727   :  { %v1931_v34 = vpop.f32.mrb[48].mxu1  ;;  %v2004_v49 = vpop.f32.mrb[56].mxu0  ;;  %v6081_v48 = vmul.f32 0.5, %v1995_v21  ;;  %v2072_v46 = vmul.f32 0.044715, %v6068_v33  ;;  %v6084_v17 = vmul.f32 0.5, %v1926_v50  ;;  %v6094_v39 = vmul.f32 %v2098_v47, %v6055_v43 }
 0x728   :  { %v2161_v54 = vadd.f32 %v2129_v19, %v1922_v25  ;;  %v1933_v1 = vpop.f32.mrb[49].mxu1  ;;  %v2006_v3 = vpop.f32.mrb[57].mxu0  ;;  %v2163_v4 = vadd.f32 %v2131_v41, %v1995_v21  ;;  %v2133_v44 = vmul.f32 %v2101_v35, %v1926_v50  ;;  %v6074_v2 = vadd.f32 %v1931_v34, %v6040_v18 }
 0x729   :  { %v6077_v42 = vadd.f32 %v2004_v49, %v6044_v22  ;;  %v1935_v6 = vpop.f32.mrb[50].mxu1  ;;  %v2008_v60 = vpop.f32.mrb[58].mxu0  ;;  %v2135_v8 = vmul.f32 %v2103_v61, %v1999_v12  ;;  %v6086_v16 = vmul.f32 0.5, %v1999_v12  ;;  %v6091_v25 = vadd.f32 %v1933_v1, %v6048_v55 }
 0x72a   :  { %v1937_v5 = vpop.f32.mrb[51].mxu1  ;;  %v2010_v10 = vpop.f32.mrb[59].mxu0  ;;  %v2193_v15 = vmul.f32 0.7978846, %v2161_v54  ;;  %v2165_v59 = vadd.f32 %v2133_v44, %v1926_v50  ;;  %v2073_v28 = vmul.f32 0.044715, %v6074_v2  ;;  %v6097_v40 = vmul.f32 %v2100_v56, %v6058_v52 }
 0x72b   :  { %6845 = vst [vmem:[#allocation32_spill] sm:$0xff] %v6077_v42  ;;  %v2167_v27 = vadd.f32 %v2135_v8, %v1999_v12  ;;  %v2075_v29 = vmul.f32 0.044715, %v6077_v42  ;;  %v2195_v21 = vmul.f32 0.7978846, %v2163_v4  ;;  %v2102_v30 = vmul.f32 %v2070_v62, %v6065_v20 }
 0x72c   :  { %v2104_v31 = vmul.f32 %v2072_v46, %v6068_v33  ;;  %v2074_v50 = vmul.f32 0.044715, %v6091_v25  ;;  %v6103_v12 = vadd.f32 %v2006_v3, %v6050_v24  ;;  %v6106_v58 = vadd.f32 %v1935_v6, %v6040_v18 }
 0x72d   :  { %4836 = vtanh.f32 %v2193_v15  ;;  %v2197_v9 = vmul.f32 0.7978846, %v2165_v59  ;;  %v2199_v0 = vmul.f32 0.7978846, %v2167_v27  ;;  %v6109_v26 = vadd.f32 %v2008_v60, %v6044_v22 }
 0x72e   :  { %6846 = vst [vmem:[#allocation33_spill] sm:$0xff] %v6106_v58  ;;  %v2105_v19 = vmul.f32 %v2073_v28, %v6074_v2  ;;  %v2107_v41 = vmul.f32 %v2075_v29, %v6077_v42  ;;  %v2076_v45 = vmul.f32 0.044715, %v6103_v12  ;;  %v2077_v47 = vmul.f32 0.044715, %v6106_v58 }
 0x72f   :  { %6847 = vst [vmem:[#allocation34_spill] sm:$0xff] %v6109_v26  ;;  %v1941_v36 = vpop.f32.mrb[52].mxu1  ;;  %v2014_v57 = vpop.f32.mrb[60].mxu0  ;;  %v2106_v49 = vmul.f32 %v2074_v50, %v6091_v25  ;;  %v2079_v54 = vmul.f32 0.044715, %v6109_v26  ;;  %v6118_v56 = vadd.f32 %v1937_v5, %v6048_v55  ;;  %v6121_v61 = vadd.f32 %v2010_v10, %v6050_v24 }
 0x730   :  { %v1943_v35 = vpop.f32.mrb[53].mxu1  ;;  %v2016_v34 = vpop.f32.mrb[61].mxu0  ;;  %4838 = vtanh.f32 %v2195_v21  ;;  %v6124_v3 = vmul.f32 %v2102_v30, %v6065_v20  ;;  %v6127_v4 = vadd.f32 %v1941_v36, %v6040_v18  ;;  %v6130_v44 = vadd.f32 %v2014_v57, %v6044_v22 }
 0x731   :  { %v1945_v62 = vpop.f32.mrb[54].mxu1  ;;  %v2018_v1 = vpop.f32.mrb[62].mxu0  ;;  %4840 = vtanh.f32 %v2197_v9  ;;  %v6133_v8 = vmul.f32 %v2104_v31, %v6068_v33  ;;  %v2108_v46 = vmul.f32 %v2076_v45, %v6103_v12  ;;  %v2078_v5 = vmul.f32 0.044715, %v6118_v56 }
 0x732   :  { %v1947_v6 = vpop.f32.mrb[55].mxu1  ;;  %v2020_v60 = vpop.f32.mrb[63].mxu0  ;;  %v6138_v10 = vmul.f32 %v2105_v19, %v6074_v2  ;;  %v2109_v15 = vmul.f32 %v2077_v47, %v6106_v58  ;;  %v2080_v59 = vmul.f32 0.044715, %v6121_v61  ;;  %v6143_v27 = vadd.f32 %v1943_v35, %v6048_v55 }
 0x733   :  { %4842 = vtanh.f32 %v2199_v0  ;;  %v6146_v28 = vmul.f32 %v2107_v41, %v6077_v42  ;;  %v6149_v29 = vmul.f32 %v2106_v49, %v6091_v25  ;;  %v2111_v21 = vmul.f32 %v2079_v54, %v6109_v26 }
 0x734   :  { %6848 = vst [vmem:[#allocation35_spill] sm:$0xff] %v6138_v10  ;;  %v2081_v30 = vmul.f32 0.044715, %v6127_v4  ;;  %v2083_v31 = vmul.f32 0.044715, %v6130_v44  ;;  %v6155_v50 = vadd.f32 %v2016_v34, %v6050_v24  ;;  %v6158_v9 = vadd.f32 %v1945_v62, %v6040_v18 }
 0x735   :  { %6849 = vst [vmem:[#allocation36_spill] sm:$0xff] %v6146_v28  ;;  %v6161_v0 = vmul.f32 %v2108_v46, %v6103_v12  ;;  %v2110_v36 = vmul.f32 %v2078_v5, %v6118_v56  ;;  %v2082_v57 = vmul.f32 0.044715, %v6143_v27  ;;  %v6166_v19 = vadd.f32 %v2018_v1, %v6044_v22 }
 0x736   :  { %v6169_v47 = vmul.f32 %v2109_v15, %v6106_v58  ;;  %v2112_v35 = vmul.f32 %v2080_v59, %v6121_v61  ;;  %v2084_v34 = vmul.f32 0.044715, %v6155_v50  ;;  %v2085_v49 = vmul.f32 0.044715, %v6158_v9 }
 0x737   :  { %v1951_v41 = vpop.f32.mrb[56].mxu1  ;;  %v2024_v45 = vpop.f32.mrb[64].mxu0  ;;  %v2087_v5 = vmul.f32 0.044715, %v6166_v19  ;;  %v6178_v1 = vadd.f32 %v1947_v6, %v6048_v55  ;;  %v6181_v38 = vadd.f32 %v2020_v60, %v6050_v24  ;;  %v6187_v14 = vmul.f32 %v2111_v21, %v6109_v26 }
 0x738   :  { %6850 = vst [vmem:[#allocation37_spill] sm:$0xff] %v6169_v47  ;;  %v1953_v54 = vpop.f32.mrb[57].mxu1  ;;  %v2026_v62 = vpop.f32.mrb[65].mxu0  ;;  %v6184_v15 = vadd.f32 %v1951_v41, %v6040_v18  ;;  %v2113_v32 = vmul.f32 %v2081_v30, %v6127_v4  ;;  %v2115_v23 = vmul.f32 %v2083_v31, %v6130_v44  ;;  %v6192_v63 = vadd.f32 %v2024_v45, %v6044_v22 }
 0x739   :  { %v6174_v46 = vpop.eup %4836  ;;  %v1955_v59 = vpop.f32.mrb[58].mxu1  ;;  %6851 = vst [vmem:[#allocation38_spill] sm:$0xff] %v6187_v14  ;;  %v6195_v60 = vmul.f32 %v2110_v36, %v6118_v56  ;;  %v2086_v41 = vmul.f32 0.044715, %v6178_v1  ;;  %v2088_v11 = vmul.f32 0.044715, %v6181_v38  ;;  %v6201_v51 = vmul.f32 %v2112_v35, %v6121_v61 }
 0x73a   :  { %v2028_v37 = vpop.f32.mrb[66].mxu0  ;;  %6852 = vst [vmem:[#allocation39_spill] sm:$0xff] %v6192_v63  ;;  %v1957_v6 = vpop.f32.mrb[59].mxu1  ;;  %v2089_v53 = vmul.f32 0.044715, %v6184_v15  ;;  %v2114_v30 = vmul.f32 %v2082_v57, %v6143_v27  ;;  %v6206_v45 = vadd.f32 %v1953_v54, %v6048_v55  ;;  %v2116_v36 = vmul.f32 %v2084_v34, %v6155_v50 }
 0x73b   :  { %v2030_v13 = vpop.f32.mrb[67].mxu0  ;;  %v4839_v21 = vpop.eup %4838  ;;  %v2091_v31 = vmul.f32 0.044715, %v6192_v63  ;;  %v2117_v26 = vmul.f32 %v2085_v49, %v6158_v9  ;;  %v2119_v28 = vmul.f32 %v2087_v5, %v6166_v19  ;;  %v2118_v42 = vmul.f32 %v2086_v41, %v6178_v1 }
 0x73c   :  { %v4841_v14 = vpop.eup %4840  ;;  %v2120_v47 = vmul.f32 %v2088_v11, %v6181_v38  ;;  %v2090_v35 = vmul.f32 0.044715, %v6206_v45  ;;  %v6215_v57 = vadd.f32 %v2026_v62, %v6050_v24  ;;  %v6218_v58 = vadd.f32 %v1955_v59, %v6040_v18 }
 0x73d   :  { %v4843_v54 = vpop.eup %4842  ;;  %v6221_v10 = vmul.f32 %v2113_v32, %v6127_v4  ;;  %v6224_v34 = vmul.f32 %v2115_v23, %v6130_v44  ;;  %v2121_v49 = vmul.f32 %v2089_v53, %v6184_v15  ;;  %v6228_v5 = vadd.f32 %v2028_v37, %v6044_v22 }
 0x73e   :  { %v6231_v11 = vmul.f32 %v2114_v30, %v6143_v27  ;;  %v2123_v62 = vmul.f32 %v2091_v31, %v6192_v63  ;;  %v2122_v18 = vmul.f32 %v2090_v35, %v6206_v45  ;;  %v2092_v59 = vmul.f32 0.044715, %v6215_v57 }
 0x73f   :  { %v6237_v32 = vmul.f32 %v2116_v36, %v6155_v50  ;;  %v6240_v23 = vmul.f32 %v2117_v26, %v6158_v9  ;;  %v2093_v53 = vmul.f32 0.044715, %v6218_v58  ;;  %v2095_v37 = vmul.f32 0.044715, %v6228_v5 }
 0x740   :  { %v6245_v22 = vmul.f32 %v2119_v28, %v6166_v19  ;;  %v6248_v41 = vmul.f32 %v2118_v42, %v6178_v1  ;;  %v6251_v30 = vmul.f32 %v2120_v47, %v6181_v38  ;;  %v6254_v31 = vadd.f32 %v1957_v6, %v6048_v55 }
 0x741   :  { %v6257_v36 = vmul.f32 %v2121_v49, %v6184_v15  ;;  %v2124_v26 = vmul.f32 %v2092_v59, %v6215_v57  ;;  %v6261_v35 = vadd.f32 %v2030_v13, %v6050_v24  ;;  %v2162_v28 = vadd.f32 %v6094_v39, %v6055_v43 }
 0x742   :  { %v6266_v42 = vmul.f32 %v2123_v62, %v6192_v63  ;;  %v6269_v47 = vmul.f32 %v2122_v18, %v6206_v45  ;;  %v6272_v55 = vmul.f32 0.5, %v6055_v43  ;;  %v2166_v6 = vadd.f32 %v6124_v3, %v6065_v20 }
 0x743   :  { %v2125_v49 = vmul.f32 %v2093_v53, %v6218_v58  ;;  %v2127_v13 = vmul.f32 %v2095_v37, %v6228_v5  ;;  %v6279_v24 = vmul.f32 0.5, %v6065_v20  ;;  %v2194_v39 = vmul.f32 0.7978846, %v2162_v28 }
 0x744   :  { %6853 = vst [vmem:[#allocation40_spill] sm:$0xff] %v6266_v42  ;;  %v2094_v62 = vmul.f32 0.044715, %v6254_v31  ;;  %v2198_v59 = vmul.f32 0.7978846, %v2166_v6  ;;  %v2164_v18 = vadd.f32 %v6097_v40, %v6058_v52  ;;  %v2168_v43 = vadd.f32 %v6133_v8, %v6068_v33 }
 0x745   :  { %v6287_v42 = vmul.f32 %v2124_v26, %v6215_v57  ;;  %v2096_v3 = vmul.f32 0.044715, %v6261_v35  ;;  %4844 = vtanh.f32 %v2194_v39  ;;  %v2257_v53 = vadd.f32 1.0, %v6174_v46 }
 0x746   :  { %4846 = vtanh.f32 %v2198_v59  ;;  %v2196_v20 = vmul.f32 0.7978846, %v2164_v18  ;;  %v2200_v37 = vmul.f32 0.7978846, %v2168_v43  ;;  %v2261_v28 = vadd.f32 1.0, %v4841_v14 }
 0x747   :  { %v6292_v6 = vmul.f32 %v2125_v49, %v6218_v58  ;;  %v6295_v40 = vmul.f32 0.5, %v6058_v52  ;;  %v2259_v63 = vadd.f32 1.0, %v4839_v21  ;;  %v2263_v8 = vadd.f32 1.0, %v4843_v54 }
 0x748   :  { %4848 = vtanh.f32 %v2196_v20  ;;  %v6298_v26 = vmul.f32 %v2257_v53, %v6079_v7  ;;  %v6301_v39 = vmul.f32 %v2261_v28, %v6084_v17  ;;  %v2170_v46 = vadd.f32 %v6149_v29, %v6091_v25  ;;  %v6855_v53 = vld [vmem:[#allocation33_spill] sm:$0xff]  ;;  %v6857_v28 = vld [vmem:[#allocation32_spill] sm:$0xff] }
 0x749   :  { %4850 = vtanh.f32 %v2200_v37  ;;  %v6306_v14 = vmul.f32 %v2259_v63, %v6081_v48  ;;  %v6309_v49 = vmul.f32 %v2263_v8, %v6086_v16  ;;  %v2174_v52 = vadd.f32 %v6195_v60, %v6118_v56  ;;  %v6856_v20 = vld [vmem:[#allocation37_spill] sm:$0xff]  ;;  %v6858_v8 = vld [vmem:[#allocation36_spill] sm:$0xff] }
 0x74a   :  { %v2126_v21 = vmul.f32 %v2094_v62, %v6254_v31  ;;  %v2128_v7 = vmul.f32 %v2096_v3, %v6261_v35  ;;  %v2321_v17 = vpack.c.bf16 %v6301_v39, %v6298_v26  ;;  %v2202_v54 = vmul.f32 0.7978846, %v2170_v46  ;;  %v6854_v62 = vld [vmem:[#allocation35_spill] sm:$0xff] }
 0x74b   :  { %v2323_v29 = vpack.c.bf16 %v6309_v49, %v6306_v14  ;;  %v2206_v59 = vmul.f32 0.7978846, %v2174_v52  ;;  %v2172_v63 = vadd.f32 %v6161_v0, %v6103_v12  ;;  %v2176_v48 = vadd.f32 %v6201_v51, %v6121_v61  ;;  %v6859_v52 = vld [vmem:[#allocation34_spill] sm:$0xff] }
 0x74c   :  { %v6324_v16 = vmul.f32 %v2127_v13, %v6228_v5  ;;  %v2040_v60 = vmul.f32 0.5, %v6068_v33  ;;  %4852 = vtanh.f32 %v2202_v54  ;;  %v2169_v18 = vadd.f32 %v6854_v62, %v6074_v2  ;;  %v6860_v54 = vld [vmem:[#allocation38_spill] sm:$0xff] }
 0x74d   :  { %4854 = vtanh.f32 %v2206_v59  ;;  %v2204_v43 = vmul.f32 0.7978846, %v2172_v63  ;;  %v2208_v3 = vmul.f32 0.7978846, %v2176_v48  ;;  %v2173_v37 = vadd.f32 %v6856_v20, %v6855_v53 }
 0x74e   :  { %v6332_v0 = vmul.f32 %v2126_v21, %v6254_v31  ;;  %v6335_v51 = vmul.f32 %v2128_v7, %v6261_v35  ;;  %v2201_v13 = vmul.f32 0.7978846, %v2169_v18  ;;  %v2171_v33 = vadd.f32 %v6858_v8, %v6857_v28 }
 0x74f   :  { %v4845_v26 = vpop.eup %4844  ;;  %v2042_v39 = vmul.f32 0.5, %v6091_v25  ;;  %4856 = vtanh.f32 %v2204_v43  ;;  %v2205_v46 = vmul.f32 0.7978846, %v2173_v37  ;;  %v2175_v59 = vadd.f32 %v6860_v54, %v6859_v52 }
 0x750   :  { %v4847_v63 = vpop.eup %4846  ;;  %v2258_v48 = vadd.f32 1.0, %v4845_v26  ;;  %v2046_v21 = vmul.f32 0.5, %v6118_v56  ;;  %4858 = vtanh.f32 %v2208_v3  ;;  %v2203_v62 = vmul.f32 0.7978846, %v2171_v33 }
 0x751   :  { %v2262_v7 = vadd.f32 1.0, %v4847_v63  ;;  %4860 = vtanh.f32 %v2201_v13  ;;  %v2207_v18 = vmul.f32 0.7978846, %v2175_v59  ;;  %v2178_v20 = vadd.f32 %v6231_v11, %v6143_v27 }
 0x752   :  { %v4849_v8 = vpop.eup %4848  ;;  %v2290_v25 = vmul.f32 %v2258_v48, %v6272_v55  ;;  %v2044_v43 = vmul.f32 0.5, %v6103_v12  ;;  %4862 = vtanh.f32 %v2205_v46  ;;  %v2182_v37 = vadd.f32 %v6248_v41, %v6178_v1 }
 0x753   :  { %v4851_v26 = vpop.eup %4850  ;;  %v2294_v56 = vmul.f32 %v2262_v7, %v6279_v24  ;;  %v2260_v3 = vadd.f32 1.0, %v4849_v8  ;;  %4864 = vtanh.f32 %v2203_v62  ;;  %v2210_v33 = vmul.f32 0.7978846, %v2178_v20 }
 0x754   :  { %v2264_v13 = vadd.f32 1.0, %v4851_v26  ;;  %v2048_v54 = vmul.f32 0.5, %v6121_v61  ;;  %4866 = vtanh.f32 %v2207_v18  ;;  %v2214_v11 = vmul.f32 0.7978846, %v2182_v37 }
 0x755   :  { %v2322_v59 = vpack.c.bf16 %v2294_v56, %v2290_v25  ;;  %v2041_v55 = vmul.f32 0.5, %v6074_v2  ;;  %4868 = vtanh.f32 %v2210_v33  ;;  %v2180_v12 = vadd.f32 %v6237_v32, %v6155_v50 }
 0x756   :  { %v4853_v46 = vpop.eup %4852  ;;  %v2292_v41 = vmul.f32 %v2260_v3, %v6295_v40  ;;  %v2296_v63 = vmul.f32 %v2264_v13, %v2040_v60  ;;  %4870 = vtanh.f32 %v2214_v11  ;;  %v2184_v24 = vadd.f32 %v6251_v30, %v6181_v38 }
 0x757   :  { %v4855_v48 = vpop.eup %4854  ;;  %2632 = vmatprep.mubr.bf16.mxu1 %v2322_v59  ;;  %v2266_v61 = vadd.f32 1.0, %v4853_v46  ;;  %v2045_v62 = vmul.f32 0.5, %v6855_v53  ;;  %v2212_v7 = vmul.f32 0.7978846, %v2180_v12  ;;  %v2177_v2 = vadd.f32 %v6221_v10, %v6127_v4 }
 0x758   :  { %v2324_v18 = vpack.c.bf16 %v2296_v63, %v2292_v41  ;;  %2633 = vmatmul.mubr.bf16.vlgmr.msra.gmra.mrb[60].mxu1 %v2321_v17  ;;  %v2270_v32 = vadd.f32 1.0, %v4855_v48  ;;  %v2216_v20 = vmul.f32 0.7978846, %v2184_v24  ;;  %v2181_v40 = vadd.f32 %v6240_v23, %v6158_v9 }
 0x759   :  { %v4857_v60 = vpop.eup %4856  ;;  %v2298_v8 = vmul.f32 %v2266_v61, %v2042_v39  ;;  %v2043_v30 = vmul.f32 0.5, %v6857_v28  ;;  %4872 = vtanh.f32 %v2212_v7  ;;  %v2209_v25 = vmul.f32 0.7978846, %v2177_v2 }
 0x75a   :  { %v4859_v37 = vpop.eup %4858  ;;  %2697 = vmatprep.mubr.bf16.mxu0 %v2324_v18  ;;  %v2302_v53 = vmul.f32 %v2270_v32, %v2046_v21  ;;  %v2268_v26 = vadd.f32 1.0, %v4857_v60  ;;  %4874 = vtanh.f32 %v2216_v20  ;;  %v2213_v56 = vmul.f32 0.7978846, %v2181_v40 }
 0x75b   :  { %v4861_v10 = vpop.eup %4860  ;;  %2698 = vmatmul.mubr.bf16.vlgmr.msra.gmra.mrb[68].mxu0 %v2323_v29  ;;  %v2272_v17 = vadd.f32 1.0, %v4859_v37  ;;  %v2047_v23 = vmul.f32 0.5, %v6859_v52  ;;  %4876 = vtanh.f32 %v2209_v25  ;;  %v2179_v28 = vadd.f32 %v6224_v34, %v6130_v44 }
 0x75c   :  { %v4863_v39 = vpop.eup %4862  ;;  %v2326_v3 = vpack.c.bf16 %v2302_v53, %v2298_v8  ;;  %v2300_v33 = vmul.f32 %v2268_v26, %v2044_v43  ;;  %v2265_v13 = vadd.f32 1.0, %v4861_v10  ;;  %4878 = vtanh.f32 %v2213_v56 }
 0x75d   :  { %v4865_v21 = vpop.eup %4864  ;;  %v2304_v11 = vmul.f32 %v2272_v17, %v2048_v54  ;;  %v2269_v59 = vadd.f32 1.0, %v4863_v39  ;;  %v2183_v12 = vadd.f32 %v6245_v22, %v6166_v19  ;;  %v2211_v14 = vmul.f32 0.7978846, %v2179_v28 }
 0x75e   :  { %v4867_v49 = vpop.eup %4866  ;;  %2640 = vmatprep.mubr.bf16.mxu1 %v2326_v3  ;;  %v2297_v29 = vmul.f32 %v2265_v13, %v2041_v55  ;;  %v2267_v52 = vadd.f32 1.0, %v4865_v21  ;;  %v2050_v46 = vmul.f32 0.5, %v6143_v27  ;;  %v2054_v34 = vmul.f32 0.5, %v6178_v1 }
 0x75f   :  { %v4869_v41 = vpop.eup %4868  ;;  %v2328_v63 = vpack.c.bf16 %v2304_v11, %v2300_v33  ;;  %v2301_v43 = vmul.f32 %v2269_v59, %v2045_v62  ;;  %v2271_v24 = vadd.f32 1.0, %v4867_v49  ;;  %v2215_v48 = vmul.f32 0.7978846, %v2183_v12  ;;  %v6861_v12 = vld [vmem:[#allocation39_spill] sm:$0xff] }
 0x760   :  { %v4871_v61 = vpop.eup %4870  ;;  %v2299_v54 = vmul.f32 %v2267_v52, %v2043_v30  ;;  %v2274_v7 = vadd.f32 1.0, %v4869_v41  ;;  %4880 = vtanh.f32 %v2211_v14  ;;  %v2186_v22 = vadd.f32 %v6269_v47, %v6206_v45  ;;  %v6862_v14 = vld [vmem:[#allocation40_spill] sm:$0xff] }
 0x761   :  { %2705 = vmatprep.mubr.bf16.mxu0 %v2328_v63  ;;  %v2325_v2 = vpack.c.bf16 %v2301_v43, %v2297_v29  ;;  %v2303_v55 = vmul.f32 %v2271_v24, %v2047_v23  ;;  %v2278_v18 = vadd.f32 1.0, %v4871_v61  ;;  %4882 = vtanh.f32 %v2215_v48 }
 0x762   :  { %v2052_v27 = vmul.f32 0.5, %v6155_v50  ;;  %v2056_v1 = vmul.f32 0.5, %v6181_v38  ;;  %v2190_v62 = vadd.f32 %v6332_v0, %v6254_v31  ;;  %v2218_v32 = vmul.f32 0.7978846, %v2186_v22 }
 0x763   :  { %v4873_v20 = vpop.eup %4872  ;;  %2641 = vmatmul.mubr.bf16.gmra.mrb[64].mxu1 %v2325_v2  ;;  %v2327_v40 = vpack.c.bf16 %v2303_v55, %v2299_v54  ;;  %v2306_v60 = vmul.f32 %v2274_v7, %v2050_v46  ;;  %v2310_v8 = vmul.f32 %v2278_v18, %v2054_v34  ;;  %v2188_v47 = vadd.f32 %v6287_v42, %v6215_v57 }
 0x764   :  { %v4875_v30 = vpop.eup %4874  ;;  %v2276_v25 = vadd.f32 1.0, %v4873_v20  ;;  %v2222_v37 = vmul.f32 0.7978846, %v2190_v62  ;;  %4884 = vtanh.f32 %v2218_v32  ;;  %v2192_v50 = vadd.f32 %v6335_v51, %v6261_v35 }
 0x765   :  { %v4877_v38 = vpop.eup %4876  ;;  %2706 = vmatmul.mubr.bf16.gmra.mrb[72].mxu0 %v2327_v40  ;;  %v2330_v53 = vpack.c.bf16 %v2310_v8, %v2306_v60  ;;  %v2280_v0 = vadd.f32 1.0, %v4875_v30  ;;  %v2049_v26 = vmul.f32 0.5, %v6127_v4  ;;  %v2220_v56 = vmul.f32 0.7978846, %v2188_v47 }
 0x766   :  { %v4879_v10 = vpop.eup %4878  ;;  %v2053_v17 = vmul.f32 0.5, %v6158_v9  ;;  %v2273_v23 = vadd.f32 1.0, %v4877_v38  ;;  %4886 = vtanh.f32 %v2222_v37  ;;  %v2224_v42 = vmul.f32 0.7978846, %v2192_v50 }
 0x767   :  { %2648 = vmatprep.mubr.bf16.mxu1 %v2330_v53  ;;  %v2308_v28 = vmul.f32 %v2276_v25, %v2052_v27  ;;  %v2312_v39 = vmul.f32 %v2280_v0, %v2056_v1  ;;  %v2277_v3 = vadd.f32 1.0, %v4879_v10  ;;  %4888 = vtanh.f32 %v2220_v56 }
 0x768   :  { %4890 = vtanh.f32 %v2224_v42  ;;  %v2185_v51 = vadd.f32 %v6257_v36, %v6184_v15  ;;  %v2189_v33 = vadd.f32 %v6292_v6, %v6218_v58  ;;  %v2305_v13 = vmul.f32 %v2273_v23, %v2049_v26 }
 0x769   :  { %v2332_v4 = vpack.c.bf16 %v2312_v39, %v2308_v28  ;;  %v2309_v21 = vmul.f32 %v2277_v3, %v2053_v17  ;;  %v2187_v49 = vadd.f32 %v6862_v14, %v6861_v12  ;;  %v2191_v29 = vadd.f32 %v6324_v16, %v6228_v5 }
 0x76a   :  { %v4881_v11 = vpop.eup %4880  ;;  %v2217_v9 = vmul.f32 0.7978846, %v2185_v51  ;;  %v2221_v59 = vmul.f32 0.7978846, %v2189_v33  ;;  %v2051_v36 = vmul.f32 0.5, %v6130_v44  ;;  %v2055_v34 = vmul.f32 0.5, %v6166_v19 }
 0x76b   :  { %v4883_v52 = vpop.eup %4882  ;;  %2713 = vmatprep.mubr.bf16.mxu0 %v2332_v4  ;;  %v2329_v46 = vpack.c.bf16 %v2309_v21, %v2305_v13  ;;  %v2275_v6 = vadd.f32 1.0, %v4881_v11  ;;  %v2219_v63 = vmul.f32 0.7978846, %v2187_v49  ;;  %v2223_v43 = vmul.f32 0.7978846, %v2191_v29 }
 0x76c   :  { %v2279_v41 = vadd.f32 1.0, %v4883_v52  ;;  %4892 = vtanh.f32 %v2217_v9  ;;  %v2058_v44 = vmul.f32 0.5, %v6206_v45  ;;  %v2062_v19 = vmul.f32 0.5, %v6254_v31 }
 0x76d   :  { %2649 = vmatmul.mubr.bf16.gmra.mrb[68].mxu1 %v2329_v46  ;;  %4894 = vtanh.f32 %v2221_v59  ;;  %v2307_v48 = vmul.f32 %v2275_v6, %v2051_v36  ;;  %v2060_v18 = vmul.f32 0.5, %v6215_v57  ;;  %v2064_v32 = vmul.f32 0.5, %v6261_v35  ;;  %v6864_v46 = vld [vmem:[#allocation24_spill] sm:$0xff] }
 0x76e   :  { %v4885_v24 = vpop.eup %4884  ;;  %v2311_v61 = vmul.f32 %v2279_v41, %v2055_v34  ;;  %4896 = vtanh.f32 %v2219_v63  ;;  %v2057_v37 = vmul.f32 0.5, %v6184_v15  ;;  %v2061_v50 = vmul.f32 0.5, %v6218_v58  ;;  %v6405_v15 = vld [vmem:[#allocation9] ss:$0 sm:$0xff]  ;;  %v6865_v41 = vld [vmem:[#allocation25_spill] sm:$0xff] }
 0x76f   :  { %v2282_v54 = vadd.f32 1.0, %v4885_v24  ;;  %4898 = vtanh.f32 %v2223_v43  ;;  %v2059_v53 = vmul.f32 0.5, %v6861_v12  ;;  %v2063_v56 = vmul.f32 0.5, %v6228_v5 }
 0x770   :  { %v4887_v16 = vpop.eup %4886  ;;  %v2331_v7 = vpack.c.bf16 %v2311_v61, %v2307_v48  ;;  %v6863_v39 = vmov 0.0  }
 0x771   :  { %v4889_v22 = vpop.eup %4888  ;;  %v2286_v2 = vadd.f32 1.0, %v4887_v16  ;;  %v2314_v1 = vmul.f32 %v2282_v54, %v2058_v44 }
 0x772   :  { %v4891_v55 = vpop.eup %4890  ;;  %2714 = vmatmul.mubr.bf16.gmra.mrb[76].mxu0 %v2331_v7  ;;  %v2284_v27 = vadd.f32 1.0, %v4889_v22 }
 0x773   :  { %v2318_v62 = vmul.f32 %v2286_v2, %v2062_v19  ;;  %v2288_v20 = vadd.f32 1.0, %v4891_v55 }
 0x774   :  { %v2316_v60 = vmul.f32 %v2284_v27, %v2060_v18 }
 0x775   :  { %v2334_v40 = vpack.c.bf16 %v2318_v62, %v2314_v1  ;;  %v2320_v8 = vmul.f32 %v2288_v20, %v2064_v32  ;;  %v6866_v32 = vld [vmem:[#allocation26_spill] sm:$0xff] }
 0x776   :  { %v4893_v47 = vpop.eup %4892 }
 0x777   :  { %v4895_v30 = vpop.eup %4894  ;;  %2656 = vmatprep.mubr.bf16.mxu1 %v2334_v40  ;;  %v2336_v45 = vpack.c.bf16 %v2320_v8, %v2316_v60  ;;  %v2281_v25 = vadd.f32 1.0, %v4893_v47  ;;  %v6867_v8 = vld [vmem:[#allocation27_spill] sm:$0xff] }
 0x778   :  { %v4897_v31 = vpop.eup %4896  ;;  %v2285_v57 = vadd.f32 1.0, %v4895_v30 }
 0x779   :  { %v4899_v38 = vpop.eup %4898  ;;  %2721 = vmatprep.mubr.bf16.mxu0 %v2336_v45  ;;  %v2283_v35 = vadd.f32 1.0, %v4897_v31  ;;  %v2313_v0 = vmul.f32 %v2281_v25, %v2057_v37 }
 0x77a   :  { %v2317_v26 = vmul.f32 %v2285_v57, %v2061_v50  ;;  %v2287_v10 = vadd.f32 1.0, %v4899_v38 }
 0x77b   :  { %v2315_v23 = vmul.f32 %v2283_v35, %v2059_v53 }
 0x77c   :  { %v2333_v17 = vpack.c.bf16 %v2317_v26, %v2313_v0  ;;  %v2319_v42 = vmul.f32 %v2287_v10, %v2063_v56 }
 0x77e   :  { %2657 = vmatmul.mubr.bf16.gmra.mrb[72].mxu1 %v2333_v17  ;;  %v2335_v28 = vpack.c.bf16 %v2319_v42, %v2315_v23  ;;  %v6868_v42 = vld [vmem:[#allocation28_spill] sm:$0xff] }
 0x77f   :  { %4541 = vmatprep.mubr.msk.f32.mxu1 %vm5174_vm0, %v6863_v39 }
 0x780   :  { %2722 = vmatmul.mubr.bf16.gmra.mrb[80].mxu0 %v2335_v28 }
 0x82b   :  { %v4275_v58 = vpop.f32.mrb[60].mxu1 }
 0x82c   :  { %v4276_v3 = vpop.f32.mrb[61].mxu1 }
 0x82d   :  { %v4277_v51 = vadd.f32 %v4276_v3, %v4275_v58  ;;  %v4278_v33 = vpop.f32.mrb[62].mxu1  ;;  %v6869_v3 = vld [vmem:[#allocation29_spill] sm:$0xff] }
 0x82e   :  { %v4315_v4 = vpop.f32.mrb[68].mxu0  ;;  %v4279_v13 = vpop.f32.mrb[63].mxu1 }
 0x82f   :  { %v2635_v5 = vadd.f32 %v4277_v51, %v6405_v15  ;;  %v4316_v21 = vpop.f32.mrb[69].mxu0  ;;  %v4280_v11 = vadd.f32 %v4279_v13, %v4278_v33 }
 0x830   :  { %v4317_v9 = vadd.f32 %v4316_v21, %v4315_v4  ;;  %v4318_v59 = vpop.f32.mrb[70].mxu0 }
 0x831   :  { %v2638_v12 = vadd.f32 %v4280_v11, %v6405_v15  ;;  %v4319_v14 = vpop.f32.mrb[71].mxu0 }
 0x832   :  { %v2700_v49 = vadd.f32 %v4317_v9, %v2635_v5  ;;  %v4320_v29 = vadd.f32 %v4319_v14, %v4318_v59 }
 0x834   :  { %v2703_v52 = vadd.f32 %v4320_v29, %v2638_v12  ;;  %v6410_v36 = vadd.f32 %v2700_v49, %v6864_v46 }
 0x836   :  { %v4281_v34 = vpop.f32.mrb[64].mxu1  ;;  %2740 = vadd.xlane.f32.xlu0 %v6410_v36  ;;  %v2764_v6 = vmul.f32 %v6410_v36, %v6410_v36  ;;  %v6416_v63 = vadd.f32 %v2703_v52, %v6865_v41 }
 0x837   :  { %v4282_v43 = vpop.f32.mrb[65].mxu1 }
 0x838   :  { %v4321_v24 = vpop.f32.mrb[72].mxu0  ;;  %v4283_v48 = vadd.f32 %v4282_v43, %v4281_v34  ;;  %v4284_v61 = vpop.f32.mrb[66].mxu1  ;;  %2772 = vadd.xlane.f32.xlu1 %v2764_v6  ;;  %v2765_v2 = vmul.f32 %v6416_v63, %v6416_v63  ;;  %v6870_v43 = vld [vmem:[#allocation30_spill] sm:$0xff] }
 0x839   :  { %v4322_v54 = vpop.f32.mrb[73].mxu0  ;;  %v4285_v16 = vpop.f32.mrb[67].mxu1 }
 0x83a   :  { %v2643_v7 = vadd.f32 %v4283_v48, %v6405_v15  ;;  %v4323_v22 = vadd.f32 %v4322_v54, %v4321_v24  ;;  %v4324_v44 = vpop.f32.mrb[74].mxu0  ;;  %v4286_v19 = vadd.f32 %v4285_v16, %v4284_v61  ;;  %2742 = vadd.xlane.f32.xlu0 %v6416_v63  ;;  %v6871_v61 = vld [vmem:[#allocation31_spill] sm:$0xff] }
 0x83b   :  { %v4325_v55 = vpop.f32.mrb[75].mxu0 }
 0x83c   :  { %v2708_v18 = vadd.f32 %v4323_v22, %v2643_v7  ;;  %v2646_v27 = vadd.f32 %v4286_v19, %v6405_v15  ;;  %v4326_v1 = vadd.f32 %v4325_v55, %v4324_v44  ;;  %2774 = vadd.xlane.f32.xlu1 %v2765_v2  ;;  %v4757_v7 = vld [vmem:[%s6794_s15] sm:$0xff]   ;;  %v4758_v22 = vld [vmem:[%s6794_s15 + $0x48] sm:$0xff]   ;;  %v4760_v19 = vld [vmem:[%s6794_s15 + $0x50] sm:$0xff]  }
 0x83d   :  { %v4759_v44 = vld [vmem:[%s6794_s15 + $0x8] sm:$0xff]   ;;  %v4761_v2 = vld [vmem:[%s6794_s15 + $0x10] sm:$0xff]  }
 0x83e   :  { %v2711_v62 = vadd.f32 %v4326_v1, %v2646_v27  ;;  %v6424_v20 = vadd.f32 %v2708_v18, %v6866_v32 }
 0x840   :  { %v4287_v40 = vpop.f32.mrb[68].mxu1  ;;  %2744 = vadd.xlane.f32.xlu0 %v6424_v20  ;;  %v2766_v60 = vmul.f32 %v6424_v20, %v6424_v20  ;;  %v6430_v47 = vadd.f32 %v2711_v62, %v6867_v8 }
 0x841   :  { %v4288_v30 = vpop.f32.mrb[69].mxu1 }
 0x842   :  { %v4289_v45 = vadd.f32 %v4288_v30, %v4287_v40  ;;  %v4290_v25 = vpop.f32.mrb[70].mxu1  ;;  %2776 = vadd.xlane.f32.xlu1 %v2766_v60  ;;  %v2767_v50 = vmul.f32 %v6430_v47, %v6430_v47 }
 0x843   :  { %v4291_v31 = vpop.f32.mrb[71].mxu1 }
 0x844   :  { %v4292_v37 = vadd.f32 %v4291_v31, %v4290_v25  ;;  %2746 = vadd.xlane.f32.xlu0 %v6430_v47  ;;  %v2651_v38 = vadd.f32 %v4289_v45, %v6405_v15 }
 0x845   :  { %v4327_v57 = vpop.f32.mrb[76].mxu0 }
 0x846   :  { %v4328_v53 = vpop.f32.mrb[77].mxu0  ;;  %2778 = vadd.xlane.f32.xlu1 %v2767_v50  ;;  %v2654_v26 = vadd.f32 %v4292_v37, %v6405_v15 }
 0x847   :  { %v4329_v35 = vadd.f32 %v4328_v53, %v4327_v57  ;;  %v4330_v0 = vpop.f32.mrb[78].mxu0 }
 0x848   :  { %v4331_v56 = vpop.f32.mrb[79].mxu0 }
 0x849   :  { %v2716_v10 = vadd.f32 %v4329_v35, %v2651_v38  ;;  %v4332_v17 = vadd.f32 %v4331_v56, %v4330_v0 }
 0x84b   :  { %v2719_v23 = vadd.f32 %v4332_v17, %v2654_v26  ;;  %v6438_v28 = vadd.f32 %v2716_v10, %v6868_v42 }
 0x84d   :  { %2748 = vadd.xlane.f32.xlu0 %v6438_v28  ;;  %v2768_v58 = vmul.f32 %v6438_v28, %v6438_v28  ;;  %v6444_v51 = vadd.f32 %v2719_v23, %v6869_v3 }
 0x84f   :  { %2780 = vadd.xlane.f32.xlu1 %v2768_v58  ;;  %v2769_v4 = vmul.f32 %v6444_v51, %v6444_v51 }
 0x851   :  { %v4293_v33 = vpop.f32.mrb[72].mxu1  ;;  %2750 = vadd.xlane.f32.xlu0 %v6444_v51 }
 0x852   :  { %v4294_v13 = vpop.f32.mrb[73].mxu1 }
 0x853   :  { %v4333_v5 = vpop.f32.mrb[80].mxu0  ;;  %v4295_v21 = vadd.f32 %v4294_v13, %v4293_v33  ;;  %v4296_v11 = vpop.f32.mrb[74].mxu1  ;;  %2782 = vadd.xlane.f32.xlu1 %v2769_v4  ;;  %v6482_v4 = vld [vmem:[#allocation10] ss:$0 sm:$0xff] }
 0x854   :  { %v4334_v9 = vpop.f32.mrb[81].mxu0  ;;  %v4297_v59 = vpop.f32.mrb[75].mxu1 }
 0x855   :  { %v2659_v12 = vadd.f32 %v4295_v21, %v6405_v15  ;;  %v4335_v14 = vadd.f32 %v4334_v9, %v4333_v5  ;;  %v4336_v49 = vpop.f32.mrb[82].mxu0  ;;  %v4298_v29 = vadd.f32 %v4297_v59, %v4296_v11  ;;  %v6484_v21 = vld [vmem:[#allocation12] ss:$0 sm:$0xff] }
 0x856   :  { %v4337_v52 = vpop.f32.mrb[83].mxu0 }
 0x857   :  { %v2724_v46 = vadd.f32 %v4335_v14, %v2659_v12  ;;  %v2662_v34 = vadd.f32 %v4298_v29, %v6405_v15  ;;  %v4338_v6 = vadd.f32 %v4337_v52, %v4336_v49  ;;  %v4756_v15 = vld [vmem:[%s6794_s15 + $0x40] sm:$0xff]  }
 0x858   :  { %4355 = vmatprep.subr.bf16.mxu0 %v4756_v15 }
 0x859   :  { %v2727_v41 = vadd.f32 %v4338_v6, %v2662_v34  ;;  %v6452_v24 = vadd.f32 %v2724_v46, %v6870_v43  ;;  %4356 = vmatpush3.bf16.msra.mxu0 %v4757_v7 }
 0x85a   :  { %4357 = vmatprep.subr.bf16.mxu0 %v4758_v22 }
 0x85b   :  { %2752 = vadd.xlane.f32.xlu0 %v6452_v24  ;;  %v2770_v48 = vmul.f32 %v6452_v24, %v6452_v24  ;;  %v6458_v54 = vadd.f32 %v2727_v41, %v6871_v61  ;;  %v202_v61 = vld [vmem:[%s6872_s1 + $0x1] sm:$0x1] }
 0x85d   :  { %2784 = vadd.xlane.f32.xlu1 %v2770_v48  ;;  %v2771_v16 = vmul.f32 %v6458_v54, %v6458_v54  ;;  %4358 = vmatpush3.bf16.msra.mxu0 %v4759_v44 }
 0x85e   :  { %4359 = vmatprep.subr.bf16.mxu0 %v4760_v19 }
 0x85f   :  { %2754 = vadd.xlane.f32.xlu0 %v6458_v54 }
 0x861   :  { %2786 = vadd.xlane.f32.xlu1 %v2771_v16  ;;  %4360 = vmatpush3.bf16.msra.mxu0 %v4761_v2 }
 0x8c3   :  { %v2741_v55 = vpop.xlane.xlu0 %2740 }
 0x8c4   :  { %v2756_v18 = vmul.f32 0.0078125, %v2741_v55 }
 0x8c5   :  { %v2773_v27 = vpop.xlane.xlu1 %2772 }
 0x8c6   :  { %v2796_v1 = vmul.f32 %v2756_v18, %v2756_v18  ;;  %v2788_v62 = vmul.f32 0.0078125, %v2773_v27  ;;  %v2812_v58 = vsub.f32 %v6410_v36, %v2756_v18  ;;  %v201_v36 = vld [vmem:[%s6872_s1] sm:$0x1] }
 0x8c7   :  { %v2743_v32 = vpop.xlane.xlu0 %2742 }
 0x8c8   :  { %v2804_v40 = vsub.f32 %v2788_v62, %v2796_v1  ;;  %v2757_v60 = vmul.f32 0.0078125, %v2743_v32 }
 0x8c9   :  { %v2775_v8 = vpop.xlane.xlu1 %2774 }
 0x8ca   :  { %v2820_v30 = vadd.f32 1e-05, %v2804_v40  ;;  %v2797_v45 = vmul.f32 %v2757_v60, %v2757_v60  ;;  %v2789_v25 = vmul.f32 0.0078125, %v2775_v8  ;;  %v2813_v11 = vsub.f32 %v6416_v63, %v2757_v60  ;;  %v203_v40 = vld [vmem:[%s6872_s1 + $0x2] sm:$0x1] }
 0x8cc   :  { %4900 = vrsqrt.f32 %v2820_v30  ;;  %v2805_v31 = vsub.f32 %v2789_v25, %v2797_v45  ;;  %v204_v25 = vld [vmem:[%s6872_s1 + $0x3] sm:$0x1] }
 0x8cd   :  { %v2745_v37 = vpop.xlane.xlu0 %2744 }
 0x8ce   :  { %v2821_v50 = vadd.f32 1e-05, %v2805_v31  ;;  %v2758_v57 = vmul.f32 0.0078125, %v2745_v37 }
 0x8cf   :  { %v2777_v38 = vpop.xlane.xlu1 %2776 }
 0x8d0   :  { %4902 = vrsqrt.f32 %v2821_v50  ;;  %v2798_v53 = vmul.f32 %v2758_v57, %v2758_v57  ;;  %v2790_v35 = vmul.f32 0.0078125, %v2777_v38  ;;  %v2814_v15 = vsub.f32 %v6424_v20, %v2758_v57 }
 0x8d1   :  { %v2747_v0 = vpop.xlane.xlu0 %2746 }
 0x8d2   :  { %v2806_v26 = vsub.f32 %v2790_v35, %v2798_v53  ;;  %v2759_v56 = vmul.f32 0.0078125, %v2747_v0 }
 0x8d3   :  { %v2779_v10 = vpop.xlane.xlu1 %2778 }
 0x8d4   :  { %v2822_v17 = vadd.f32 1e-05, %v2806_v26  ;;  %v2799_v23 = vmul.f32 %v2759_v56, %v2759_v56  ;;  %v2791_v42 = vmul.f32 0.0078125, %v2779_v10  ;;  %v2815_v55 = vsub.f32 %v6430_v47, %v2759_v56 }
 0x8d6   :  { %v4901_v3 = vpop.eup %4900  ;;  %4904 = vrsqrt.f32 %v2822_v17  ;;  %v2807_v33 = vsub.f32 %v2791_v42, %v2799_v23 }
 0x8d7   :  { %v2836_v13 = vmul.f32 %v4901_v3, %v2812_v58 }
 0x8d8   :  { %v2823_v5 = vadd.f32 1e-05, %v2807_v33  ;;  %v205_v33 = vld [vmem:[%s6872_s1 + $0x4] sm:$0x1] }
 0x8d9   :  { %v2850_v9 = vmul.f32 %v6482_v4, %v2836_v13 }
 0x8da   :  { %v4903_v59 = vpop.eup %4902  ;;  %4906 = vrsqrt.f32 %v2823_v5  ;;  %v2749_v12 = vpop.xlane.xlu0 %2748 }
 0x8db   :  { %v2760_v14 = vmul.f32 0.0078125, %v2749_v12  ;;  %v6489_v49 = vadd.f32 %v6484_v21, %v2850_v9  ;;  %v2837_v29 = vmul.f32 %v4903_v59, %v2813_v11  ;;  %v206_v9 = vld [vmem:[%s6872_s1 + $0x5] sm:$0x1] }
 0x8dc   :  { %v2781_v52 = vpop.xlane.xlu1 %2780 }
 0x8dd   :  { %v2800_v46 = vmul.f32 %v2760_v14, %v2760_v14  ;;  %v2792_v34 = vmul.f32 0.0078125, %v2781_v52  ;;  %4540 = vmatpush3.msra.mxu1 %v6489_v49  ;;  %v2851_v63 = vmul.f32 %v6482_v4, %v2837_v29  ;;  %v2816_v50 = vsub.f32 %v6438_v28, %v2760_v14 }
 0x8de   :  { %v2751_v6 = vpop.xlane.xlu0 %2750  ;;  %4542 = vmatmul.mubr.msk.f32.vlgmr.msra.gmra.mrb[76].mxu1 %vm912_vm2, %v201_v36  ;;  %4544 = vmatprep.subr.mxu1 %v6863_v39 }
 0x8df   :  { %v2808_v41 = vsub.f32 %v2792_v34, %v2800_v46  ;;  %v2761_v43 = vmul.f32 0.0078125, %v2751_v6  ;;  %v6499_v48 = vadd.f32 %v6484_v21, %v2851_v63  ;;  %4546 = vmatprep.mubr.msk.f32.mxu1 %vm5174_vm0, %v6863_v39  ;;  %v207_v34 = vld [vmem:[%s6872_s1 + $0x6] sm:$0x1]  ;;  %v208_v6 = vld [vmem:[%s6872_s1 + $0x7] sm:$0x1] }
 0x8e0   :  { %v4905_v16 = vpop.eup %4904  ;;  %v2783_v7 = vpop.xlane.xlu1 %2782 }
 0x8e1   :  { %v2824_v22 = vadd.f32 1e-05, %v2808_v41  ;;  %v2801_v44 = vmul.f32 %v2761_v43, %v2761_v43  ;;  %v2793_v19 = vmul.f32 0.0078125, %v2783_v7  ;;  %4545 = vmatpush3.msra.mxu1 %v6499_v48  ;;  %v2838_v2 = vmul.f32 %v4905_v16, %v2814_v15  ;;  %v4764_v41 = vld [vmem:[%s6794_s15 + $0x60] sm:$0xff]   ;;  %v4767_v16 = vld [vmem:[%s6794_s15 + $0x28] sm:$0xff]   ;;  %v4768_v15 = vld [vmem:[%s6794_s15 + $0x70] sm:$0xff]  }
 0x8e2   :  { %4547 = vmatmul.mubr.msk.f32.vlgmr.msra.gmra.mrb[78].mxu1 %vm912_vm2, %v202_v61  ;;  %4549 = vmatprep.subr.mxu1 %v6863_v39  ;;  %v2817_v23 = vsub.f32 %v6444_v51, %v2761_v43  ;;  %v4765_v43 = vld [vmem:[%s6794_s15 + $0x20] sm:$0xff]   ;;  %v4766_v61 = vld [vmem:[%s6794_s15 + $0x68] sm:$0xff]   ;;  %v4769_v7 = vld [vmem:[%s6794_s15 + $0x30] sm:$0xff]  }
 0x8e3   :  { %4908 = vrsqrt.f32 %v2824_v22  ;;  %v2809_v18 = vsub.f32 %v2793_v19, %v2801_v44  ;;  %4551 = vmatprep.mubr.msk.f32.mxu1 %vm5174_vm0, %v6863_v39  ;;  %v2852_v20 = vmul.f32 %v6482_v4, %v2838_v2  ;;  %v4770_v22 = vld [vmem:[%s6794_s15 + $0x78] sm:$0xff]   ;;  %v4772_v19 = vld [vmem:[%s6796_s17] sm:$0xff]   ;;  %v4773_v2 = vld [vmem:[%s6796_s17 + $0x8] sm:$0xff]  }
 0x8e4   :  { %v4907_v27 = vpop.eup %4906  ;;  %v4771_v44 = vld [vmem:[%s6794_s15 + $0x38] sm:$0xff]  }
 0x8e5   :  { %v2825_v1 = vadd.f32 1e-05, %v2809_v18  ;;  %v2839_v62 = vmul.f32 %v4907_v27, %v2815_v55  ;;  %v6515_v32 = vadd.f32 %v6484_v21, %v2852_v20  ;;  %v4774_v55 = vld [vmem:[%s6796_s17 + $0x10] sm:$0xff]  }
 0x8e7   :  { %4910 = vrsqrt.f32 %v2825_v1  ;;  %v2853_v47 = vmul.f32 %v6482_v4, %v2839_v62  ;;  %4550 = vmatpush3.msra.mxu1 %v6515_v32 }
 0x8e8   :  { %v2753_v60 = vpop.xlane.xlu0 %2752  ;;  %4552 = vmatmul.mubr.msk.f32.vlgmr.msra.gmra.mrb[80].mxu1 %vm912_vm2, %v203_v40  ;;  %4554 = vmatprep.subr.mxu1 %v6863_v39 }
 0x8e9   :  { %v2762_v8 = vmul.f32 0.0078125, %v2753_v60  ;;  %v6525_v30 = vadd.f32 %v6484_v21, %v2853_v47  ;;  %4556 = vmatprep.mubr.msk.f32.mxu1 %vm5174_vm0, %v6863_v39 }
 0x8ea   :  { %v2785_v45 = vpop.xlane.xlu1 %2784 }
 0x8eb   :  { %v2802_v31 = vmul.f32 %v2762_v8, %v2762_v8  ;;  %v2794_v37 = vmul.f32 0.0078125, %v2785_v45  ;;  %4555 = vmatpush3.msra.mxu1 %v6525_v30  ;;  %v2818_v59 = vsub.f32 %v6452_v24, %v2762_v8 }
 0x8ec   :  { %v2755_v57 = vpop.xlane.xlu0 %2754  ;;  %4559 = vmatprep.subr.mxu1 %v6863_v39  ;;  %4557 = vmatmul.mubr.msk.f32.vlgmr.msra.gmra.mrb[82].mxu1 %vm912_vm2, %v204_v25 }
 0x8ed   :  { %v4909_v38 = vpop.eup %4908  ;;  %v2810_v53 = vsub.f32 %v2794_v37, %v2802_v31  ;;  %v2763_v35 = vmul.f32 0.0078125, %v2755_v57  ;;  %4561 = vmatprep.mubr.msk.f32.mxu1 %vm5174_vm0, %v6863_v39 }
 0x8ee   :  { %v2787_v0 = vpop.xlane.xlu1 %2786  ;;  %v2840_v26 = vmul.f32 %v4909_v38, %v2816_v50 }
 0x8ef   :  { %v2826_v56 = vadd.f32 1e-05, %v2810_v53  ;;  %v2803_v10 = vmul.f32 %v2763_v35, %v2763_v35  ;;  %v2795_v17 = vmul.f32 0.0078125, %v2787_v0  ;;  %v2819_v36 = vsub.f32 %v6458_v54, %v2763_v35 }
 0x8f0   :  { %v2854_v28 = vmul.f32 %v6482_v4, %v2840_v26 }
 0x8f1   :  { %v4911_v42 = vpop.eup %4910  ;;  %4912 = vrsqrt.f32 %v2826_v56  ;;  %v2811_v58 = vsub.f32 %v2795_v17, %v2803_v10  ;;  %v3464_v17 = vrot.slane %v6499_v48, 7 }
 0x8f2   :  { %v6541_v3 = vadd.f32 %v6484_v21, %v2854_v28  ;;  %v2841_v13 = vmul.f32 %v4911_v42, %v2817_v23  ;;  %v3467_v23 = vrot.slane %v6515_v32, 6  ;;  %v3470_v28 = vrot.slane %v6525_v30, 5 }
 0x8f3   :  { %v2827_v5 = vadd.f32 1e-05, %v2811_v58 }
 0x8f4   :  { %4560 = vmatpush3.msra.mxu1 %v6541_v3  ;;  %v2855_v11 = vmul.f32 %v6482_v4, %v2841_v13  ;;  %v3473_v42 = vrot.slane %v6541_v3, 4 }
 0x8f5   :  { %4914 = vrsqrt.f32 %v2827_v5  ;;  %4562 = vmatmul.mubr.msk.f32.vlgmr.msra.gmra.mrb[84].mxu1 %vm912_vm2, %v205_v33  ;;  %4564 = vmatprep.subr.mxu1 %v6863_v39  ;;  %v3466_v33 = vsel %vm3465_vm3, %v3464_v17, %v6489_v49 }
 0x8f6   :  { %v6551_v51 = vadd.f32 %v6484_v21, %v2855_v11  ;;  %4566 = vmatprep.mubr.msk.f32.mxu1 %vm5174_vm0, %v6863_v39  ;;  %v3469_v11 = vsel %vm3468_vm4, %v3467_v23, %v3466_v33  ;;  %v5175_v23 = vmov 1  }
 0x8f7   :  { %4634 = vset.pattern.permute.xlu1 %v5175_v23 }
 0x8f8   :  { %4565 = vmatpush3.msra.mxu1 %v6551_v51  ;;  %v3476_v58 = vrot.slane %v6551_v51, 3 }
 0x8f9   :  { %4567 = vmatmul.mubr.msk.f32.vlgmr.msra.gmra.mrb[86].mxu1 %vm912_vm2, %v206_v9  ;;  %4569 = vmatprep.subr.mxu1 %v6863_v39 }
 0x8fa   :  { %4571 = vmatprep.mubr.msk.f32.mxu1 %vm5174_vm0, %v6863_v39 }
 0x8fb   :  { %v4913_v12 = vpop.eup %4912 }
 0x8fc   :  { %v2842_v14 = vmul.f32 %v4913_v12, %v2818_v59 }
 0x8fe   :  { %v2856_v29 = vmul.f32 %v6482_v4, %v2842_v14  ;;  %v3472_v14 = vsel %vm3471_vm5, %v3470_v28, %v3469_v11  ;;  %v4780_v28 = vld [vmem:[%s6798_s19] sm:$0xff]  }
 0x8ff   :  { %v4915_v52 = vpop.eup %4914 }
 0x900   :  { %v6567_v46 = vadd.f32 %v6484_v21, %v2856_v29  ;;  %v2843_v63 = vmul.f32 %v4915_v52, %v2819_v36  ;;  %v3475_v36 = vsel %vm3474_vm6, %v3473_v42, %v3472_v14  ;;  %v4781_v42 = vld [vmem:[%s6798_s19 + $0x8] sm:$0xff]   ;;  %v4786_v14 = vld [vmem:[%s6798_s19 + $0x30] sm:$0xff]  }
 0x901   :  { %v3478_v52 = vsel %vm3477_vm7, %v3476_v58, %v3475_v36  ;;  %v4782_v58 = vld [vmem:[%s6798_s19 + $0x10] sm:$0xff]   ;;  %v4787_v36 = vld [vmem:[%s6798_s19 + $0x38] sm:$0xff]  }
 0x902   :  { %4570 = vmatpush3.msra.mxu1 %v6567_v46  ;;  %v2857_v24 = vmul.f32 %v6482_v4, %v2843_v63  ;;  %v4762_v4 = vld [vmem:[%s6794_s15 + $0x58] sm:$0xff]   ;;  %v3479_v5 = vrot.slane %v6567_v46, 2 }
 0x903   :  { %4572 = vmatmul.mubr.msk.f32.vlgmr.msra.gmra.mrb[88].mxu1 %vm912_vm2, %v207_v34  ;;  %4574 = vmatprep.subr.mxu1 %v6863_v39 }
 0x904   :  { %v6577_v54 = vadd.f32 %v6484_v21, %v2857_v24  ;;  %4576 = vmatprep.mubr.msk.f32.mxu1 %vm5174_vm0, %v6863_v39  ;;  %4361 = vmatprep.subr.bf16.mxu0 %v4762_v4  ;;  %v4763_v21 = vld [vmem:[%s6794_s15 + $0x18] sm:$0xff]   ;;  %v3481_v63 = vsel %vm3480_vm8, %v3479_v5, %v3478_v52 }
 0x905   :  { %4362 = vmatpush3.bf16.msra.mxu0 %v4763_v21 }
 0x906   :  { %4575 = vmatpush3.msra.mxu1 %v6577_v54  ;;  %4363 = vmatprep.subr.bf16.mxu0 %v4764_v41  ;;  %v3482_v12 = vrot.slane %v6577_v54, 1 }
 0x907   :  { %4577 = vmatmul.mubr.msk.f32.vlgmr.msra.gmra.mrb[90].mxu1 %vm912_vm2, %v208_v6  ;;  %4579 = vmatprep.subr.bf16.mxu1 %v6863_v39 }
 0x908   :  { %4595 = vmatprep.mubr.msk.bf16.mxu1 %vm5174_vm0, %v6863_v39  ;;  %4580 = vmatpush3.bf16.msra.mxu1 %v4772_v19  ;;  %v3484_v4 = vsel %vm3483_vm9, %v3482_v12, %v3481_v63  ;;  %v4168_v19 = vld [vmem:[#allocation13] ss:$0 sm:$0xff]  ;;  %v4785_v12 = vld [vmem:[%s6798_s19 + $0x28] sm:$0xff]  }
 0x909   :  { %4364 = vmatpush3.bf16.msra.mxu0 %v4765_v43  ;;  %4581 = vmatprep.subr.bf16.mxu1 %v6863_v39  ;;  %v3509_v43 = vpack.c.bf16 %v3484_v4, %v3484_v4 }
 0x90a   :  { %4365 = vmatprep.subr.bf16.mxu0 %v4766_v61  ;;  %v4775_v61 = vld [vmem:[%s6796_s17 + $0x18] sm:$0xff]  }
 0x90c   :  { %4582 = vmatpush3.bf16.msra.mxu1 %v4773_v2 }
 0x90d   :  { %4366 = vmatpush3.bf16.msra.mxu0 %v4767_v16  ;;  %4583 = vmatprep.subr.bf16.mxu1 %v6863_v39  ;;  %v4776_v16 = vld [vmem:[%s6796_s17 + $0x20] sm:$0xff]  }
 0x90e   :  { %4367 = vmatprep.subr.bf16.mxu0 %v4768_v15  ;;  %v4777_v15 = vld [vmem:[%s6796_s17 + $0x28] sm:$0xff]  }
 0x910   :  { %4584 = vmatpush3.bf16.msra.mxu1 %v4774_v55 }
 0x911   :  { %4368 = vmatpush3.bf16.msra.mxu0 %v4769_v7  ;;  %4585 = vmatprep.subr.bf16.mxu1 %v6863_v39  ;;  %v4778_v7 = vld [vmem:[%s6796_s17 + $0x30] sm:$0xff]  }
 0x912   :  { %4369 = vmatprep.subr.bf16.mxu0 %v4770_v22  ;;  %v4779_v22 = vld [vmem:[%s6796_s17 + $0x38] sm:$0xff]  }
 0x914   :  { %4586 = vmatpush3.bf16.msra.mxu1 %v4775_v61 }
 0x915   :  { %4370 = vmatpush3.bf16.msra.mxu0 %v4771_v44  ;;  %4587 = vmatprep.subr.bf16.mxu1 %v6863_v39 }
 0x916   :  { %4599 = vmatprep.subr.bf16.mxu0 %v6863_v39 }
 0x918   :  { %4588 = vmatpush3.bf16.msra.mxu1 %v4776_v16 }
 0x919   :  { %4589 = vmatprep.subr.bf16.mxu1 %v6863_v39 }
 0x91c   :  { %4590 = vmatpush3.bf16.msra.mxu1 %v4777_v15 }
 0x91d   :  { %4591 = vmatprep.subr.bf16.mxu1 %v6863_v39 }
 0x920   :  { %4592 = vmatpush3.bf16.msra.mxu1 %v4778_v7 }
 0x921   :  { %4593 = vmatprep.subr.bf16.mxu1 %v6863_v39 }
 0x924   :  { %4594 = vmatpush3.bf16.msra.mxu1 %v4779_v22 }
 0x9b1   :  { %v6632_v18 = vpop.f32.mrb[76].mxu1 }
 0x9b2   :  { %v4543_v27 = vpop.f32.mrb[77].mxu1 }
 0x9b5   :  { %v6634_v20 = vpop.f32.mrb[78].mxu1 }
 0x9b6   :  { %v3494_v1 = vrot.slane %v6634_v20, 7  ;;  %v4548_v62 = vpop.f32.mrb[79].mxu1 }
 0x9b8   :  { %v3495_v40 = vsel %vm3465_vm3, %v3494_v1, %v6632_v18 }
 0x9bb   :  { %v6639_v47 = vpop.f32.mrb[80].mxu1 }
 0x9bc   :  { %v3496_v60 = vrot.slane %v6639_v47, 6  ;;  %v4553_v8 = vpop.f32.mrb[81].mxu1 }
 0x9bd   :  { %v4185_v8 = vld [vmem:[#allocation15] ss:$0 sm:$0xff] }
 0x9be   :  { %v3497_v45 = vsel %vm3468_vm4, %v3496_v60, %v3495_v40 }
 0x9bf   :  { %v6643_v25 = vpop.f32.mrb[82].mxu1 }
 0x9c0   :  { %v3498_v31 = vrot.slane %v6643_v25, 5  ;;  %v4558_v37 = vpop.f32.mrb[83].mxu1 }
 0x9c2   :  { %v3499_v50 = vsel %vm3471_vm5, %v3498_v31, %v3497_v45 }
 0x9c8   :  { %v6647_v57 = vpop.f32.mrb[84].mxu1 }
 0x9c9   :  { %v3500_v38 = vrot.slane %v6647_v57, 4  ;;  %v4563_v53 = vpop.f32.mrb[85].mxu1 }
 0x9cb   :  { %v3501_v35 = vsel %vm3474_vm6, %v3500_v38, %v3499_v50 }
 0x9cc   :  { %v6651_v0 = vpop.f32.mrb[86].mxu1 }
 0x9cd   :  { %v3502_v26 = vrot.slane %v6651_v0, 3  ;;  %v4568_v56 = vpop.f32.mrb[87].mxu1 }
 0x9cf   :  { %v3503_v10 = vsel %vm3477_vm7, %v3502_v26, %v3501_v35 }
 0x9d6   :  { %v6662_v13 = vpop.f32.mrb[88].mxu1 }
 0x9d7   :  { %v3504_v9 = vrot.slane %v6662_v13, 2  ;;  %v4573_v59 = vpop.f32.mrb[89].mxu1 }
 0x9d8   :  { %v4784_v59 = vld [vmem:[%s6798_s19 + $0x20] sm:$0xff]  }
 0x9d9   :  { %v3505_v29 = vsel %vm3480_vm8, %v3504_v9, %v3503_v10  ;;  %v4783_v9 = vld [vmem:[%s6798_s19 + $0x18] sm:$0xff]  }
 0x9da   :  { %v6672_v34 = vpop.f32.mrb[90].mxu1 }
 0x9db   :  { %v3506_v24 = vrot.slane %v6672_v34, 1  ;;  %v4578_v6 = vpop.f32.mrb[91].mxu1 }
 0x9dd   :  { %v3507_v21 = vsel %vm3483_vm9, %v3506_v24, %v3505_v29 }
 0x9de   :  { %v3510_v41 = vpack.c.bf16 %v3507_v21, %v3507_v21 }
 0x9e0   :  { %3678 = vmatprep.mubr.bf16.mxu0 %v3510_v41 }
 0x9e1   :  { %3679 = vmatmul.mubr.bf16.vlgmr.msra.gmra.mrb[84].mxu0 %v3509_v43 }
 0x9e2   :  { %4615 = vmatprep.mubr.msk.bf16.mxu0 %vm5174_vm0, %v6863_v39  ;;  %4600 = vmatpush3.bf16.msra.mxu0 %v4780_v28 }
 0x9e3   :  { %4601 = vmatprep.subr.bf16.mxu0 %v6863_v39 }
 0x9e6   :  { %4602 = vmatpush3.bf16.msra.mxu0 %v4781_v42 }
 0x9e7   :  { %4603 = vmatprep.subr.bf16.mxu0 %v6863_v39 }
 0x9ea   :  { %4604 = vmatpush3.bf16.msra.mxu0 %v4782_v58 }
 0x9eb   :  { %4605 = vmatprep.subr.bf16.mxu0 %v6863_v39 }
 0x9ee   :  { %4606 = vmatpush3.bf16.msra.mxu0 %v4783_v9 }
 0x9ef   :  { %4607 = vmatprep.subr.bf16.mxu0 %v6863_v39 }
 0x9f2   :  { %4608 = vmatpush3.bf16.msra.mxu0 %v4784_v59 }
 0x9f3   :  { %4609 = vmatprep.subr.bf16.mxu0 %v6863_v39 }
 0x9f6   :  { %4610 = vmatpush3.bf16.msra.mxu0 %v4785_v12 }
 0x9f7   :  { %4611 = vmatprep.subr.bf16.mxu0 %v6863_v39 }
 0x9fa   :  { %4612 = vmatpush3.bf16.msra.mxu0 %v4786_v14 }
 0x9fb   :  { %4613 = vmatprep.subr.bf16.mxu0 %v6863_v39 }
 0x9fe   :  { %4614 = vmatpush3.bf16.msra.mxu0 %v4787_v36 }
 0xab4   :  { %v4371_v44 = vpop.f32.mrb[84].mxu0 }
 0xab5   :  { %v4372_v2 = vpop.f32.mrb[85].mxu0 }
 0xab6   :  { %v4373_v55 = vadd.f32 %v4372_v2, %v4371_v44  ;;  %v4374_v27 = vpop.f32.mrb[86].mxu0 }
 0xab7   :  { %v4375_v1 = vpop.f32.mrb[87].mxu0 }
 0xab8   :  { %v3681_v62 = vadd.f32 %v4373_v55, %v4168_v19 }
 0xaba   :  { %4916 = vtanh.f32 %v3681_v62 }
 0xac4   :  { %v4917_v40 = vpop.eup %4916 }
 0xac5   :  { %v3687_v60 = vpack.c.bf16 %v4917_v40, %v4917_v40 }
 0xac7   :  { %4596 = vmatmul.mubr.bf16.vlgmr.msra.gmra.mrb[92].mxu1 %v3687_v60 }
 0xb9a   :  { %v3793_v45 = vpop.f32.mrb[92].mxu1 }
 0xb9b   :  { %v3794_v31 = vadd.f32 %v4185_v8, %v3793_v45  ;;  %v4597_v37 = vpop.f32.mrb[93].mxu1 }
 0xb9c   :  { %v3796_v50 = vpop.f32.mrb[94].mxu1 }
 0xb9d   :  { %v4598_v38 = vpop.f32.mrb[95].mxu1  ;;  %v3800_v53 = vsel %vm3799_vm10, %v3794_v31, -inf }
 0xb9e   :  { %3801 = vmax.xlane.f32.xlu0 %v3800_v53 }
 0xc2b   :  { %v3802_v35 = vpop.xlane.xlu0 %3801 }
 0xc2c   :  { %v3803_v26 = vsub.f32 %v3794_v31, %v3802_v35 }
 0xc2e   :  { %v3804_v56 = vmul.f32 1.442695, %v3803_v26 }
 0xc30   :  { %4918 = vpow2.f32 %v3804_v56 }
 0xc3a   :  { %v4919_v10 = vpop.eup %4918 }
 0xc3b   :  { %v3806_v17 = vsel %vm3799_vm10, %v4919_v10, 0.0 }
 0xc3c   :  { %3807 = vadd.xlane.f32.xlu1 %v3806_v17 }
 0xcc9   :  { %v3808_v33 = vpop.xlane.xlu1 %3807 }
 0xcca   :  { %4920 = vrcp.f32 %v3808_v33 }
 0xcd4   :  { %v4921_v5 = vpop.eup %4920 }
 0xcd5   :  { %v3810_v11 = vmul.f32 %v4921_v5, %v4919_v10 }
 0xcd7   :  { %3839 = vperm.xlu1 %4634, %v3810_v11   ;;  %3813 = vperm.xlu0 %4633, %v3810_v11  }
 0xcdb   :  { %4635 = vset.pattern.permute.xlu0 %v5175_v23 }
 0xd56   :  { %v6730_v29 = vpop.permute.xlu1 %3839  ;;  %v6732_v52 = vpop.permute.xlu0 %3813 }
 0xd57   :  { %v3842_v63 = vrot.slane %v6730_v29, 1  ;;  %v3843_v24 = vrot.slane %v6730_v29, 2  ;;  %v3844_v6 = vrot.slane %v6730_v29, 3  ;;  %v3845_v4 = vrot.slane %v6730_v29, 4 }
 0xd58   :  { %v3846_v21 = vrot.slane %v6730_v29, 5  ;;  %v3847_v41 = vrot.slane %v6730_v29, 6  ;;  %v3856_v39 = vmul.f32 %v6730_v29, %v6632_v18  ;;  %v3816_v43 = vrot.slane %v6732_v52, 1 }
 0xd59   :  { %v3857_v61 = vmul.f32 %v3842_v63, %v6634_v20  ;;  %v3858_v16 = vmul.f32 %v3843_v24, %v6639_v47  ;;  %v3859_v15 = vmul.f32 %v3844_v6, %v6643_v25  ;;  %v3860_v7 = vmul.f32 %v3845_v4, %v6647_v57 }
 0xd5a   :  { %v3817_v22 = vrot.slane %v6732_v52, 2  ;;  %v3818_v44 = vrot.slane %v6732_v52, 3  ;;  %v3819_v19 = vrot.slane %v6732_v52, 4  ;;  %v3820_v2 = vrot.slane %v6732_v52, 5 }
 0xd5b   :  { %v3821_v18 = vrot.slane %v6732_v52, 6  ;;  %v3830_v55 = vmul.f32 %v6732_v52, %v6489_v49  ;;  %v3831_v20 = vmul.f32 %v3816_v43, %v6499_v48  ;;  %v3822_v47 = vrot.slane %v6732_v52, 7 }
 0xd5c   :  { %v3832_v25 = vmul.f32 %v3817_v22, %v6515_v32  ;;  %v3833_v57 = vmul.f32 %v3818_v44, %v6525_v30  ;;  %v3834_v27 = vmul.f32 %v3819_v19, %v6541_v3  ;;  %v3835_v1 = vmul.f32 %v3820_v2, %v6551_v51 }
 0xd5d   :  { %v3864_v62 = vadd.f32 %v3856_v39, %v3830_v55  ;;  %v3865_v40 = vadd.f32 %v3857_v61, %v3831_v20  ;;  %v3836_v60 = vmul.f32 %v3821_v18, %v6567_v46  ;;  %v3837_v8 = vmul.f32 %v3822_v47, %v6577_v54 }
 0xd5e   :  { %v3866_v45 = vadd.f32 %v3858_v16, %v3832_v25  ;;  %v3848_v49 = vrot.slane %v6730_v29, 7  ;;  %v3861_v48 = vmul.f32 %v3846_v21, %v6651_v0  ;;  %v3862_v31 = vmul.f32 %v3847_v41, %v6662_v13  ;;  %v4194_v16 = vld [vmem:[#allocation16] ss:$0 sm:$0xff] }
 0xd5f   :  { %v3872_v32 = vpack.c.bf16 %v3864_v62, %v3864_v62  ;;  %v3873_v37 = vpack.c.bf16 %v3865_v40, %v3865_v40  ;;  %v3867_v30 = vadd.f32 %v3859_v15, %v3833_v57  ;;  %v3868_v50 = vadd.f32 %v3860_v7, %v3834_v27 }
 0xd60   :  { %v3874_v3 = vpack.c.bf16 %v3866_v45, %v3866_v45  ;;  %v3863_v51 = vmul.f32 %v3848_v49, %v6672_v34  ;;  %v3869_v38 = vadd.f32 %v3861_v48, %v3835_v1  ;;  %v3870_v53 = vadd.f32 %v3862_v31, %v3836_v60 }
 0xd61   :  { %v3912_v35 = vunpack.c.l.b16 %v3873_v37  ;;  %v3875_v46 = vpack.c.bf16 %v3867_v30, %v3867_v30  ;;  %v3876_v26 = vpack.c.bf16 %v3868_v50, %v3868_v50  ;;  %v3911_v23 = vunpack.c.l.b16 %v3872_v32 }
 0xd62   :  { %v3871_v54 = vadd.f32 %v3863_v51, %v3837_v8  ;;  %v3877_v56 = vpack.c.bf16 %v3869_v38, %v3869_v38  ;;  %v3878_v10 = vpack.c.bf16 %v3870_v53, %v3870_v53  ;;  %v3913_v17 = vunpack.c.l.b16 %v3874_v3 }
 0xd63   :  { %v3919_v0 = vrot.slane %v3912_v35, 7  ;;  %v3914_v28 = vunpack.c.l.b16 %v3875_v46  ;;  %v3915_v13 = vunpack.c.l.b16 %v3876_v26  ;;  %v6873_v43 = vlaneseq }
 0xd64   :  { %v3879_v42 = vpack.c.bf16 %v3871_v54, %v3871_v54  ;;  %v3916_v58 = vunpack.c.l.b16 %v3877_v56  ;;  %v3917_v33 = vunpack.c.l.b16 %v3878_v10  ;;  %v3921_v5 = vrot.slane %v3913_v17, 6 }
 0xd65   :  { %v3920_v11 = vsel %vm3465_vm3, %v3919_v0, %v3911_v23  ;;  %v3923_v34 = vrot.slane %v3914_v28, 5  ;;  %v3925_v12 = vrot.slane %v3915_v13, 4  ;;  %v4024_v61 = vand.u32 127, %v6873_v43 }
 0xd66   :  { %v3918_v9 = vunpack.c.l.b16 %v3879_v42  ;;  %v3922_v59 = vsel %vm3468_vm4, %v3921_v5, %v3920_v11  ;;  %v3927_v36 = vrot.slane %v3916_v58, 3  ;;  %v3929_v24 = vrot.slane %v3917_v33, 2 }
 0xd67   :  { %v3924_v14 = vsel %vm3471_vm5, %v3923_v34, %v3922_v59  ;;  %vm4025_vm11 = vcmp.eq.s32.totalorder %v4024_v61, 7  ;;  %vm4028_vm12 = vcmp.eq.s32.totalorder %v4024_v61, 8 }
 0xd68   :  { %v3926_v63 = vsel %vm3474_vm6, %v3925_v12, %v3924_v14  ;;  %v3931_v4 = vrot.slane %v3918_v9, 1  ;;  %v4026_v44 = vsel %vm4025_vm11, %v6732_v52, 0.0  ;;  %v4029_v55 = vsel %vm4028_vm12, %v6730_v29, 0.0 }
 0xd69   :  { %v3928_v6 = vsel %vm3477_vm7, %v3927_v36, %v3926_v63 }
 0xd6a   :  { %v3930_v21 = vsel %vm3480_vm8, %v3929_v24, %v3928_v6 }
 0xd6b   :  { %v3932_v41 = vsel %vm3483_vm9, %v3931_v4, %v3930_v21 }
 0xd6c   :  { %v3933_v39 = vpack.c.b16 %v3932_v41, %v3932_v41 }
 0xd6e   :  { %4616 = vmatmul.mubr.bf16.vlgmr.msra.gmra.mrb[88].mxu0 %v3933_v39 }
 0xe41   :  { %v4017_v15 = vpop.f32.mrb[88].mxu0 }
 0xe42   :  { %v4018_v7 = vadd.f32 %v4194_v16, %v4017_v15  ;;  %v4617_v22 = vpop.f32.mrb[89].mxu0 }
 0xe43   :  { %v4020_v19 = vpop.f32.mrb[90].mxu0 }
 0xe44   :  { %v4027_v2 = vadd.f32 %v4026_v44, %v4018_v7  ;;  %v4618_v18 = vpop.f32.mrb[91].mxu0 }
 0xe46   :  { %v4030_v20 = vadd.f32 %v4029_v55, %v4027_v2 }
 0xe48   :  { %4031 = vst [vmem:[%s6800_s21] sm:$0xff] %v4030_v20 }
 0xe49   :  { %4036 = vsyncpa [#allocation3], 1 }
 0xe4a   :  { %4037 = vsyncpa [#allocation5], 1 }
 0xe4b   :  { %4038 = vsyncpa [#allocation8], 1 }
 0xe4c   :  { %4039 = vsyncpa [#allocation11], 1 }
 0xe4d   :  { %4040 = vsyncpa [#allocation14], 1 }
 0xe4e   :  { %4041 = vsyncpa [#allocation17], 1 }

</bundles_post_ra>
